<compile_context>
chip_gen: v7x
topology: tpu7x:2x2x1
jax: 0.10.0
libtpu: 0.0.40
codegen_flags: <defaults>
</compile_context>

<pallas_src>
import functools
import math

import jax
import jax.numpy as jnp
from jax.experimental import pallas as pl
from jax.experimental.pallas import tpu as pltpu

_COMPUTE_DTYPE = jnp.bfloat16      # MXU operand / residual-stream dtype (fp32 accumulation)
_ATT_DTYPE = jnp.bfloat16          # dtype of the returned attention maps
_VMEM_LIMIT = 64 * 1024 * 1024     # explicit scoped-VMEM limit for every pallas_call


# ------------------------------ tiling helpers ------------------------------

def _pick_divisor_tile(dim, pref, align):
    """Largest multiple of `align` that divides `dim` and is <= pref, else full dim.
    Used for axes that must divide exactly (K / reduction axes, Tq)."""
    if dim <= pref:
        return dim
    t = max(align, (pref // align) * align)
    while t >= align:
        if dim % t == 0:
            return t
        t -= align
    return dim


def _pick_edge_tile(dim, pref, align):
    """Tile for a maskable axis (M or N of a matmul / LN rows): exact divisor if one
    exists, otherwise a pref-sized aligned tile with a Pallas-masked edge block
    (the grid uses pl.cdiv) - no more block==full-dim fallback for huge vocabs."""
    if dim <= pref:
        return dim
    t = max(align, (pref // align) * align)
    s = t
    while s >= align:
        if dim % s == 0:
            return s
        s -= align
    return t


def _pick_hblk(n_head, head_dim):
    """Smallest head group whose lane width is a multiple of 128 (lane-dense stores);
    fall back to all heads (block width == full channel dim)."""
    for d in range(1, n_head + 1):
        if n_head % d == 0 and (d * head_dim) % 128 == 0:
            return d
    return n_head


# ------------------------------- Pallas kernels ------------------------------

def _matmul_kernel(*refs, activation, transpose_w, has_bias, has_residual):
    idx = 0
    x_ref = refs[idx]; idx += 1
    w_ref = refs[idx]; idx += 1
    b_ref = None
    r_ref = None
    if has_bias:
        b_ref = refs[idx]; idx += 1
    if has_residual:
        r_ref = refs[idx]; idx += 1
    o_ref = refs[idx]; idx += 1
    acc_ref = refs[idx]

    @pl.when(pl.program_id(2) == 0)
    def _():
        acc_ref[...] = jnp.zeros_like(acc_ref)

    if transpose_w:
        # w block is (tn, tk): contract the last dims -> no transposed weight copy in HBM.
        # TODO(synk): if the Mosaic dump shows a per-K-step vxpose of this block,
        # pre-transpose the weight once per forward into a bf16 (K, N) buffer instead.
        acc_ref[...] += jax.lax.dot_general(
            x_ref[...], w_ref[...],
            dimension_numbers=(((1,), (1,)), ((), ())),
            preferred_element_type=jnp.float32)
    else:
        acc_ref[...] += jnp.dot(x_ref[...], w_ref[...],
                                preferred_element_type=jnp.float32)

    @pl.when(pl.program_id(2) == pl.num_programs(2) - 1)
    def _():
        h = acc_ref[...]
        if has_bias:
            h = h + b_ref[...]                      # bias added once, in the finalize branch
        if activation == "gelu":
            # TODO(synk): PyTorch nn.GELU() default is the exact erf form; the tanh
            # approximation (nanoGPT new_gelu) is used here.
            c = math.sqrt(2.0 / math.pi)
            h = 0.5 * h * (1.0 + jnp.tanh(c * (h + 0.044715 * h * h * h)))
        if has_residual:
            h = h + r_ref[...].astype(jnp.float32)  # fused residual add (no extra HBM pass)
        o_ref[...] = h.astype(o_ref.dtype)


def _layernorm_kernel(x_ref, g_ref, b_ref, o_ref):
    x = x_ref[...].astype(jnp.float32)              # bf16 stream, fp32 statistics
    mu = jnp.mean(x, axis=-1, keepdims=True)
    var = jnp.mean((x - mu) ** 2, axis=-1, keepdims=True)
    y = (x - mu) * jax.lax.rsqrt(var + 1e-5)
    o_ref[...] = (y * g_ref[...] + b_ref[...]).astype(o_ref.dtype)


def _attention_kernel(*refs, scale, hblk, hd, q_col, k_col, v_col, mask_mode, tq):
    idx = 0
    q_ref = refs[idx]; idx += 1
    k_ref = refs[idx]; idx += 1
    v_ref = refs[idx]; idx += 1
    m_ref = None
    if mask_mode == "tensor":
        m_ref = refs[idx]; idx += 1
    o_ref = refs[idx]; idx += 1
    att_ref = refs[idx]

    Tk = k_ref.shape[1]

    keep = None
    if mask_mode == "causal":
        # causal mask generated in-kernel (VALU compare/select), no fp32 tril DMA
        t0 = pl.program_id(2) * tq
        rows = jax.lax.broadcasted_iota(jnp.int32, (tq, Tk), 0) + t0
        cols = jax.lax.broadcasted_iota(jnp.int32, (tq, Tk), 1)
        keep = rows >= cols
    elif mask_mode == "tensor":
        keep = m_ref[0] > 0                         # (tq, Tk) or (1, Tk); broadcasts over rows

    # hblk is capped at the minimum lane-dense head group, so the static unroll only
    # keeps a bounded number of (tq, Tk) fp32 temporaries live.
    for j in range(hblk):
        q = q_ref[0, :, q_col + j * hd: q_col + (j + 1) * hd]     # (tq, hd) bf16
        kk = k_ref[0, :, k_col + j * hd: k_col + (j + 1) * hd]    # (Tk, hd) bf16
        vv = v_ref[0, :, v_col + j * hd: v_col + (j + 1) * hd]    # (Tk, hd) bf16
        s = jax.lax.dot_general(q, kk, (((1,), (1,)), ((), ())),
                                preferred_element_type=jnp.float32) * scale
        if keep is not None:
            s = jnp.where(keep, s, jnp.float32(-1e30))
        smax = jnp.max(s, axis=-1, keepdims=True)
        # bf16 exp (EUP bf16 path on v6e/v7x); denominator stays fp32.
        e = jnp.exp((s - smax).astype(jnp.bfloat16)).astype(jnp.float32)
        denom = jnp.sum(e, axis=-1, keepdims=True)
        att = e * pl.reciprocal(denom, approx=True)               # EUP, not VALU divide
        att_ref[0, j] = att.astype(att_ref.dtype)
        o_ref[0, :, j * hd:(j + 1) * hd] = jnp.dot(
            att.astype(vv.dtype), vv,
            preferred_element_type=jnp.float32).astype(o_ref.dtype)


# ------------------------------ Pallas wrappers ------------------------------

def linear(x2d, w, b=None, *, residual=None, activation=None, transpose_w=False,
           out_dtype=_COMPUTE_DTYPE, tm=256, tn=512, tk=1024):
    """y = x2d @ w (+ b) (+ residual)   x2d: (M,K); w: (K,N) or (N,K) if transpose_w."""
    M, K = x2d.shape
    N = w.shape[0] if transpose_w else w.shape[1]
    tm = _pick_edge_tile(M, tm, 16)        # 16-row alignment for bf16 sublane packing
    tn = _pick_edge_tile(N, tn, 256)       # 256-aligned for the 2x256 MXU (v6e/v7x)
    tk = _pick_divisor_tile(K, tk, 256)    # K must divide exactly (accumulation axis)

    x2d = x2d.astype(_COMPUTE_DTYPE)
    w = w.astype(_COMPUTE_DTYPE)

    in_specs = [pl.BlockSpec((tm, tk), lambda i, j, k: (i, k))]
    if transpose_w:
        in_specs.append(pl.BlockSpec((tn, tk), lambda i, j, k: (j, k)))
    else:
        in_specs.append(pl.BlockSpec((tk, tn), lambda i, j, k: (k, j)))
    operands = [x2d, w]

    has_bias = b is not None
    if has_bias:
        in_specs.append(pl.BlockSpec((1, tn), lambda i, j, k: (0, j)))
        operands.append(b.reshape(1, N).astype(jnp.float32))

    has_residual = residual is not None
    if has_residual:
        in_specs.append(pl.BlockSpec((tm, tn), lambda i, j, k: (i, j)))
        operands.append(residual.astype(_COMPUTE_DTYPE))

    kernel = functools.partial(_matmul_kernel, activation=activation,
                               transpose_w=transpose_w, has_bias=has_bias,
                               has_residual=has_residual)
    return pl.pallas_call(
        kernel,
        out_shape=jax.ShapeDtypeStruct((M, N), out_dtype),
        grid=(pl.cdiv(M, tm), pl.cdiv(N, tn), K // tk),
        in_specs=in_specs,
        out_specs=pl.BlockSpec((tm, tn), lambda i, j, k: (i, j)),
        scratch_shapes=[pltpu.VMEM((tm, tn), jnp.float32)],
        compiler_params=pltpu.CompilerParams(
            dimension_semantics=("parallel", "parallel", "arbitrary"),
            vmem_limit_bytes=_VMEM_LIMIT),
    )(*operands)


def layernorm(x2d, g, b, *, out_dtype=_COMPUTE_DTYPE, tm=1024):
    M, C = x2d.shape
    tm = _pick_edge_tile(M, tm, 16)
    return pl.pallas_call(
        _layernorm_kernel,
        out_shape=jax.ShapeDtypeStruct((M, C), out_dtype),
        grid=(pl.cdiv(M, tm),),
        in_specs=[pl.BlockSpec((tm, C), lambda i: (i, 0)),
                  pl.BlockSpec((1, C), lambda i: (0, 0)),
                  pl.BlockSpec((1, C), lambda i: (0, 0))],
        out_specs=pl.BlockSpec((tm, C), lambda i: (i, 0)),
        compiler_params=pltpu.CompilerParams(
            dimension_semantics=("parallel",),
            vmem_limit_bytes=_VMEM_LIMIT),
    )(x2d.astype(_COMPUTE_DTYPE), g.reshape(1, C).astype(jnp.float32),
      b.reshape(1, C).astype(jnp.float32))


def attention(q_arr, k_arr, v_arr, *, n_head, n_embd,
              q_head_off=0, k_head_off=0, v_head_off=0,
              mask=None, causal=False, tq_pref=256,
              out_dtype=_COMPUTE_DTYPE, att_dtype=_ATT_DTYPE):
    """q_arr: (B,Tq,Wq), k_arr/v_arr: (B,Tk,Wk).  The heads for each operand live at
    columns [head_off*hd, head_off*hd + n_embd), which lets fused qkv / kv buffers be
    sliced purely via BlockSpec index maps (no XLA slice copies).
    mask: (1,Tq,Tk) shared, (B,1,Tk) key mask, or (B,Tq,Tk); ignored when causal=True.
    Returns (out (B,Tq,n_embd), att (B,n_head,Tq,Tk))."""
    B, Tq, _ = q_arr.shape
    Tk = k_arr.shape[1]
    hd = n_embd // n_head
    hblk = _pick_hblk(n_head, hd)
    nhb = n_head // hblk
    scale = 1.0 / math.sqrt(hd)
    tq = _pick_divisor_tile(Tq, tq_pref, 8)     # Tq tile bounds fp32 score temporaries
    width = hblk * hd
    lane_dense = (width % 128 == 0)

    def make_in_spec(arr, head_off, is_q):
        rows = tq if is_q else Tk
        if lane_dense:
            blk0 = head_off // hblk            # head-window addressed by block index
            if is_q:
                spec = pl.BlockSpec((1, rows, width),
                                    lambda b, h, t, blk0=blk0: (b, t, blk0 + h))
            else:
                spec = pl.BlockSpec((1, rows, width),
                                    lambda b, h, t, blk0=blk0: (b, 0, blk0 + h))
            return spec, 0
        # small-C fallback: hblk == n_head, single head-block; take the full last dim
        # and offset columns statically inside the kernel (free static ref slices).
        full = arr.shape[-1]
        if is_q:
            spec = pl.BlockSpec((1, rows, full), lambda b, h, t: (b, t, 0))
        else:
            spec = pl.BlockSpec((1, rows, full), lambda b, h, t: (b, 0, 0))
        return spec, head_off * hd

    q_spec, q_col = make_in_spec(q_arr, q_head_off, True)
    k_spec, k_col = make_in_spec(k_arr, k_head_off, False)
    v_spec, v_col = make_in_spec(v_arr, v_head_off, False)

    in_specs = [q_spec, k_spec, v_spec]
    operands = [q_arr.astype(_COMPUTE_DTYPE), k_arr.astype(_COMPUTE_DTYPE),
                v_arr.astype(_COMPUTE_DTYPE)]

    if causal:
        mask_mode = "causal"
    elif mask is not None:
        mask_mode = "tensor"
        mask = mask.astype(_COMPUTE_DTYPE)      # bf16 mask halves the DMA vs fp32
        Bm, Tqm = mask.shape[0], mask.shape[1]
        m_rows = tq if Tqm == Tq else 1
        in_specs.append(pl.BlockSpec(
            (1, m_rows, Tk),
            lambda b, h, t, Bm=Bm, Tqm=Tqm: (b if Bm > 1 else 0,
                                             t if Tqm > 1 else 0, 0)))
        operands.append(mask)
    else:
        mask_mode = "none"

    kernel = functools.partial(_attention_kernel, scale=scale, hblk=hblk, hd=hd,
                               q_col=q_col, k_col=k_col, v_col=v_col,
                               mask_mode=mask_mode, tq=tq)
    out, att = pl.pallas_call(
        kernel,
        out_shape=(jax.ShapeDtypeStruct((B, Tq, n_embd), out_dtype),
                   jax.ShapeDtypeStruct((B, n_head, Tq, Tk), att_dtype)),
        grid=(B, nhb, Tq // tq),
        in_specs=in_specs,
        out_specs=(pl.BlockSpec((1, tq, width), lambda b, h, t: (b, t, h)),
                   pl.BlockSpec((1, hblk, tq, Tk), lambda b, h, t: (b, h, t, 0))),
        compiler_params=pltpu.CompilerParams(
            dimension_semantics=("parallel", "parallel", "parallel"),
            vmem_limit_bytes=_VMEM_LIMIT),
    )(*operands)
    return out, att


# ------------------------------- Model (glue) --------------------------------

def decoder_block(p, x, enc_output, src_mask, tgt_mask, n_head, causal_tgt):
    B, T, C = x.shape
    x2d = x.reshape(B * T, C)                       # bf16 residual stream

    # --- causal self-attention (pre-LN, residual fused into the projection) ---
    xn = layernorm(x2d, p["ln1_g"], p["ln1_b"])
    qkv = linear(xn, p["attn_w"], p["attn_b"])      # fused (M, 3C): xn & weight read once
    qkv3 = qkv.reshape(B, T, 3 * C)
    tmask = None
    if (not causal_tgt) and (tgt_mask is not None):
        tmask = tgt_mask.reshape(1, T, T)
    y, dec_attn = attention(qkv3, qkv3, qkv3, n_head=n_head, n_embd=C,
                            q_head_off=0, k_head_off=n_head, v_head_off=2 * n_head,
                            mask=tmask, causal=causal_tgt)
    x2d = linear(y.reshape(B * T, C), p["attn_proj_w"], p["attn_proj_b"],
                 residual=x2d)

    # --- cross-attention with encoder output ---
    cross_attn = None
    if enc_output is not None:
        Te = enc_output.shape[1]
        xn = layernorm(x2d, p["ln2_g"], p["ln2_b"])
        qc = linear(xn, p["cq_w"], p["cq_b"])
        kv = linear(enc_output.reshape(B * Te, C), p["ckv_w"], p["ckv_b"])  # fused (M_enc, 2C)
        kv3 = kv.reshape(B, Te, 2 * C)
        smask = None if src_mask is None else src_mask.reshape(B, 1, Te)
        yc, cross_attn = attention(qc.reshape(B, T, C), kv3, kv3, n_head=n_head,
                                   n_embd=C, q_head_off=0, k_head_off=0,
                                   v_head_off=n_head, mask=smask)
        x2d = linear(yc.reshape(B * T, C), p["cproj_w"], p["cproj_b"],
                     residual=x2d)

    # --- MLP (GELU in the fc finalize, residual fused into the mproj finalize) ---
    xn = layernorm(x2d, p["ln3_g"], p["ln3_b"])
    h = linear(xn, p["fc_w"], p["fc_b"], activation="gelu")
    x2d = linear(h, p["mproj_w"], p["mproj_b"], residual=x2d)
    return x2d.reshape(B, T, C), dec_attn, cross_attn


def decoder_forward(params, idx, enc_output=None, src_mask=None, tgt_mask=None,
                    *, n_head, causal_tgt=False):
    B, T = idx.shape
    V, C = params["wte"].shape
    tok_emb = params["wte"][idx]                    # (B, T, C) gather (plain-JAX glue)
    pos_emb = params["wpe"][jnp.arange(T)]          # (T, C)
    # residual stream kept in bf16; dropout p=0 (eval mode)
    x = (tok_emb + pos_emb).astype(_COMPUTE_DTYPE)
    dec_attns, cross_attns = [], []
    for blk in params["blocks"]:
        x, da, ca = decoder_block(blk, x, enc_output, src_mask, tgt_mask,
                                  n_head, causal_tgt)
        dec_attns.append(da)
        cross_attns.append(ca)
    xf = layernorm(x.reshape(B * T, C), params["ln_f_g"], params["ln_f_b"])
    # lm_head: weight tied with wte (V, C); transposed contraction inside the kernel,
    # tiled (and edge-masked) over the vocab axis with full-K accumulation.
    logits = linear(xf, params["wte"], None, transpose_w=True,
                    out_dtype=jnp.float32, tm=256, tn=512, tk=2048)
    return logits.reshape(B, T, V), dec_attns, cross_attns


# ------------------------------ Parameter init -------------------------------

def init_params(key, *, vocab_size, block_size, n_embd, n_layer):
    C = n_embd
    std = 0.02
    proj_std = 0.02 / math.sqrt(2 * n_layer)        # c_proj.weight special init
    keys = iter(jax.random.split(key, 128))

    def nrm(shape, s=std):
        return (s * jax.random.normal(next(keys), shape)).astype(jnp.float32)

    params = {
        "wte": nrm((vocab_size, C)),                # shared with lm_head (weight tying)
        "wpe": nrm((block_size, C)),
        "ln_f_g": jnp.ones((C,), jnp.float32),
        "ln_f_b": jnp.zeros((C,), jnp.float32),
        "blocks": [],
    }
    for _ in range(n_layer):
        blk = {
            "ln1_g": jnp.ones((C,), jnp.float32), "ln1_b": jnp.zeros((C,), jnp.float32),
            "attn_w": nrm((C, 3 * C)), "attn_b": jnp.zeros((3 * C,), jnp.float32),
            "attn_proj_w": nrm((C, C), proj_std), "attn_proj_b": jnp.zeros((C,), jnp.float32),
            "ln2_g": jnp.ones((C,), jnp.float32), "ln2_b": jnp.zeros((C,), jnp.float32),
            "cq_w": nrm((C, C)), "cq_b": jnp.zeros((C,), jnp.float32),
            "ckv_w": nrm((C, 2 * C)), "ckv_b": jnp.zeros((2 * C,), jnp.float32),
            "cproj_w": nrm((C, C), proj_std), "cproj_b": jnp.zeros((C,), jnp.float32),
            "ln3_g": jnp.ones((C,), jnp.float32), "ln3_b": jnp.zeros((C,), jnp.float32),
            "fc_w": nrm((C, 4 * C)), "fc_b": jnp.zeros((4 * C,), jnp.float32),
            "mproj_w": nrm((4 * C, C), proj_std), "mproj_b": jnp.zeros((C,), jnp.float32),
        }
        params["blocks"].append(blk)
    return params


# ----------------------------------- Main ------------------------------------

if __name__ == "__main__":
    # small config consistent with Decoder.forward
    vocab_size, block_size, n_embd, n_head, n_layer = 64, 8, 32, 4, 2
    B, T, T_enc = 2, 8, 8

    key = jax.random.PRNGKey(0)
    k_param, k_idx, k_enc = jax.random.split(key, 3)

    params = init_params(k_param, vocab_size=vocab_size, block_size=block_size,
                         n_embd=n_embd, n_layer=n_layer)

    idx = jax.random.randint(k_idx, (B, T), 0, vocab_size, dtype=jnp.int32)
    enc_output = (0.02 * jax.random.normal(k_enc, (B, T_enc, n_embd))).astype(jnp.float32)
    src_mask = jnp.ones((B, 1, T_enc), jnp.float32)   # exercises the tensor-mask path
    # causal target mask generated in-kernel (causal_tgt=True); tensor tgt masks still
    # supported via tgt_mask + causal_tgt=False.

    fwd = jax.jit(functools.partial(decoder_forward, n_head=n_head, causal_tgt=True))
    logits, dec_attns, cross_attns = fwd(params, idx, enc_output=enc_output,
                                         src_mask=src_mask, tgt_mask=None)

    jax.block_until_ready(logits)
    for a in dec_attns + [c for c in cross_attns if c is not None]:
        jax.block_until_ready(a)

    assert logits.shape == (B, T, vocab_size)
    assert dec_attns[0].shape == (B, n_head, T, T)
    assert cross_attns[0].shape == (B, n_head, T, T_enc)
    assert bool(jnp.isfinite(logits).all())
    print("KERNEL_OK")
</pallas_src>

<mosaic_0001>
module attributes {stable_mosaic.version = 11 : i64} {
  func.func @_layernorm_kernel(%arg0: i32, %arg1: memref<16x32xbf16, #tpu.memory_space<vmem>>, %arg2: memref<1x32xf32, #tpu.memory_space<vmem>>, %arg3: memref<1x32xf32, #tpu.memory_space<vmem>>, %arg4: memref<16x32xbf16, #tpu.memory_space<vmem>>) attributes {dimension_semantics = [#tpu.dimension_semantics<parallel>], iteration_bounds = array<i64: 1>, scalar_prefetch = 0 : i64, scratch_operands = 0 : i64, tpu.core_type = #tpu.core_type<tc>, window_params = [{transform_indices = @transform_0, window_bounds = array<i64: 16, 32>}, {pipeline_mode = #tpu.pipeline_mode<synchronous>, transform_indices = @transform_1, window_bounds = array<i64: 1, 32>}, {pipeline_mode = #tpu.pipeline_mode<synchronous>, transform_indices = @transform_2, window_bounds = array<i64: 1, 32>}, {transform_indices = @transform_3, window_bounds = array<i64: 16, 32>}]} {
    %c0 = arith.constant 0 : index
    %c0_0 = arith.constant 0 : index
    %0 = vector.load %arg1[%c0, %c0_0] : memref<16x32xbf16, #tpu.memory_space<vmem>>, vector<16x32xbf16>
    %1 = arith.extf %0 : vector<16x32xbf16> to vector<16x32xf32>
    %cst = arith.constant dense<0.000000e+00> : vector<16xf32>
    %2 = vector.multi_reduction <add>, %1, %cst [1] : vector<16x32xf32> to vector<16xf32>
    %3 = vector.shape_cast %2 : vector<16xf32> to vector<16x1xf32>
    %cst_1 = arith.constant 3.200000e+01 : f32
    %4 = vector.broadcast %cst_1 : f32 to vector<16x1xf32>
    %5 = arith.divf %3, %4 : vector<16x1xf32>
    %6 = vector.broadcast %5 : vector<16x1xf32> to vector<16x32xf32>
    %7 = arith.subf %1, %6 : vector<16x32xf32>
    %8 = arith.mulf %7, %7 : vector<16x32xf32>
    %cst_2 = arith.constant dense<0.000000e+00> : vector<16xf32>
    %9 = vector.multi_reduction <add>, %8, %cst_2 [1] : vector<16x32xf32> to vector<16xf32>
    %10 = vector.shape_cast %9 : vector<16xf32> to vector<16x1xf32>
    %cst_3 = arith.constant 3.200000e+01 : f32
    %11 = vector.broadcast %cst_3 : f32 to vector<16x1xf32>
    %12 = arith.divf %10, %11 : vector<16x1xf32>
    %13 = vector.broadcast %5 : vector<16x1xf32> to vector<16x32xf32>
    %14 = arith.subf %1, %13 : vector<16x32xf32>
    %cst_4 = arith.constant 9.99999974E-6 : f32
    %15 = vector.broadcast %cst_4 : f32 to vector<16x1xf32>
    %16 = arith.addf %12, %15 : vector<16x1xf32>
    %17 = math.rsqrt %16 : vector<16x1xf32>
    %18 = vector.broadcast %17 : vector<16x1xf32> to vector<16x32xf32>
    %19 = arith.mulf %14, %18 : vector<16x32xf32>
    %c0_5 = arith.constant 0 : index
    %c0_6 = arith.constant 0 : index
    %20 = vector.load %arg2[%c0_5, %c0_6] : memref<1x32xf32, #tpu.memory_space<vmem>>, vector<1x32xf32>
    %21 = vector.broadcast %20 : vector<1x32xf32> to vector<16x32xf32>
    %22 = arith.mulf %19, %21 : vector<16x32xf32>
    %c0_7 = arith.constant 0 : index
    %c0_8 = arith.constant 0 : index
    %23 = vector.load %arg3[%c0_7, %c0_8] : memref<1x32xf32, #tpu.memory_space<vmem>>, vector<1x32xf32>
    %24 = vector.broadcast %23 : vector<1x32xf32> to vector<16x32xf32>
    %25 = arith.addf %22, %24 : vector<16x32xf32>
    %26 = arith.truncf %25 : vector<16x32xf32> to vector<16x32xbf16>
    %c0_9 = arith.constant 0 : index
    %c0_10 = arith.constant 0 : index
    %27 = vector.load %arg4[%c0_9, %c0_10] : memref<16x32xbf16, #tpu.memory_space<vmem>>, vector<16x32xbf16>
    tpu.vector_store %arg4[%c0_9, %c0_10], %26 {strides = array<i32>} : memref<16x32xbf16, #tpu.memory_space<vmem>>, vector<16x32xbf16>,
    return
  }
  func.func @transform_0(%arg0: i32) -> (i32, i32) {
    %c0_i32 = arith.constant 0 : i32
    %c0_i32_0 = arith.constant 0 : i32
    return %arg0, %c0_i32 : i32, i32
  }
  func.func @transform_1(%arg0: i32) -> (i32, i32) {
    %c0_i32 = arith.constant 0 : i32
    %c0_i32_0 = arith.constant 0 : i32
    %c0_i32_1 = arith.constant 0 : i32
    return %c0_i32, %c0_i32_0 : i32, i32
  }
  func.func @transform_2(%arg0: i32) -> (i32, i32) {
    %c0_i32 = arith.constant 0 : i32
    %c0_i32_0 = arith.constant 0 : i32
    %c0_i32_1 = arith.constant 0 : i32
    return %c0_i32, %c0_i32_0 : i32, i32
  }
  func.func @transform_3(%arg0: i32) -> (i32, i32) {
    %c0_i32 = arith.constant 0 : i32
    %c0_i32_0 = arith.constant 0 : i32
    return %arg0, %c0_i32 : i32, i32
  }
}

module attributes {stable_mosaic.version = 11 : i64} {
  func.func @_matmul_kernel(%arg0: i32, %arg1: i32, %arg2: i32, %arg3: memref<16x32xbf16, #tpu.memory_space<vmem>>, %arg4: memref<32x96xbf16, #tpu.memory_space<vmem>>, %arg5: memref<1x96xf32, #tpu.memory_space<vmem>>, %arg6: memref<16x96xbf16, #tpu.memory_space<vmem>>, %arg7: memref<16x96xf32, #tpu.memory_space<vmem>>) attributes {dimension_semantics = [#tpu.dimension_semantics<parallel>, #tpu.dimension_semantics<parallel>, #tpu.dimension_semantics<arbitrary>], iteration_bounds = array<i64: 1, 1, 1>, scalar_prefetch = 0 : i64, scratch_operands = 1 : i64, tpu.core_type = #tpu.core_type<tc>, window_params = [{transform_indices = @transform_0, window_bounds = array<i64: 16, 32>}, {transform_indices = @transform_1, window_bounds = array<i64: 32, 96>}, {transform_indices = @transform_2, window_bounds = array<i64: 1, 96>}, {transform_indices = @transform_3, window_bounds = array<i64: 16, 96>}]} {
    %c0_i32 = arith.constant 0 : i32
    %0 = arith.cmpi eq, %arg2, %c0_i32 : i32
    %1 = arith.extui %0 : i1 to i32
    %c0_i32_0 = arith.constant 0 : i32
    %2 = arith.cmpi ne, %1, %c0_i32_0 : i32
    scf.if %2 {
      %cst_10 = arith.constant 0.000000e+00 : f32
      %12 = vector.broadcast %cst_10 : f32 to vector<16x96xf32>
      %c0_11 = arith.constant 0 : index
      %c0_12 = arith.constant 0 : index
      %13 = vector.load %arg7[%c0_11, %c0_12] : memref<16x96xf32, #tpu.memory_space<vmem>>, vector<16x96xf32>
      tpu.vector_store %arg7[%c0_11, %c0_12], %12 {strides = array<i32>} : memref<16x96xf32, #tpu.memory_space<vmem>>, vector<16x96xf32>,
    } else {
    }
    %c0 = arith.constant 0 : index
    %c0_1 = arith.constant 0 : index
    %3 = vector.load %arg7[%c0, %c0_1] : memref<16x96xf32, #tpu.memory_space<vmem>>, vector<16x96xf32>
    %c0_2 = arith.constant 0 : index
    %c0_3 = arith.constant 0 : index
    %4 = vector.load %arg3[%c0_2, %c0_3] : memref<16x32xbf16, #tpu.memory_space<vmem>>, vector<16x32xbf16>
    %c0_4 = arith.constant 0 : index
    %c0_5 = arith.constant 0 : index
    %5 = vector.load %arg4[%c0_4, %c0_5] : memref<32x96xbf16, #tpu.memory_space<vmem>>, vector<32x96xbf16>
    %cst = arith.constant dense<0.000000e+00> : vector<16x96xf32>
    %6 = tpu.matmul %4, %5, %cst {dimension_numbers = #tpu.dot_dimension_numbers<[1], [0], [0], [1], [0, 0, 1, 1], [], []>} : vector<16x32xbf16>, vector<32x96xbf16>, vector<16x96xf32> -> vector<16x96xf32>
    %7 = arith.addf %3, %6 : vector<16x96xf32>
    %c0_6 = arith.constant 0 : index
    %c0_7 = arith.constant 0 : index
    %8 = vector.load %arg7[%c0_6, %c0_7] : memref<16x96xf32, #tpu.memory_space<vmem>>, vector<16x96xf32>
    tpu.vector_store %arg7[%c0_6, %c0_7], %7 {strides = array<i32>} : memref<16x96xf32, #tpu.memory_space<vmem>>, vector<16x96xf32>,
    %c0_i32_8 = arith.constant 0 : i32
    %9 = arith.cmpi eq, %arg2, %c0_i32_8 : i32
    %10 = arith.extui %9 : i1 to i32
    %c0_i32_9 = arith.constant 0 : i32
    %11 = arith.cmpi ne, %10, %c0_i32_9 : i32
    scf.if %11 {
      %c0_10 = arith.constant 0 : index
      %c0_11 = arith.constant 0 : index
      %12 = vector.load %arg7[%c0_10, %c0_11] : memref<16x96xf32, #tpu.memory_space<vmem>>, vector<16x96xf32>
      %c0_12 = arith.constant 0 : index
      %c0_13 = arith.constant 0 : index
      %13 = vector.load %arg5[%c0_12, %c0_13] : memref<1x96xf32, #tpu.memory_space<vmem>>, vector<1x96xf32>
      %14 = vector.broadcast %13 : vector<1x96xf32> to vector<16x96xf32>
      %15 = arith.addf %12, %14 : vector<16x96xf32>
      %16 = arith.truncf %15 : vector<16x96xf32> to vector<16x96xbf16>
      %c0_14 = arith.constant 0 : index
      %c0_15 = arith.constant 0 : index
      %17 = vector.load %arg6[%c0_14, %c0_15] : memref<16x96xbf16, #tpu.memory_space<vmem>>, vector<16x96xbf16>
      tpu.vector_store %arg6[%c0_14, %c0_15], %16 {strides = array<i32>} : memref<16x96xbf16, #tpu.memory_space<vmem>>, vector<16x96xbf16>,
    } else {
    }
    return
  }
  func.func @transform_0(%arg0: i32, %arg1: i32, %arg2: i32) -> (i32, i32) {
    %c0_i32 = arith.constant 0 : i32
    return %arg0, %arg2 : i32, i32
  }
  func.func @transform_1(%arg0: i32, %arg1: i32, %arg2: i32) -> (i32, i32) {
    %c0_i32 = arith.constant 0 : i32
    return %arg2, %arg1 : i32, i32
  }
  func.func @transform_2(%arg0: i32, %arg1: i32, %arg2: i32) -> (i32, i32) {
    %c0_i32 = arith.constant 0 : i32
    %c0_i32_0 = arith.constant 0 : i32
    return %c0_i32, %arg1 : i32, i32
  }
  func.func @transform_3(%arg0: i32, %arg1: i32, %arg2: i32) -> (i32, i32) {
    %c0_i32 = arith.constant 0 : i32
    return %arg0, %arg1 : i32, i32
  }
}

module attributes {stable_mosaic.version = 11 : i64} {
  func.func @_matmul_kernel(%arg0: i32, %arg1: i32, %arg2: i32, %arg3: memref<16x32xbf16, #tpu.memory_space<vmem>>, %arg4: memref<32x32xbf16, #tpu.memory_space<vmem>>, %arg5: memref<1x32xf32, #tpu.memory_space<vmem>>, %arg6: memref<16x32xbf16, #tpu.memory_space<vmem>>, %arg7: memref<16x32xbf16, #tpu.memory_space<vmem>>, %arg8: memref<16x32xf32, #tpu.memory_space<vmem>>) attributes {dimension_semantics = [#tpu.dimension_semantics<parallel>, #tpu.dimension_semantics<parallel>, #tpu.dimension_semantics<arbitrary>], iteration_bounds = array<i64: 1, 1, 1>, scalar_prefetch = 0 : i64, scratch_operands = 1 : i64, tpu.core_type = #tpu.core_type<tc>, window_params = [{transform_indices = @transform_0, window_bounds = array<i64: 16, 32>}, {transform_indices = @transform_1, window_bounds = array<i64: 32, 32>}, {transform_indices = @transform_2, window_bounds = array<i64: 1, 32>}, {transform_indices = @transform_3, window_bounds = array<i64: 16, 32>}, {transform_indices = @transform_4, window_bounds = array<i64: 16, 32>}]} {
    %c0_i32 = arith.constant 0 : i32
    %0 = arith.cmpi eq, %arg2, %c0_i32 : i32
    %1 = arith.extui %0 : i1 to i32
    %c0_i32_0 = arith.constant 0 : i32
    %2 = arith.cmpi ne, %1, %c0_i32_0 : i32
    scf.if %2 {
      %cst_10 = arith.constant 0.000000e+00 : f32
      %12 = vector.broadcast %cst_10 : f32 to vector<16x32xf32>
      %c0_11 = arith.constant 0 : index
      %c0_12 = arith.constant 0 : index
      %13 = vector.load %arg8[%c0_11, %c0_12] : memref<16x32xf32, #tpu.memory_space<vmem>>, vector<16x32xf32>
      tpu.vector_store %arg8[%c0_11, %c0_12], %12 {strides = array<i32>} : memref<16x32xf32, #tpu.memory_space<vmem>>, vector<16x32xf32>,
    } else {
    }
    %c0 = arith.constant 0 : index
    %c0_1 = arith.constant 0 : index
    %3 = vector.load %arg8[%c0, %c0_1] : memref<16x32xf32, #tpu.memory_space<vmem>>, vector<16x32xf32>
    %c0_2 = arith.constant 0 : index
    %c0_3 = arith.constant 0 : index
    %4 = vector.load %arg3[%c0_2, %c0_3] : memref<16x32xbf16, #tpu.memory_space<vmem>>, vector<16x32xbf16>
    %c0_4 = arith.constant 0 : index
    %c0_5 = arith.constant 0 : index
    %5 = vector.load %arg4[%c0_4, %c0_5] : memref<32x32xbf16, #tpu.memory_space<vmem>>, vector<32x32xbf16>
    %cst = arith.constant dense<0.000000e+00> : vector<16x32xf32>
    %6 = tpu.matmul %4, %5, %cst {dimension_numbers = #tpu.dot_dimension_numbers<[1], [0], [0], [1], [0, 0, 1, 1], [], []>} : vector<16x32xbf16>, vector<32x32xbf16>, vector<16x32xf32> -> vector<16x32xf32>
    %7 = arith.addf %3, %6 : vector<16x32xf32>
    %c0_6 = arith.constant 0 : index
    %c0_7 = arith.constant 0 : index
    %8 = vector.load %arg8[%c0_6, %c0_7] : memref<16x32xf32, #tpu.memory_space<vmem>>, vector<16x32xf32>
    tpu.vector_store %arg8[%c0_6, %c0_7], %7 {strides = array<i32>} : memref<16x32xf32, #tpu.memory_space<vmem>>, vector<16x32xf32>,
    %c0_i32_8 = arith.constant 0 : i32
    %9 = arith.cmpi eq, %arg2, %c0_i32_8 : i32
    %10 = arith.extui %9 : i1 to i32
    %c0_i32_9 = arith.constant 0 : i32
    %11 = arith.cmpi ne, %10, %c0_i32_9 : i32
    scf.if %11 {
      %c0_10 = arith.constant 0 : index
      %c0_11 = arith.constant 0 : index
      %12 = vector.load %arg8[%c0_10, %c0_11] : memref<16x32xf32, #tpu.memory_space<vmem>>, vector<16x32xf32>
      %c0_12 = arith.constant 0 : index
      %c0_13 = arith.constant 0 : index
      %13 = vector.load %arg5[%c0_12, %c0_13] : memref<1x32xf32, #tpu.memory_space<vmem>>, vector<1x32xf32>
      %14 = vector.broadcast %13 : vector<1x32xf32> to vector<16x32xf32>
      %15 = arith.addf %12, %14 : vector<16x32xf32>
      %c0_14 = arith.constant 0 : index
      %c0_15 = arith.constant 0 : index
      %16 = vector.load %arg6[%c0_14, %c0_15] : memref<16x32xbf16, #tpu.memory_space<vmem>>, vector<16x32xbf16>
      %17 = arith.extf %16 : vector<16x32xbf16> to vector<16x32xf32>
      %18 = arith.addf %15, %17 : vector<16x32xf32>
      %19 = arith.truncf %18 : vector<16x32xf32> to vector<16x32xbf16>
      %c0_16 = arith.constant 0 : index
      %c0_17 = arith.constant 0 : index
      %20 = vector.load %arg7[%c0_16, %c0_17] : memref<16x32xbf16, #tpu.memory_space<vmem>>, vector<16x32xbf16>
      tpu.vector_store %arg7[%c0_16, %c0_17], %19 {strides = array<i32>} : memref<16x32xbf16, #tpu.memory_space<vmem>>, vector<16x32xbf16>,
    } else {
    }
    return
  }
  func.func @transform_0(%arg0: i32, %arg1: i32, %arg2: i32) -> (i32, i32) {
    %c0_i32 = arith.constant 0 : i32
    return %arg0, %arg2 : i32, i32
  }
  func.func @transform_1(%arg0: i32, %arg1: i32, %arg2: i32) -> (i32, i32) {
    %c0_i32 = arith.constant 0 : i32
    return %arg2, %arg1 : i32, i32
  }
  func.func @transform_2(%arg0: i32, %arg1: i32, %arg2: i32) -> (i32, i32) {
    %c0_i32 = arith.constant 0 : i32
    %c0_i32_0 = arith.constant 0 : i32
    return %c0_i32, %arg1 : i32, i32
  }
  func.func @transform_3(%arg0: i32, %arg1: i32, %arg2: i32) -> (i32, i32) {
    %c0_i32 = arith.constant 0 : i32
    return %arg0, %arg1 : i32, i32
  }
  func.func @transform_4(%arg0: i32, %arg1: i32, %arg2: i32) -> (i32, i32) {
    %c0_i32 = arith.constant 0 : i32
    return %arg0, %arg1 : i32, i32
  }
}

module attributes {stable_mosaic.version = 11 : i64} {
  func.func @_attention_kernel(%arg0: i32, %arg1: i32, %arg2: i32, %arg3: memref<1x8x96xbf16, #tpu.memory_space<vmem>>, %arg4: memref<1x8x96xbf16, #tpu.memory_space<vmem>>, %arg5: memref<1x8x96xbf16, #tpu.memory_space<vmem>>, %arg6: memref<1x8x32xbf16, #tpu.memory_space<vmem>>, %arg7: memref<1x4x8x8xbf16, #tpu.memory_space<vmem>>) attributes {dimension_semantics = [#tpu.dimension_semantics<parallel>, #tpu.dimension_semantics<parallel>, #tpu.dimension_semantics<parallel>], iteration_bounds = array<i64: 2, 1, 1>, scalar_prefetch = 0 : i64, scratch_operands = 0 : i64, tpu.core_type = #tpu.core_type<tc>, window_params = [{transform_indices = @transform_0, window_bounds = array<i64: 1, 8, 96>}, {transform_indices = @transform_1, window_bounds = array<i64: 1, 8, 96>}, {transform_indices = @transform_2, window_bounds = array<i64: 1, 8, 96>}, {transform_indices = @transform_3, window_bounds = array<i64: 1, 8, 32>}, {transform_indices = @transform_4, window_bounds = array<i64: 1, 4, 8, 8>}]} {
    %c8_i32 = arith.constant 8 : i32
    %0 = arith.muli %arg2, %c8_i32 : i32
    %1 = tpu.iota {dimensions = array<i32: 0>} : vector<8x8xi32>
    %2 = vector.broadcast %0 : i32 to vector<8x8xi32>
    %3 = arith.addi %1, %2 : vector<8x8xi32>
    %4 = tpu.iota {dimensions = array<i32: 1>} : vector<8x8xi32>
    %5 = arith.cmpi sge, %3, %4 : vector<8x8xi32>
    %c0 = arith.constant 0 : index
    %c0_0 = arith.constant 0 : index
    %c0_1 = arith.constant 0 : index
    %6 = vector.load %arg3[%c0, %c0_0, %c0_1] : memref<1x8x96xbf16, #tpu.memory_space<vmem>>, vector<1x8x8xbf16>
    %7 = vector.shape_cast %6 : vector<1x8x8xbf16> to vector<8x8xbf16>
    %c0_2 = arith.constant 0 : index
    %c0_3 = arith.constant 0 : index
    %c32 = arith.constant 32 : index
    %8 = vector.load %arg4[%c0_2, %c0_3, %c32] : memref<1x8x96xbf16, #tpu.memory_space<vmem>>, vector<1x8x8xbf16>
    %9 = vector.shape_cast %8 : vector<1x8x8xbf16> to vector<8x8xbf16>
    %c0_4 = arith.constant 0 : index
    %c0_5 = arith.constant 0 : index
    %c64 = arith.constant 64 : index
    %10 = vector.load %arg5[%c0_4, %c0_5, %c64] : memref<1x8x96xbf16, #tpu.memory_space<vmem>>, vector<1x8x8xbf16>
    %11 = vector.shape_cast %10 : vector<1x8x8xbf16> to vector<8x8xbf16>
    %cst = arith.constant dense<0.000000e+00> : vector<8x8xf32>
    %12 = tpu.matmul %7, %9, %cst {dimension_numbers = #tpu.dot_dimension_numbers<[1], [1], [0], [0], [0, 0, 1, 0], [], []>} : vector<8x8xbf16>, vector<8x8xbf16>, vector<8x8xf32> -> vector<8x8xf32>
    %cst_6 = arith.constant 0.353553385 : f32
    %13 = vector.broadcast %cst_6 : f32 to vector<8x8xf32>
    %14 = arith.mulf %12, %13 : vector<8x8xf32>
    %cst_7 = arith.constant -1.000000e+30 : f32
    %15 = vector.broadcast %cst_7 : f32 to vector<8x8xf32>
    %16 = arith.select %5, %14, %15 : vector<8x8xi1>, vector<8x8xf32>
    %cst_8 = arith.constant dense<0xFF800000> : vector<8xf32>
    %17 = vector.multi_reduction <maximumf>, %16, %cst_8 [1] : vector<8x8xf32> to vector<8xf32>
    %18 = vector.shape_cast %17 : vector<8xf32> to vector<8x1xf32>
    %19 = vector.broadcast %18 : vector<8x1xf32> to vector<8x8xf32>
    %20 = arith.subf %16, %19 : vector<8x8xf32>
    %21 = arith.truncf %20 : vector<8x8xf32> to vector<8x8xbf16>
    %22 = math.exp %21 : vector<8x8xbf16>
    %23 = arith.extf %22 : vector<8x8xbf16> to vector<8x8xf32>
    %cst_9 = arith.constant dense<0.000000e+00> : vector<8xf32>
    %24 = vector.multi_reduction <add>, %23, %cst_9 [1] : vector<8x8xf32> to vector<8xf32>
    %25 = vector.shape_cast %24 : vector<8xf32> to vector<8x1xf32>
    %26 = tpu.reciprocal %25 {approx = true} : vector<8x1xf32> -> vector<8x1xf32>
    %27 = vector.broadcast %26 : vector<8x1xf32> to vector<8x8xf32>
    %28 = arith.mulf %23, %27 : vector<8x8xf32>
    %29 = arith.truncf %28 : vector<8x8xf32> to vector<8x8xbf16>
    %c0_10 = arith.constant 0 : index
    %c0_11 = arith.constant 0 : index
    %c0_12 = arith.constant 0 : index
    %c0_13 = arith.constant 0 : index
    %30 = vector.load %arg7[%c0_10, %c0_11, %c0_12, %c0_13] : memref<1x4x8x8xbf16, #tpu.memory_space<vmem>>, vector<1x1x8x8xbf16>
    %31 = vector.shape_cast %30 : vector<1x1x8x8xbf16> to vector<8x8xbf16>
    %32 = vector.shape_cast %29 : vector<8x8xbf16> to vector<1x1x8x8xbf16>
    tpu.vector_store %arg7[%c0_10, %c0_11, %c0_12, %c0_13], %32 {strides = array<i32>} : memref<1x4x8x8xbf16, #tpu.memory_space<vmem>>, vector<1x1x8x8xbf16>,
    %33 = arith.truncf %28 : vector<8x8xf32> to vector<8x8xbf16>
    %cst_14 = arith.constant dense<0.000000e+00> : vector<8x8xf32>
    %34 = tpu.matmul %33, %11, %cst_14 {dimension_numbers = #tpu.dot_dimension_numbers<[1], [0], [0], [1], [0, 0, 1, 1], [], []>} : vector<8x8xbf16>, vector<8x8xbf16>, vector<8x8xf32> -> vector<8x8xf32>
    %35 = arith.truncf %34 : vector<8x8xf32> to vector<8x8xbf16>
    %c0_15 = arith.constant 0 : index
    %c0_16 = arith.constant 0 : index
    %c0_17 = arith.constant 0 : index
    %36 = vector.load %arg6[%c0_15, %c0_16, %c0_17] : memref<1x8x32xbf16, #tpu.memory_space<vmem>>, vector<1x8x8xbf16>
    %37 = vector.shape_cast %36 : vector<1x8x8xbf16> to vector<8x8xbf16>
    %38 = vector.shape_cast %35 : vector<8x8xbf16> to vector<1x8x8xbf16>
    tpu.vector_store %arg6[%c0_15, %c0_16, %c0_17], %38 {strides = array<i32>} : memref<1x8x32xbf16, #tpu.memory_space<vmem>>, vector<1x8x8xbf16>,
    %c0_18 = arith.constant 0 : index
    %c0_19 = arith.constant 0 : index
    %c8 = arith.constant 8 : index
    %39 = vector.load %arg3[%c0_18, %c0_19, %c8] : memref<1x8x96xbf16, #tpu.memory_space<vmem>>, vector<1x8x8xbf16>
    %40 = vector.shape_cast %39 : vector<1x8x8xbf16> to vector<8x8xbf16>
    %c0_20 = arith.constant 0 : index
    %c0_21 = arith.constant 0 : index
    %c40 = arith.constant 40 : index
    %41 = vector.load %arg4[%c0_20, %c0_21, %c40] : memref<1x8x96xbf16, #tpu.memory_space<vmem>>, vector<1x8x8xbf16>
    %42 = vector.shape_cast %41 : vector<1x8x8xbf16> to vector<8x8xbf16>
    %c0_22 = arith.constant 0 : index
    %c0_23 = arith.constant 0 : index
    %c72 = arith.constant 72 : index
    %43 = vector.load %arg5[%c0_22, %c0_23, %c72] : memref<1x8x96xbf16, #tpu.memory_space<vmem>>, vector<1x8x8xbf16>
    %44 = vector.shape_cast %43 : vector<1x8x8xbf16> to vector<8x8xbf16>
    %cst_24 = arith.constant dense<0.000000e+00> : vector<8x8xf32>
    %45 = tpu.matmul %40, %42, %cst_24 {dimension_numbers = #tpu.dot_dimension_numbers<[1], [1], [0], [0], [0, 0, 1, 0], [], []>} : vector<8x8xbf16>, vector<8x8xbf16>, vector<8x8xf32> -> vector<8x8xf32>
    %cst_25 = arith.constant 0.353553385 : f32
    %46 = vector.broadcast %cst_25 : f32 to vector<8x8xf32>
    %47 = arith.mulf %45, %46 : vector<8x8xf32>
    %cst_26 = arith.constant -1.000000e+30 : f32
    %48 = vector.broadcast %cst_26 : f32 to vector<8x8xf32>
    %49 = arith.select %5, %47, %48 : vector<8x8xi1>, vector<8x8xf32>
    %cst_27 = arith.constant dense<0xFF800000> : vector<8xf32>
    %50 = vector.multi_reduction <maximumf>, %49, %cst_27 [1] : vector<8x8xf32> to vector<8xf32>
    %51 = vector.shape_cast %50 : vector<8xf32> to vector<8x1xf32>
    %52 = vector.broadcast %51 : vector<8x1xf32> to vector<8x8xf32>
    %53 = arith.subf %49, %52 : vector<8x8xf32>
    %54 = arith.truncf %53 : vector<8x8xf32> to vector<8x8xbf16>
    %55 = math.exp %54 : vector<8x8xbf16>
    %56 = arith.extf %55 : vector<8x8xbf16> to vector<8x8xf32>
    %cst_28 = arith.constant dense<0.000000e+00> : vector<8xf32>
    %57 = vector.multi_reduction <add>, %56, %cst_28 [1] : vector<8x8xf32> to vector<8xf32>
    %58 = vector.shape_cast %57 : vector<8xf32> to vector<8x1xf32>
    %59 = tpu.reciprocal %58 {approx = true} : vector<8x1xf32> -> vector<8x1xf32>
    %60 = vector.broadcast %59 : vector<8x1xf32> to vector<8x8xf32>
    %61 = arith.mulf %56, %60 : vector<8x8xf32>
    %62 = arith.truncf %61 : vector<8x8xf32> to vector<8x8xbf16>
    %c0_29 = arith.constant 0 : index
    %c1 = arith.constant 1 : index
    %c0_30 = arith.constant 0 : index
    %c0_31 = arith.constant 0 : index
    %63 = vector.load %arg7[%c0_29, %c1, %c0_30, %c0_31] : memref<1x4x8x8xbf16, #tpu.memory_space<vmem>>, vector<1x1x8x8xbf16>
    %64 = vector.shape_cast %63 : vector<1x1x8x8xbf16> to vector<8x8xbf16>
    %65 = vector.shape_cast %62 : vector<8x8xbf16> to vector<1x1x8x8xbf16>
    tpu.vector_store %arg7[%c0_29, %c1, %c0_30, %c0_31], %65 {strides = array<i32>} : memref<1x4x8x8xbf16, #tpu.memory_space<vmem>>, vector<1x1x8x8xbf16>,
    %66 = arith.truncf %61 : vector<8x8xf32> to vector<8x8xbf16>
    %cst_32 = arith.constant dense<0.000000e+00> : vector<8x8xf32>
    %67 = tpu.matmul %66, %44, %cst_32 {dimension_numbers = #tpu.dot_dimension_numbers<[1], [0], [0], [1], [0, 0, 1, 1], [], []>} : vector<8x8xbf16>, vector<8x8xbf16>, vector<8x8xf32> -> vector<8x8xf32>
    %68 = arith.truncf %67 : vector<8x8xf32> to vector<8x8xbf16>
    %c0_33 = arith.constant 0 : index
    %c0_34 = arith.constant 0 : index
    %c8_35 = arith.constant 8 : index
    %69 = vector.load %arg6[%c0_33, %c0_34, %c8_35] : memref<1x8x32xbf16, #tpu.memory_space<vmem>>, vector<1x8x8xbf16>
    %70 = vector.shape_cast %69 : vector<1x8x8xbf16> to vector<8x8xbf16>
    %71 = vector.shape_cast %68 : vector<8x8xbf16> to vector<1x8x8xbf16>
    tpu.vector_store %arg6[%c0_33, %c0_34, %c8_35], %71 {strides = array<i32>} : memref<1x8x32xbf16, #tpu.memory_space<vmem>>, vector<1x8x8xbf16>,
    %c0_36 = arith.constant 0 : index
    %c0_37 = arith.constant 0 : index
    %c16 = arith.constant 16 : index
    %72 = vector.load %arg3[%c0_36, %c0_37, %c16] : memref<1x8x96xbf16, #tpu.memory_space<vmem>>, vector<1x8x8xbf16>
    %73 = vector.shape_cast %72 : vector<1x8x8xbf16> to vector<8x8xbf16>
    %c0_38 = arith.constant 0 : index
    %c0_39 = arith.constant 0 : index
    %c48 = arith.constant 48 : index
    %74 = vector.load %arg4[%c0_38, %c0_39, %c48] : memref<1x8x96xbf16, #tpu.memory_space<vmem>>, vector<1x8x8xbf16>
    %75 = vector.shape_cast %74 : vector<1x8x8xbf16> to vector<8x8xbf16>
    %c0_40 = arith.constant 0 : index
    %c0_41 = arith.constant 0 : index
    %c80 = arith.constant 80 : index
    %76 = vector.load %arg5[%c0_40, %c0_41, %c80] : memref<1x8x96xbf16, #tpu.memory_space<vmem>>, vector<1x8x8xbf16>
    %77 = vector.shape_cast %76 : vector<1x8x8xbf16> to vector<8x8xbf16>
    %cst_42 = arith.constant dense<0.000000e+00> : vector<8x8xf32>
    %78 = tpu.matmul %73, %75, %cst_42 {dimension_numbers = #tpu.dot_dimension_numbers<[1], [1], [0], [0], [0, 0, 1, 0], [], []>} : vector<8x8xbf16>, vector<8x8xbf16>, vector<8x8xf32> -> vector<8x8xf32>
    %cst_43 = arith.constant 0.353553385 : f32
    %79 = vector.broadcast %cst_43 : f32 to vector<8x8xf32>
    %80 = arith.mulf %78, %79 : vector<8x8xf32>
    %cst_44 = arith.constant -1.000000e+30 : f32
    %81 = vector.broadcast %cst_44 : f32 to vector<8x8xf32>
    %82 = arith.select %5, %80, %81 : vector<8x8xi1>, vector<8x8xf32>
    %cst_45 = arith.constant dense<0xFF800000> : vector<8xf32>
    %83 = vector.multi_reduction <maximumf>, %82, %cst_45 [1] : vector<8x8xf32> to vector<8xf32>
    %84 = vector.shape_cast %83 : vector<8xf32> to vector<8x1xf32>
    %85 = vector.broadcast %84 : vector<8x1xf32> to vector<8x8xf32>
    %86 = arith.subf %82, %85 : vector<8x8xf32>
    %87 = arith.truncf %86 : vector<8x8xf32> to vector<8x8xbf16>
    %88 = math.exp %87 : vector<8x8xbf16>
    %89 = arith.extf %88 : vector<8x8xbf16> to vector<8x8xf32>
    %cst_46 = arith.constant dense<0.000000e+00> : vector<8xf32>
    %90 = vector.multi_reduction <add>, %89, %cst_46 [1] : vector<8x8xf32> to vector<8xf32>
    %91 = vector.shape_cast %90 : vector<8xf32> to vector<8x1xf32>
    %92 = tpu.reciprocal %91 {approx = true} : vector<8x1xf32> -> vector<8x1xf32>
    %93 = vector.broadcast %92 : vector<8x1xf32> to vector<8x8xf32>
    %94 = arith.mulf %89, %93 : vector<8x8xf32>
    %95 = arith.truncf %94 : vector<8x8xf32> to vector<8x8xbf16>
    %c0_47 = arith.constant 0 : index
    %c2 = arith.constant 2 : index
    %c0_48 = arith.constant 0 : index
    %c0_49 = arith.constant 0 : index
    %96 = vector.load %arg7[%c0_47, %c2, %c0_48, %c0_49] : memref<1x4x8x8xbf16, #tpu.memory_space<vmem>>, vector<1x1x8x8xbf16>
    %97 = vector.shape_cast %96 : vector<1x1x8x8xbf16> to vector<8x8xbf16>
    %98 = vector.shape_cast %95 : vector<8x8xbf16> to vector<1x1x8x8xbf16>
    tpu.vector_store %arg7[%c0_47, %c2, %c0_48, %c0_49], %98 {strides = array<i32>} : memref<1x4x8x8xbf16, #tpu.memory_space<vmem>>, vector<1x1x8x8xbf16>,
    %99 = arith.truncf %94 : vector<8x8xf32> to vector<8x8xbf16>
    %cst_50 = arith.constant dense<0.000000e+00> : vector<8x8xf32>
    %100 = tpu.matmul %99, %77, %cst_50 {dimension_numbers = #tpu.dot_dimension_numbers<[1], [0], [0], [1], [0, 0, 1, 1], [], []>} : vector<8x8xbf16>, vector<8x8xbf16>, vector<8x8xf32> -> vector<8x8xf32>
    %101 = arith.truncf %100 : vector<8x8xf32> to vector<8x8xbf16>
    %c0_51 = arith.constant 0 : index
    %c0_52 = arith.constant 0 : index
    %c16_53 = arith.constant 16 : index
    %102 = vector.load %arg6[%c0_51, %c0_52, %c16_53] : memref<1x8x32xbf16, #tpu.memory_space<vmem>>, vector<1x8x8xbf16>
    %103 = vector.shape_cast %102 : vector<1x8x8xbf16> to vector<8x8xbf16>
    %104 = vector.shape_cast %101 : vector<8x8xbf16> to vector<1x8x8xbf16>
    tpu.vector_store %arg6[%c0_51, %c0_52, %c16_53], %104 {strides = array<i32>} : memref<1x8x32xbf16, #tpu.memory_space<vmem>>, vector<1x8x8xbf16>,
    %c0_54 = arith.constant 0 : index
    %c0_55 = arith.constant 0 : index
    %c24 = arith.constant 24 : index
    %105 = vector.load %arg3[%c0_54, %c0_55, %c24] : memref<1x8x96xbf16, #tpu.memory_space<vmem>>, vector<1x8x8xbf16>
    %106 = vector.shape_cast %105 : vector<1x8x8xbf16> to vector<8x8xbf16>
    %c0_56 = arith.constant 0 : index
    %c0_57 = arith.constant 0 : index
    %c56 = arith.constant 56 : index
    %107 = vector.load %arg4[%c0_56, %c0_57, %c56] : memref<1x8x96xbf16, #tpu.memory_space<vmem>>, vector<1x8x8xbf16>
    %108 = vector.shape_cast %107 : vector<1x8x8xbf16> to vector<8x8xbf16>
    %c0_58 = arith.constant 0 : index
    %c0_59 = arith.constant 0 : index
    %c88 = arith.constant 88 : index
    %109 = vector.load %arg5[%c0_58, %c0_59, %c88] : memref<1x8x96xbf16, #tpu.memory_space<vmem>>, vector<1x8x8xbf16>
    %110 = vector.shape_cast %109 : vector<1x8x8xbf16> to vector<8x8xbf16>
    %cst_60 = arith.constant dense<0.000000e+00> : vector<8x8xf32>
    %111 = tpu.matmul %106, %108, %cst_60 {dimension_numbers = #tpu.dot_dimension_numbers<[1], [1], [0], [0], [0, 0, 1, 0], [], []>} : vector<8x8xbf16>, vector<8x8xbf16>, vector<8x8xf32> -> vector<8x8xf32>
    %cst_61 = arith.constant 0.353553385 : f32
    %112 = vector.broadcast %cst_61 : f32 to vector<8x8xf32>
    %113 = arith.mulf %111, %112 : vector<8x8xf32>
    %cst_62 = arith.constant -1.000000e+30 : f32
    %114 = vector.broadcast %cst_62 : f32 to vector<8x8xf32>
    %115 = arith.select %5, %113, %114 : vector<8x8xi1>, vector<8x8xf32>
    %cst_63 = arith.constant dense<0xFF800000> : vector<8xf32>
    %116 = vector.multi_reduction <maximumf>, %115, %cst_63 [1] : vector<8x8xf32> to vector<8xf32>
    %117 = vector.shape_cast %116 : vector<8xf32> to vector<8x1xf32>
    %118 = vector.broadcast %117 : vector<8x1xf32> to vector<8x8xf32>
    %119 = arith.subf %115, %118 : vector<8x8xf32>
    %120 = arith.truncf %119 : vector<8x8xf32> to vector<8x8xbf16>
    %121 = math.exp %120 : vector<8x8xbf16>
    %122 = arith.extf %121 : vector<8x8xbf16> to vector<8x8xf32>
    %cst_64 = arith.constant dense<0.000000e+00> : vector<8xf32>
    %123 = vector.multi_reduction <add>, %122, %cst_64 [1] : vector<8x8xf32> to vector<8xf32>
    %124 = vector.shape_cast %123 : vector<8xf32> to vector<8x1xf32>
    %125 = tpu.reciprocal %124 {approx = true} : vector<8x1xf32> -> vector<8x1xf32>
    %126 = vector.broadcast %125 : vector<8x1xf32> to vector<8x8xf32>
    %127 = arith.mulf %122, %126 : vector<8x8xf32>
    %128 = arith.truncf %127 : vector<8x8xf32> to vector<8x8xbf16>
    %c0_65 = arith.constant 0 : index
    %c3 = arith.constant 3 : index
    %c0_66 = arith.constant 0 : index
    %c0_67 = arith.constant 0 : index
    %129 = vector.load %arg7[%c0_65, %c3, %c0_66, %c0_67] : memref<1x4x8x8xbf16, #tpu.memory_space<vmem>>, vector<1x1x8x8xbf16>
    %130 = vector.shape_cast %129 : vector<1x1x8x8xbf16> to vector<8x8xbf16>
    %131 = vector.shape_cast %128 : vector<8x8xbf16> to vector<1x1x8x8xbf16>
    tpu.vector_store %arg7[%c0_65, %c3, %c0_66, %c0_67], %131 {strides = array<i32>} : memref<1x4x8x8xbf16, #tpu.memory_space<vmem>>, vector<1x1x8x8xbf16>,
    %132 = arith.truncf %127 : vector<8x8xf32> to vector<8x8xbf16>
    %cst_68 = arith.constant dense<0.000000e+00> : vector<8x8xf32>
    %133 = tpu.matmul %132, %110, %cst_68 {dimension_numbers = #tpu.dot_dimension_numbers<[1], [0], [0], [1], [0, 0, 1, 1], [], []>} : vector<8x8xbf16>, vector<8x8xbf16>, vector<8x8xf32> -> vector<8x8xf32>
    %134 = arith.truncf %133 : vector<8x8xf32> to vector<8x8xbf16>
    %c0_69 = arith.constant 0 : index
    %c0_70 = arith.constant 0 : index
    %c24_71 = arith.constant 24 : index
    %135 = vector.load %arg6[%c0_69, %c0_70, %c24_71] : memref<1x8x32xbf16, #tpu.memory_space<vmem>>, vector<1x8x8xbf16>
    %136 = vector.shape_cast %135 : vector<1x8x8xbf16> to vector<8x8xbf16>
    %137 = vector.shape_cast %134 : vector<8x8xbf16> to vector<1x8x8xbf16>
    tpu.vector_store %arg6[%c0_69, %c0_70, %c24_71], %137 {strides = array<i32>} : memref<1x8x32xbf16, #tpu.memory_space<vmem>>, vector<1x8x8xbf16>,
    return
  }
  func.func @transform_0(%arg0: i32, %arg1: i32, %arg2: i32) -> (i32, i32, i32) {
    %c0_i32 = arith.constant 0 : i32
    %c0_i32_0 = arith.constant 0 : i32
    return %arg0, %arg2, %c0_i32 : i32, i32, i32
  }
  func.func @transform_1(%arg0: i32, %arg1: i32, %arg2: i32) -> (i32, i32, i32) {
    %c0_i32 = arith.constant 0 : i32
    %c0_i32_0 = arith.constant 0 : i32
    %c0_i32_1 = arith.constant 0 : i32
    return %arg0, %c0_i32, %c0_i32_0 : i32, i32, i32
  }
  func.func @transform_2(%arg0: i32, %arg1: i32, %arg2: i32) -> (i32, i32, i32) {
    %c0_i32 = arith.constant 0 : i32
    %c0_i32_0 = arith.constant 0 : i32
    %c0_i32_1 = arith.constant 0 : i32
    return %arg0, %c0_i32, %c0_i32_0 : i32, i32, i32
  }
  func.func @transform_3(%arg0: i32, %arg1: i32, %arg2: i32) -> (i32, i32, i32) {
    %c0_i32 = arith.constant 0 : i32
    return %arg0, %arg2, %arg1 : i32, i32, i32
  }
  func.func @transform_4(%arg0: i32, %arg1: i32, %arg2: i32) -> (i32, i32, i32, i32) {
    %c0_i32 = arith.constant 0 : i32
    %c0_i32_0 = arith.constant 0 : i32
    return %arg0, %arg1, %arg2, %c0_i32 : i32, i32, i32, i32
  }
}

module attributes {stable_mosaic.version = 11 : i64} {
  func.func @_matmul_kernel(%arg0: i32, %arg1: i32, %arg2: i32, %arg3: memref<16x32xbf16, #tpu.memory_space<vmem>>, %arg4: memref<32x32xbf16, #tpu.memory_space<vmem>>, %arg5: memref<1x32xf32, #tpu.memory_space<vmem>>, %arg6: memref<16x32xbf16, #tpu.memory_space<vmem>>, %arg7: memref<16x32xf32, #tpu.memory_space<vmem>>) attributes {dimension_semantics = [#tpu.dimension_semantics<parallel>, #tpu.dimension_semantics<parallel>, #tpu.dimension_semantics<arbitrary>], iteration_bounds = array<i64: 1, 1, 1>, scalar_prefetch = 0 : i64, scratch_operands = 1 : i64, tpu.core_type = #tpu.core_type<tc>, window_params = [{transform_indices = @transform_0, window_bounds = array<i64: 16, 32>}, {transform_indices = @transform_1, window_bounds = array<i64: 32, 32>}, {transform_indices = @transform_2, window_bounds = array<i64: 1, 32>}, {transform_indices = @transform_3, window_bounds = array<i64: 16, 32>}]} {
    %c0_i32 = arith.constant 0 : i32
    %0 = arith.cmpi eq, %arg2, %c0_i32 : i32
    %1 = arith.extui %0 : i1 to i32
    %c0_i32_0 = arith.constant 0 : i32
    %2 = arith.cmpi ne, %1, %c0_i32_0 : i32
    scf.if %2 {
      %cst_10 = arith.constant 0.000000e+00 : f32
      %12 = vector.broadcast %cst_10 : f32 to vector<16x32xf32>
      %c0_11 = arith.constant 0 : index
      %c0_12 = arith.constant 0 : index
      %13 = vector.load %arg7[%c0_11, %c0_12] : memref<16x32xf32, #tpu.memory_space<vmem>>, vector<16x32xf32>
      tpu.vector_store %arg7[%c0_11, %c0_12], %12 {strides = array<i32>} : memref<16x32xf32, #tpu.memory_space<vmem>>, vector<16x32xf32>,
    } else {
    }
    %c0 = arith.constant 0 : index
    %c0_1 = arith.constant 0 : index
    %3 = vector.load %arg7[%c0, %c0_1] : memref<16x32xf32, #tpu.memory_space<vmem>>, vector<16x32xf32>
    %c0_2 = arith.constant 0 : index
    %c0_3 = arith.constant 0 : index
    %4 = vector.load %arg3[%c0_2, %c0_3] : memref<16x32xbf16, #tpu.memory_space<vmem>>, vector<16x32xbf16>
    %c0_4 = arith.constant 0 : index
    %c0_5 = arith.constant 0 : index
    %5 = vector.load %arg4[%c0_4, %c0_5] : memref<32x32xbf16, #tpu.memory_space<vmem>>, vector<32x32xbf16>
    %cst = arith.constant dense<0.000000e+00> : vector<16x32xf32>
    %6 = tpu.matmul %4, %5, %cst {dimension_numbers = #tpu.dot_dimension_numbers<[1], [0], [0], [1], [0, 0, 1, 1], [], []>} : vector<16x32xbf16>, vector<32x32xbf16>, vector<16x32xf32> -> vector<16x32xf32>
    %7 = arith.addf %3, %6 : vector<16x32xf32>
    %c0_6 = arith.constant 0 : index
    %c0_7 = arith.constant 0 : index
    %8 = vector.load %arg7[%c0_6, %c0_7] : memref<16x32xf32, #tpu.memory_space<vmem>>, vector<16x32xf32>
    tpu.vector_store %arg7[%c0_6, %c0_7], %7 {strides = array<i32>} : memref<16x32xf32, #tpu.memory_space<vmem>>, vector<16x32xf32>,
    %c0_i32_8 = arith.constant 0 : i32
    %9 = arith.cmpi eq, %arg2, %c0_i32_8 : i32
    %10 = arith.extui %9 : i1 to i32
    %c0_i32_9 = arith.constant 0 : i32
    %11 = arith.cmpi ne, %10, %c0_i32_9 : i32
    scf.if %11 {
      %c0_10 = arith.constant 0 : index
      %c0_11 = arith.constant 0 : index
      %12 = vector.load %arg7[%c0_10, %c0_11] : memref<16x32xf32, #tpu.memory_space<vmem>>, vector<16x32xf32>
      %c0_12 = arith.constant 0 : index
      %c0_13 = arith.constant 0 : index
      %13 = vector.load %arg5[%c0_12, %c0_13] : memref<1x32xf32, #tpu.memory_space<vmem>>, vector<1x32xf32>
      %14 = vector.broadcast %13 : vector<1x32xf32> to vector<16x32xf32>
      %15 = arith.addf %12, %14 : vector<16x32xf32>
      %16 = arith.truncf %15 : vector<16x32xf32> to vector<16x32xbf16>
      %c0_14 = arith.constant 0 : index
      %c0_15 = arith.constant 0 : index
      %17 = vector.load %arg6[%c0_14, %c0_15] : memref<16x32xbf16, #tpu.memory_space<vmem>>, vector<16x32xbf16>
      tpu.vector_store %arg6[%c0_14, %c0_15], %16 {strides = array<i32>} : memref<16x32xbf16, #tpu.memory_space<vmem>>, vector<16x32xbf16>,
    } else {
    }
    return
  }
  func.func @transform_0(%arg0: i32, %arg1: i32, %arg2: i32) -> (i32, i32) {
    %c0_i32 = arith.constant 0 : i32
    return %arg0, %arg2 : i32, i32
  }
  func.func @transform_1(%arg0: i32, %arg1: i32, %arg2: i32) -> (i32, i32) {
    %c0_i32 = arith.constant 0 : i32
    return %arg2, %arg1 : i32, i32
  }
  func.func @transform_2(%arg0: i32, %arg1: i32, %arg2: i32) -> (i32, i32) {
    %c0_i32 = arith.constant 0 : i32
    %c0_i32_0 = arith.constant 0 : i32
    return %c0_i32, %arg1 : i32, i32
  }
  func.func @transform_3(%arg0: i32, %arg1: i32, %arg2: i32) -> (i32, i32) {
    %c0_i32 = arith.constant 0 : i32
    return %arg0, %arg1 : i32, i32
  }
}

module attributes {stable_mosaic.version = 11 : i64} {
  func.func @_matmul_kernel(%arg0: i32, %arg1: i32, %arg2: i32, %arg3: memref<16x32xbf16, #tpu.memory_space<vmem>>, %arg4: memref<32x64xbf16, #tpu.memory_space<vmem>>, %arg5: memref<1x64xf32, #tpu.memory_space<vmem>>, %arg6: memref<16x64xbf16, #tpu.memory_space<vmem>>, %arg7: memref<16x64xf32, #tpu.memory_space<vmem>>) attributes {dimension_semantics = [#tpu.dimension_semantics<parallel>, #tpu.dimension_semantics<parallel>, #tpu.dimension_semantics<arbitrary>], iteration_bounds = array<i64: 1, 1, 1>, scalar_prefetch = 0 : i64, scratch_operands = 1 : i64, tpu.core_type = #tpu.core_type<tc>, window_params = [{transform_indices = @transform_0, window_bounds = array<i64: 16, 32>}, {transform_indices = @transform_1, window_bounds = array<i64: 32, 64>}, {transform_indices = @transform_2, window_bounds = array<i64: 1, 64>}, {transform_indices = @transform_3, window_bounds = array<i64: 16, 64>}]} {
    %c0_i32 = arith.constant 0 : i32
    %0 = arith.cmpi eq, %arg2, %c0_i32 : i32
    %1 = arith.extui %0 : i1 to i32
    %c0_i32_0 = arith.constant 0 : i32
    %2 = arith.cmpi ne, %1, %c0_i32_0 : i32
    scf.if %2 {
      %cst_10 = arith.constant 0.000000e+00 : f32
      %12 = vector.broadcast %cst_10 : f32 to vector<16x64xf32>
      %c0_11 = arith.constant 0 : index
      %c0_12 = arith.constant 0 : index
      %13 = vector.load %arg7[%c0_11, %c0_12] : memref<16x64xf32, #tpu.memory_space<vmem>>, vector<16x64xf32>
      tpu.vector_store %arg7[%c0_11, %c0_12], %12 {strides = array<i32>} : memref<16x64xf32, #tpu.memory_space<vmem>>, vector<16x64xf32>,
    } else {
    }
    %c0 = arith.constant 0 : index
    %c0_1 = arith.constant 0 : index
    %3 = vector.load %arg7[%c0, %c0_1] : memref<16x64xf32, #tpu.memory_space<vmem>>, vector<16x64xf32>
    %c0_2 = arith.constant 0 : index
    %c0_3 = arith.constant 0 : index
    %4 = vector.load %arg3[%c0_2, %c0_3] : memref<16x32xbf16, #tpu.memory_space<vmem>>, vector<16x32xbf16>
    %c0_4 = arith.constant 0 : index
    %c0_5 = arith.constant 0 : index
    %5 = vector.load %arg4[%c0_4, %c0_5] : memref<32x64xbf16, #tpu.memory_space<vmem>>, vector<32x64xbf16>
    %cst = arith.constant dense<0.000000e+00> : vector<16x64xf32>
    %6 = tpu.matmul %4, %5, %cst {dimension_numbers = #tpu.dot_dimension_numbers<[1], [0], [0], [1], [0, 0, 1, 1], [], []>} : vector<16x32xbf16>, vector<32x64xbf16>, vector<16x64xf32> -> vector<16x64xf32>
    %7 = arith.addf %3, %6 : vector<16x64xf32>
    %c0_6 = arith.constant 0 : index
    %c0_7 = arith.constant 0 : index
    %8 = vector.load %arg7[%c0_6, %c0_7] : memref<16x64xf32, #tpu.memory_space<vmem>>, vector<16x64xf32>
    tpu.vector_store %arg7[%c0_6, %c0_7], %7 {strides = array<i32>} : memref<16x64xf32, #tpu.memory_space<vmem>>, vector<16x64xf32>,
    %c0_i32_8 = arith.constant 0 : i32
    %9 = arith.cmpi eq, %arg2, %c0_i32_8 : i32
    %10 = arith.extui %9 : i1 to i32
    %c0_i32_9 = arith.constant 0 : i32
    %11 = arith.cmpi ne, %10, %c0_i32_9 : i32
    scf.if %11 {
      %c0_10 = arith.constant 0 : index
      %c0_11 = arith.constant 0 : index
      %12 = vector.load %arg7[%c0_10, %c0_11] : memref<16x64xf32, #tpu.memory_space<vmem>>, vector<16x64xf32>
      %c0_12 = arith.constant 0 : index
      %c0_13 = arith.constant 0 : index
      %13 = vector.load %arg5[%c0_12, %c0_13] : memref<1x64xf32, #tpu.memory_space<vmem>>, vector<1x64xf32>
      %14 = vector.broadcast %13 : vector<1x64xf32> to vector<16x64xf32>
      %15 = arith.addf %12, %14 : vector<16x64xf32>
      %16 = arith.truncf %15 : vector<16x64xf32> to vector<16x64xbf16>
      %c0_14 = arith.constant 0 : index
      %c0_15 = arith.constant 0 : index
      %17 = vector.load %arg6[%c0_14, %c0_15] : memref<16x64xbf16, #tpu.memory_space<vmem>>, vector<16x64xbf16>
      tpu.vector_store %arg6[%c0_14, %c0_15], %16 {strides = array<i32>} : memref<16x64xbf16, #tpu.memory_space<vmem>>, vector<16x64xbf16>,
    } else {
    }
    return
  }
  func.func @transform_0(%arg0: i32, %arg1: i32, %arg2: i32) -> (i32, i32) {
    %c0_i32 = arith.constant 0 : i32
    return %arg0, %arg2 : i32, i32
  }
  func.func @transform_1(%arg0: i32, %arg1: i32, %arg2: i32) -> (i32, i32) {
    %c0_i32 = arith.constant 0 : i32
    return %arg2, %arg1 : i32, i32
  }
  func.func @transform_2(%arg0: i32, %arg1: i32, %arg2: i32) -> (i32, i32) {
    %c0_i32 = arith.constant 0 : i32
    %c0_i32_0 = arith.constant 0 : i32
    return %c0_i32, %arg1 : i32, i32
  }
  func.func @transform_3(%arg0: i32, %arg1: i32, %arg2: i32) -> (i32, i32) {
    %c0_i32 = arith.constant 0 : i32
    return %arg0, %arg1 : i32, i32
  }
}

module attributes {stable_mosaic.version = 11 : i64} {
  func.func @_attention_kernel(%arg0: i32, %arg1: i32, %arg2: i32, %arg3: memref<1x8x32xbf16, #tpu.memory_space<vmem>>, %arg4: memref<1x8x64xbf16, #tpu.memory_space<vmem>>, %arg5: memref<1x8x64xbf16, #tpu.memory_space<vmem>>, %arg6: memref<1x1x8xbf16, #tpu.memory_space<vmem>>, %arg7: memref<1x8x32xbf16, #tpu.memory_space<vmem>>, %arg8: memref<1x4x8x8xbf16, #tpu.memory_space<vmem>>) attributes {dimension_semantics = [#tpu.dimension_semantics<parallel>, #tpu.dimension_semantics<parallel>, #tpu.dimension_semantics<parallel>], iteration_bounds = array<i64: 2, 1, 1>, scalar_prefetch = 0 : i64, scratch_operands = 0 : i64, tpu.core_type = #tpu.core_type<tc>, window_params = [{transform_indices = @transform_0, window_bounds = array<i64: 1, 8, 32>}, {transform_indices = @transform_1, window_bounds = array<i64: 1, 8, 64>}, {transform_indices = @transform_2, window_bounds = array<i64: 1, 8, 64>}, {transform_indices = @transform_3, window_bounds = array<i64: 1, 1, 8>}, {transform_indices = @transform_4, window_bounds = array<i64: 1, 8, 32>}, {transform_indices = @transform_5, window_bounds = array<i64: 1, 4, 8, 8>}]} {
    %c0 = arith.constant 0 : index
    %c0_0 = arith.constant 0 : index
    %c0_1 = arith.constant 0 : index
    %0 = vector.load %arg6[%c0, %c0_0, %c0_1] : memref<1x1x8xbf16, #tpu.memory_space<vmem>>, vector<1x1x8xbf16>
    %1 = vector.shape_cast %0 : vector<1x1x8xbf16> to vector<1x8xbf16>
    %cst = arith.constant 0.000000e+00 : bf16
    %2 = vector.broadcast %cst : bf16 to vector<1x8xbf16>
    %3 = arith.cmpf ogt, %1, %2 : vector<1x8xbf16>
    %c0_2 = arith.constant 0 : index
    %c0_3 = arith.constant 0 : index
    %c0_4 = arith.constant 0 : index
    %4 = vector.load %arg3[%c0_2, %c0_3, %c0_4] : memref<1x8x32xbf16, #tpu.memory_space<vmem>>, vector<1x8x8xbf16>
    %5 = vector.shape_cast %4 : vector<1x8x8xbf16> to vector<8x8xbf16>
    %c0_5 = arith.constant 0 : index
    %c0_6 = arith.constant 0 : index
    %c0_7 = arith.constant 0 : index
    %6 = vector.load %arg4[%c0_5, %c0_6, %c0_7] : memref<1x8x64xbf16, #tpu.memory_space<vmem>>, vector<1x8x8xbf16>
    %7 = vector.shape_cast %6 : vector<1x8x8xbf16> to vector<8x8xbf16>
    %c0_8 = arith.constant 0 : index
    %c0_9 = arith.constant 0 : index
    %c32 = arith.constant 32 : index
    %8 = vector.load %arg5[%c0_8, %c0_9, %c32] : memref<1x8x64xbf16, #tpu.memory_space<vmem>>, vector<1x8x8xbf16>
    %9 = vector.shape_cast %8 : vector<1x8x8xbf16> to vector<8x8xbf16>
    %cst_10 = arith.constant dense<0.000000e+00> : vector<8x8xf32>
    %10 = tpu.matmul %5, %7, %cst_10 {dimension_numbers = #tpu.dot_dimension_numbers<[1], [1], [0], [0], [0, 0, 1, 0], [], []>} : vector<8x8xbf16>, vector<8x8xbf16>, vector<8x8xf32> -> vector<8x8xf32>
    %cst_11 = arith.constant 0.353553385 : f32
    %11 = vector.broadcast %cst_11 : f32 to vector<8x8xf32>
    %12 = arith.mulf %10, %11 : vector<8x8xf32>
    %cst_12 = arith.constant -1.000000e+30 : f32
    %13 = vector.shape_cast %3 : vector<1x8xi1> to vector<1x8xi1>
    %14 = vector.broadcast %13 : vector<1x8xi1> to vector<8x8xi1>
    %15 = vector.broadcast %cst_12 : f32 to vector<8x8xf32>
    %16 = arith.select %14, %12, %15 : vector<8x8xi1>, vector<8x8xf32>
    %cst_13 = arith.constant dense<0xFF800000> : vector<8xf32>
    %17 = vector.multi_reduction <maximumf>, %16, %cst_13 [1] : vector<8x8xf32> to vector<8xf32>
    %18 = vector.shape_cast %17 : vector<8xf32> to vector<8x1xf32>
    %19 = vector.broadcast %18 : vector<8x1xf32> to vector<8x8xf32>
    %20 = arith.subf %16, %19 : vector<8x8xf32>
    %21 = arith.truncf %20 : vector<8x8xf32> to vector<8x8xbf16>
    %22 = math.exp %21 : vector<8x8xbf16>
    %23 = arith.extf %22 : vector<8x8xbf16> to vector<8x8xf32>
    %cst_14 = arith.constant dense<0.000000e+00> : vector<8xf32>
    %24 = vector.multi_reduction <add>, %23, %cst_14 [1] : vector<8x8xf32> to vector<8xf32>
    %25 = vector.shape_cast %24 : vector<8xf32> to vector<8x1xf32>
    %26 = tpu.reciprocal %25 {approx = true} : vector<8x1xf32> -> vector<8x1xf32>
    %27 = vector.broadcast %26 : vector<8x1xf32> to vector<8x8xf32>
    %28 = arith.mulf %23, %27 : vector<8x8xf32>
    %29 = arith.truncf %28 : vector<8x8xf32> to vector<8x8xbf16>
    %c0_15 = arith.constant 0 : index
    %c0_16 = arith.constant 0 : index
    %c0_17 = arith.constant 0 : index
    %c0_18 = arith.constant 0 : index
    %30 = vector.load %arg8[%c0_15, %c0_16, %c0_17, %c0_18] : memref<1x4x8x8xbf16, #tpu.memory_space<vmem>>, vector<1x1x8x8xbf16>
    %31 = vector.shape_cast %30 : vector<1x1x8x8xbf16> to vector<8x8xbf16>
    %32 = vector.shape_cast %29 : vector<8x8xbf16> to vector<1x1x8x8xbf16>
    tpu.vector_store %arg8[%c0_15, %c0_16, %c0_17, %c0_18], %32 {strides = array<i32>} : memref<1x4x8x8xbf16, #tpu.memory_space<vmem>>, vector<1x1x8x8xbf16>,
    %33 = arith.truncf %28 : vector<8x8xf32> to vector<8x8xbf16>
    %cst_19 = arith.constant dense<0.000000e+00> : vector<8x8xf32>
    %34 = tpu.matmul %33, %9, %cst_19 {dimension_numbers = #tpu.dot_dimension_numbers<[1], [0], [0], [1], [0, 0, 1, 1], [], []>} : vector<8x8xbf16>, vector<8x8xbf16>, vector<8x8xf32> -> vector<8x8xf32>
    %35 = arith.truncf %34 : vector<8x8xf32> to vector<8x8xbf16>
    %c0_20 = arith.constant 0 : index
    %c0_21 = arith.constant 0 : index
    %c0_22 = arith.constant 0 : index
    %36 = vector.load %arg7[%c0_20, %c0_21, %c0_22] : memref<1x8x32xbf16, #tpu.memory_space<vmem>>, vector<1x8x8xbf16>
    %37 = vector.shape_cast %36 : vector<1x8x8xbf16> to vector<8x8xbf16>
    %38 = vector.shape_cast %35 : vector<8x8xbf16> to vector<1x8x8xbf16>
    tpu.vector_store %arg7[%c0_20, %c0_21, %c0_22], %38 {strides = array<i32>} : memref<1x8x32xbf16, #tpu.memory_space<vmem>>, vector<1x8x8xbf16>,
    %c0_23 = arith.constant 0 : index
    %c0_24 = arith.constant 0 : index
    %c8 = arith.constant 8 : index
    %39 = vector.load %arg3[%c0_23, %c0_24, %c8] : memref<1x8x32xbf16, #tpu.memory_space<vmem>>, vector<1x8x8xbf16>
    %40 = vector.shape_cast %39 : vector<1x8x8xbf16> to vector<8x8xbf16>
    %c0_25 = arith.constant 0 : index
    %c0_26 = arith.constant 0 : index
    %c8_27 = arith.constant 8 : index
    %41 = vector.load %arg4[%c0_25, %c0_26, %c8_27] : memref<1x8x64xbf16, #tpu.memory_space<vmem>>, vector<1x8x8xbf16>
    %42 = vector.shape_cast %41 : vector<1x8x8xbf16> to vector<8x8xbf16>
    %c0_28 = arith.constant 0 : index
    %c0_29 = arith.constant 0 : index
    %c40 = arith.constant 40 : index
    %43 = vector.load %arg5[%c0_28, %c0_29, %c40] : memref<1x8x64xbf16, #tpu.memory_space<vmem>>, vector<1x8x8xbf16>
    %44 = vector.shape_cast %43 : vector<1x8x8xbf16> to vector<8x8xbf16>
    %cst_30 = arith.constant dense<0.000000e+00> : vector<8x8xf32>
    %45 = tpu.matmul %40, %42, %cst_30 {dimension_numbers = #tpu.dot_dimension_numbers<[1], [1], [0], [0], [0, 0, 1, 0], [], []>} : vector<8x8xbf16>, vector<8x8xbf16>, vector<8x8xf32> -> vector<8x8xf32>
    %cst_31 = arith.constant 0.353553385 : f32
    %46 = vector.broadcast %cst_31 : f32 to vector<8x8xf32>
    %47 = arith.mulf %45, %46 : vector<8x8xf32>
    %cst_32 = arith.constant -1.000000e+30 : f32
    %48 = vector.shape_cast %3 : vector<1x8xi1> to vector<1x8xi1>
    %49 = vector.broadcast %48 : vector<1x8xi1> to vector<8x8xi1>
    %50 = vector.broadcast %cst_32 : f32 to vector<8x8xf32>
    %51 = arith.select %49, %47, %50 : vector<8x8xi1>, vector<8x8xf32>
    %cst_33 = arith.constant dense<0xFF800000> : vector<8xf32>
    %52 = vector.multi_reduction <maximumf>, %51, %cst_33 [1] : vector<8x8xf32> to vector<8xf32>
    %53 = vector.shape_cast %52 : vector<8xf32> to vector<8x1xf32>
    %54 = vector.broadcast %53 : vector<8x1xf32> to vector<8x8xf32>
    %55 = arith.subf %51, %54 : vector<8x8xf32>
    %56 = arith.truncf %55 : vector<8x8xf32> to vector<8x8xbf16>
    %57 = math.exp %56 : vector<8x8xbf16>
    %58 = arith.extf %57 : vector<8x8xbf16> to vector<8x8xf32>
    %cst_34 = arith.constant dense<0.000000e+00> : vector<8xf32>
    %59 = vector.multi_reduction <add>, %58, %cst_34 [1] : vector<8x8xf32> to vector<8xf32>
    %60 = vector.shape_cast %59 : vector<8xf32> to vector<8x1xf32>
    %61 = tpu.reciprocal %60 {approx = true} : vector<8x1xf32> -> vector<8x1xf32>
    %62 = vector.broadcast %61 : vector<8x1xf32> to vector<8x8xf32>
    %63 = arith.mulf %58, %62 : vector<8x8xf32>
    %64 = arith.truncf %63 : vector<8x8xf32> to vector<8x8xbf16>
    %c0_35 = arith.constant 0 : index
    %c1 = arith.constant 1 : index
    %c0_36 = arith.constant 0 : index
    %c0_37 = arith.constant 0 : index
    %65 = vector.load %arg8[%c0_35, %c1, %c0_36, %c0_37] : memref<1x4x8x8xbf16, #tpu.memory_space<vmem>>, vector<1x1x8x8xbf16>
    %66 = vector.shape_cast %65 : vector<1x1x8x8xbf16> to vector<8x8xbf16>
    %67 = vector.shape_cast %64 : vector<8x8xbf16> to vector<1x1x8x8xbf16>
    tpu.vector_store %arg8[%c0_35, %c1, %c0_36, %c0_37], %67 {strides = array<i32>} : memref<1x4x8x8xbf16, #tpu.memory_space<vmem>>, vector<1x1x8x8xbf16>,
    %68 = arith.truncf %63 : vector<8x8xf32> to vector<8x8xbf16>
    %cst_38 = arith.constant dense<0.000000e+00> : vector<8x8xf32>
    %69 = tpu.matmul %68, %44, %cst_38 {dimension_numbers = #tpu.dot_dimension_numbers<[1], [0], [0], [1], [0, 0, 1, 1], [], []>} : vector<8x8xbf16>, vector<8x8xbf16>, vector<8x8xf32> -> vector<8x8xf32>
    %70 = arith.truncf %69 : vector<8x8xf32> to vector<8x8xbf16>
    %c0_39 = arith.constant 0 : index
    %c0_40 = arith.constant 0 : index
    %c8_41 = arith.constant 8 : index
    %71 = vector.load %arg7[%c0_39, %c0_40, %c8_41] : memref<1x8x32xbf16, #tpu.memory_space<vmem>>, vector<1x8x8xbf16>
    %72 = vector.shape_cast %71 : vector<1x8x8xbf16> to vector<8x8xbf16>
    %73 = vector.shape_cast %70 : vector<8x8xbf16> to vector<1x8x8xbf16>
    tpu.vector_store %arg7[%c0_39, %c0_40, %c8_41], %73 {strides = array<i32>} : memref<1x8x32xbf16, #tpu.memory_space<vmem>>, vector<1x8x8xbf16>,
    %c0_42 = arith.constant 0 : index
    %c0_43 = arith.constant 0 : index
    %c16 = arith.constant 16 : index
    %74 = vector.load %arg3[%c0_42, %c0_43, %c16] : memref<1x8x32xbf16, #tpu.memory_space<vmem>>, vector<1x8x8xbf16>
    %75 = vector.shape_cast %74 : vector<1x8x8xbf16> to vector<8x8xbf16>
    %c0_44 = arith.constant 0 : index
    %c0_45 = arith.constant 0 : index
    %c16_46 = arith.constant 16 : index
    %76 = vector.load %arg4[%c0_44, %c0_45, %c16_46] : memref<1x8x64xbf16, #tpu.memory_space<vmem>>, vector<1x8x8xbf16>
    %77 = vector.shape_cast %76 : vector<1x8x8xbf16> to vector<8x8xbf16>
    %c0_47 = arith.constant 0 : index
    %c0_48 = arith.constant 0 : index
    %c48 = arith.constant 48 : index
    %78 = vector.load %arg5[%c0_47, %c0_48, %c48] : memref<1x8x64xbf16, #tpu.memory_space<vmem>>, vector<1x8x8xbf16>
    %79 = vector.shape_cast %78 : vector<1x8x8xbf16> to vector<8x8xbf16>
    %cst_49 = arith.constant dense<0.000000e+00> : vector<8x8xf32>
    %80 = tpu.matmul %75, %77, %cst_49 {dimension_numbers = #tpu.dot_dimension_numbers<[1], [1], [0], [0], [0, 0, 1, 0], [], []>} : vector<8x8xbf16>, vector<8x8xbf16>, vector<8x8xf32> -> vector<8x8xf32>
    %cst_50 = arith.constant 0.353553385 : f32
    %81 = vector.broadcast %cst_50 : f32 to vector<8x8xf32>
    %82 = arith.mulf %80, %81 : vector<8x8xf32>
    %cst_51 = arith.constant -1.000000e+30 : f32
    %83 = vector.shape_cast %3 : vector<1x8xi1> to vector<1x8xi1>
    %84 = vector.broadcast %83 : vector<1x8xi1> to vector<8x8xi1>
    %85 = vector.broadcast %cst_51 : f32 to vector<8x8xf32>
    %86 = arith.select %84, %82, %85 : vector<8x8xi1>, vector<8x8xf32>
    %cst_52 = arith.constant dense<0xFF800000> : vector<8xf32>
    %87 = vector.multi_reduction <maximumf>, %86, %cst_52 [1] : vector<8x8xf32> to vector<8xf32>
    %88 = vector.shape_cast %87 : vector<8xf32> to vector<8x1xf32>
    %89 = vector.broadcast %88 : vector<8x1xf32> to vector<8x8xf32>
    %90 = arith.subf %86, %89 : vector<8x8xf32>
    %91 = arith.truncf %90 : vector<8x8xf32> to vector<8x8xbf16>
    %92 = math.exp %91 : vector<8x8xbf16>
    %93 = arith.extf %92 : vector<8x8xbf16> to vector<8x8xf32>
    %cst_53 = arith.constant dense<0.000000e+00> : vector<8xf32>
    %94 = vector.multi_reduction <add>, %93, %cst_53 [1] : vector<8x8xf32> to vector<8xf32>
    %95 = vector.shape_cast %94 : vector<8xf32> to vector<8x1xf32>
    %96 = tpu.reciprocal %95 {approx = true} : vector<8x1xf32> -> vector<8x1xf32>
    %97 = vector.broadcast %96 : vector<8x1xf32> to vector<8x8xf32>
    %98 = arith.mulf %93, %97 : vector<8x8xf32>
    %99 = arith.truncf %98 : vector<8x8xf32> to vector<8x8xbf16>
    %c0_54 = arith.constant 0 : index
    %c2 = arith.constant 2 : index
    %c0_55 = arith.constant 0 : index
    %c0_56 = arith.constant 0 : index
    %100 = vector.load %arg8[%c0_54, %c2, %c0_55, %c0_56] : memref<1x4x8x8xbf16, #tpu.memory_space<vmem>>, vector<1x1x8x8xbf16>
    %101 = vector.shape_cast %100 : vector<1x1x8x8xbf16> to vector<8x8xbf16>
    %102 = vector.shape_cast %99 : vector<8x8xbf16> to vector<1x1x8x8xbf16>
    tpu.vector_store %arg8[%c0_54, %c2, %c0_55, %c0_56], %102 {strides = array<i32>} : memref<1x4x8x8xbf16, #tpu.memory_space<vmem>>, vector<1x1x8x8xbf16>,
    %103 = arith.truncf %98 : vector<8x8xf32> to vector<8x8xbf16>
    %cst_57 = arith.constant dense<0.000000e+00> : vector<8x8xf32>
    %104 = tpu.matmul %103, %79, %cst_57 {dimension_numbers = #tpu.dot_dimension_numbers<[1], [0], [0], [1], [0, 0, 1, 1], [], []>} : vector<8x8xbf16>, vector<8x8xbf16>, vector<8x8xf32> -> vector<8x8xf32>
    %105 = arith.truncf %104 : vector<8x8xf32> to vector<8x8xbf16>
    %c0_58 = arith.constant 0 : index
    %c0_59 = arith.constant 0 : index
    %c16_60 = arith.constant 16 : index
    %106 = vector.load %arg7[%c0_58, %c0_59, %c16_60] : memref<1x8x32xbf16, #tpu.memory_space<vmem>>, vector<1x8x8xbf16>
    %107 = vector.shape_cast %106 : vector<1x8x8xbf16> to vector<8x8xbf16>
    %108 = vector.shape_cast %105 : vector<8x8xbf16> to vector<1x8x8xbf16>
    tpu.vector_store %arg7[%c0_58, %c0_59, %c16_60], %108 {strides = array<i32>} : memref<1x8x32xbf16, #tpu.memory_space<vmem>>, vector<1x8x8xbf16>,
    %c0_61 = arith.constant 0 : index
    %c0_62 = arith.constant 0 : index
    %c24 = arith.constant 24 : index
    %109 = vector.load %arg3[%c0_61, %c0_62, %c24] : memref<1x8x32xbf16, #tpu.memory_space<vmem>>, vector<1x8x8xbf16>
    %110 = vector.shape_cast %109 : vector<1x8x8xbf16> to vector<8x8xbf16>
    %c0_63 = arith.constant 0 : index
    %c0_64 = arith.constant 0 : index
    %c24_65 = arith.constant 24 : index
    %111 = vector.load %arg4[%c0_63, %c0_64, %c24_65] : memref<1x8x64xbf16, #tpu.memory_space<vmem>>, vector<1x8x8xbf16>
    %112 = vector.shape_cast %111 : vector<1x8x8xbf16> to vector<8x8xbf16>
    %c0_66 = arith.constant 0 : index
    %c0_67 = arith.constant 0 : index
    %c56 = arith.constant 56 : index
    %113 = vector.load %arg5[%c0_66, %c0_67, %c56] : memref<1x8x64xbf16, #tpu.memory_space<vmem>>, vector<1x8x8xbf16>
    %114 = vector.shape_cast %113 : vector<1x8x8xbf16> to vector<8x8xbf16>
    %cst_68 = arith.constant dense<0.000000e+00> : vector<8x8xf32>
    %115 = tpu.matmul %110, %112, %cst_68 {dimension_numbers = #tpu.dot_dimension_numbers<[1], [1], [0], [0], [0, 0, 1, 0], [], []>} : vector<8x8xbf16>, vector<8x8xbf16>, vector<8x8xf32> -> vector<8x8xf32>
    %cst_69 = arith.constant 0.353553385 : f32
    %116 = vector.broadcast %cst_69 : f32 to vector<8x8xf32>
    %117 = arith.mulf %115, %116 : vector<8x8xf32>
    %cst_70 = arith.constant -1.000000e+30 : f32
    %118 = vector.shape_cast %3 : vector<1x8xi1> to vector<1x8xi1>
    %119 = vector.broadcast %118 : vector<1x8xi1> to vector<8x8xi1>
    %120 = vector.broadcast %cst_70 : f32 to vector<8x8xf32>
    %121 = arith.select %119, %117, %120 : vector<8x8xi1>, vector<8x8xf32>
    %cst_71 = arith.constant dense<0xFF800000> : vector<8xf32>
    %122 = vector.multi_reduction <maximumf>, %121, %cst_71 [1] : vector<8x8xf32> to vector<8xf32>
    %123 = vector.shape_cast %122 : vector<8xf32> to vector<8x1xf32>
    %124 = vector.broadcast %123 : vector<8x1xf32> to vector<8x8xf32>
    %125 = arith.subf %121, %124 : vector<8x8xf32>
    %126 = arith.truncf %125 : vector<8x8xf32> to vector<8x8xbf16>
    %127 = math.exp %126 : vector<8x8xbf16>
    %128 = arith.extf %127 : vector<8x8xbf16> to vector<8x8xf32>
    %cst_72 = arith.constant dense<0.000000e+00> : vector<8xf32>
    %129 = vector.multi_reduction <add>, %128, %cst_72 [1] : vector<8x8xf32> to vector<8xf32>
    %130 = vector.shape_cast %129 : vector<8xf32> to vector<8x1xf32>
    %131 = tpu.reciprocal %130 {approx = true} : vector<8x1xf32> -> vector<8x1xf32>
    %132 = vector.broadcast %131 : vector<8x1xf32> to vector<8x8xf32>
    %133 = arith.mulf %128, %132 : vector<8x8xf32>
    %134 = arith.truncf %133 : vector<8x8xf32> to vector<8x8xbf16>
    %c0_73 = arith.constant 0 : index
    %c3 = arith.constant 3 : index
    %c0_74 = arith.constant 0 : index
    %c0_75 = arith.constant 0 : index
    %135 = vector.load %arg8[%c0_73, %c3, %c0_74, %c0_75] : memref<1x4x8x8xbf16, #tpu.memory_space<vmem>>, vector<1x1x8x8xbf16>
    %136 = vector.shape_cast %135 : vector<1x1x8x8xbf16> to vector<8x8xbf16>
    %137 = vector.shape_cast %134 : vector<8x8xbf16> to vector<1x1x8x8xbf16>
    tpu.vector_store %arg8[%c0_73, %c3, %c0_74, %c0_75], %137 {strides = array<i32>} : memref<1x4x8x8xbf16, #tpu.memory_space<vmem>>, vector<1x1x8x8xbf16>,
    %138 = arith.truncf %133 : vector<8x8xf32> to vector<8x8xbf16>
    %cst_76 = arith.constant dense<0.000000e+00> : vector<8x8xf32>
    %139 = tpu.matmul %138, %114, %cst_76 {dimension_numbers = #tpu.dot_dimension_numbers<[1], [0], [0], [1], [0, 0, 1, 1], [], []>} : vector<8x8xbf16>, vector<8x8xbf16>, vector<8x8xf32> -> vector<8x8xf32>
    %140 = arith.truncf %139 : vector<8x8xf32> to vector<8x8xbf16>
    %c0_77 = arith.constant 0 : index
    %c0_78 = arith.constant 0 : index
    %c24_79 = arith.constant 24 : index
    %141 = vector.load %arg7[%c0_77, %c0_78, %c24_79] : memref<1x8x32xbf16, #tpu.memory_space<vmem>>, vector<1x8x8xbf16>
    %142 = vector.shape_cast %141 : vector<1x8x8xbf16> to vector<8x8xbf16>
    %143 = vector.shape_cast %140 : vector<8x8xbf16> to vector<1x8x8xbf16>
    tpu.vector_store %arg7[%c0_77, %c0_78, %c24_79], %143 {strides = array<i32>} : memref<1x8x32xbf16, #tpu.memory_space<vmem>>, vector<1x8x8xbf16>,
    return
  }
  func.func @transform_0(%arg0: i32, %arg1: i32, %arg2: i32) -> (i32, i32, i32) {
    %c0_i32 = arith.constant 0 : i32
    %c0_i32_0 = arith.constant 0 : i32
    return %arg0, %arg2, %c0_i32 : i32, i32, i32
  }
  func.func @transform_1(%arg0: i32, %arg1: i32, %arg2: i32) -> (i32, i32, i32) {
    %c0_i32 = arith.constant 0 : i32
    %c0_i32_0 = arith.constant 0 : i32
    %c0_i32_1 = arith.constant 0 : i32
    return %arg0, %c0_i32, %c0_i32_0 : i32, i32, i32
  }
  func.func @transform_2(%arg0: i32, %arg1: i32, %arg2: i32) -> (i32, i32, i32) {
    %c0_i32 = arith.constant 0 : i32
    %c0_i32_0 = arith.constant 0 : i32
    %c0_i32_1 = arith.constant 0 : i32
    return %arg0, %c0_i32, %c0_i32_0 : i32, i32, i32
  }
  func.func @transform_3(%arg0: i32, %arg1: i32, %arg2: i32) -> (i32, i32, i32) {
    %c0_i32 = arith.constant 0 : i32
    %c0_i32_0 = arith.constant 0 : i32
    %c0_i32_1 = arith.constant 0 : i32
    return %arg0, %c0_i32, %c0_i32_0 : i32, i32, i32
  }
  func.func @transform_4(%arg0: i32, %arg1: i32, %arg2: i32) -> (i32, i32, i32) {
    %c0_i32 = arith.constant 0 : i32
    return %arg0, %arg2, %arg1 : i32, i32, i32
  }
  func.func @transform_5(%arg0: i32, %arg1: i32, %arg2: i32) -> (i32, i32, i32, i32) {
    %c0_i32 = arith.constant 0 : i32
    %c0_i32_0 = arith.constant 0 : i32
    return %arg0, %arg1, %arg2, %c0_i32 : i32, i32, i32, i32
  }
}

module attributes {stable_mosaic.version = 11 : i64} {
  func.func @_matmul_kernel(%arg0: i32, %arg1: i32, %arg2: i32, %arg3: memref<16x32xbf16, #tpu.memory_space<vmem>>, %arg4: memref<32x128xbf16, #tpu.memory_space<vmem>>, %arg5: memref<1x128xf32, #tpu.memory_space<vmem>>, %arg6: memref<16x128xbf16, #tpu.memory_space<vmem>>, %arg7: memref<16x128xf32, #tpu.memory_space<vmem>>) attributes {dimension_semantics = [#tpu.dimension_semantics<parallel>, #tpu.dimension_semantics<parallel>, #tpu.dimension_semantics<arbitrary>], iteration_bounds = array<i64: 1, 1, 1>, scalar_prefetch = 0 : i64, scratch_operands = 1 : i64, tpu.core_type = #tpu.core_type<tc>, window_params = [{transform_indices = @transform_0, window_bounds = array<i64: 16, 32>}, {transform_indices = @transform_1, window_bounds = array<i64: 32, 128>}, {transform_indices = @transform_2, window_bounds = array<i64: 1, 128>}, {transform_indices = @transform_3, window_bounds = array<i64: 16, 128>}]} {
    %c0_i32 = arith.constant 0 : i32
    %0 = arith.cmpi eq, %arg2, %c0_i32 : i32
    %1 = arith.extui %0 : i1 to i32
    %c0_i32_0 = arith.constant 0 : i32
    %2 = arith.cmpi ne, %1, %c0_i32_0 : i32
    scf.if %2 {
      %cst_10 = arith.constant 0.000000e+00 : f32
      %12 = vector.broadcast %cst_10 : f32 to vector<16x128xf32>
      %c0_11 = arith.constant 0 : index
      %c0_12 = arith.constant 0 : index
      %13 = vector.load %arg7[%c0_11, %c0_12] : memref<16x128xf32, #tpu.memory_space<vmem>>, vector<16x128xf32>
      tpu.vector_store %arg7[%c0_11, %c0_12], %12 {strides = array<i32>} : memref<16x128xf32, #tpu.memory_space<vmem>>, vector<16x128xf32>,
    } else {
    }
    %c0 = arith.constant 0 : index
    %c0_1 = arith.constant 0 : index
    %3 = vector.load %arg7[%c0, %c0_1] : memref<16x128xf32, #tpu.memory_space<vmem>>, vector<16x128xf32>
    %c0_2 = arith.constant 0 : index
    %c0_3 = arith.constant 0 : index
    %4 = vector.load %arg3[%c0_2, %c0_3] : memref<16x32xbf16, #tpu.memory_space<vmem>>, vector<16x32xbf16>
    %c0_4 = arith.constant 0 : index
    %c0_5 = arith.constant 0 : index
    %5 = vector.load %arg4[%c0_4, %c0_5] : memref<32x128xbf16, #tpu.memory_space<vmem>>, vector<32x128xbf16>
    %cst = arith.constant dense<0.000000e+00> : vector<16x128xf32>
    %6 = tpu.matmul %4, %5, %cst {dimension_numbers = #tpu.dot_dimension_numbers<[1], [0], [0], [1], [0, 0, 1, 1], [], []>} : vector<16x32xbf16>, vector<32x128xbf16>, vector<16x128xf32> -> vector<16x128xf32>
    %7 = arith.addf %3, %6 : vector<16x128xf32>
    %c0_6 = arith.constant 0 : index
    %c0_7 = arith.constant 0 : index
    %8 = vector.load %arg7[%c0_6, %c0_7] : memref<16x128xf32, #tpu.memory_space<vmem>>, vector<16x128xf32>
    tpu.vector_store %arg7[%c0_6, %c0_7], %7 {strides = array<i32>} : memref<16x128xf32, #tpu.memory_space<vmem>>, vector<16x128xf32>,
    %c0_i32_8 = arith.constant 0 : i32
    %9 = arith.cmpi eq, %arg2, %c0_i32_8 : i32
    %10 = arith.extui %9 : i1 to i32
    %c0_i32_9 = arith.constant 0 : i32
    %11 = arith.cmpi ne, %10, %c0_i32_9 : i32
    scf.if %11 {
      %c0_10 = arith.constant 0 : index
      %c0_11 = arith.constant 0 : index
      %12 = vector.load %arg7[%c0_10, %c0_11] : memref<16x128xf32, #tpu.memory_space<vmem>>, vector<16x128xf32>
      %c0_12 = arith.constant 0 : index
      %c0_13 = arith.constant 0 : index
      %13 = vector.load %arg5[%c0_12, %c0_13] : memref<1x128xf32, #tpu.memory_space<vmem>>, vector<1x128xf32>
      %14 = vector.broadcast %13 : vector<1x128xf32> to vector<16x128xf32>
      %15 = arith.addf %12, %14 : vector<16x128xf32>
      %cst_14 = arith.constant 5.000000e-01 : f32
      %16 = vector.broadcast %cst_14 : f32 to vector<16x128xf32>
      %17 = arith.mulf %16, %15 : vector<16x128xf32>
      %cst_15 = arith.constant 4.471500e-02 : f32
      %18 = vector.broadcast %cst_15 : f32 to vector<16x128xf32>
      %19 = arith.mulf %18, %15 : vector<16x128xf32>
      %20 = arith.mulf %19, %15 : vector<16x128xf32>
      %21 = arith.mulf %20, %15 : vector<16x128xf32>
      %22 = arith.addf %15, %21 : vector<16x128xf32>
      %cst_16 = arith.constant 0.797884583 : f32
      %23 = vector.broadcast %cst_16 : f32 to vector<16x128xf32>
      %24 = arith.mulf %23, %22 : vector<16x128xf32>
      %25 = math.tanh %24 : vector<16x128xf32>
      %cst_17 = arith.constant 1.000000e+00 : f32
      %26 = vector.broadcast %cst_17 : f32 to vector<16x128xf32>
      %27 = arith.addf %26, %25 : vector<16x128xf32>
      %28 = arith.mulf %17, %27 : vector<16x128xf32>
      %29 = arith.truncf %28 : vector<16x128xf32> to vector<16x128xbf16>
      %c0_18 = arith.constant 0 : index
      %c0_19 = arith.constant 0 : index
      %30 = vector.load %arg6[%c0_18, %c0_19] : memref<16x128xbf16, #tpu.memory_space<vmem>>, vector<16x128xbf16>
      tpu.vector_store %arg6[%c0_18, %c0_19], %29 {strides = array<i32>} : memref<16x128xbf16, #tpu.memory_space<vmem>>, vector<16x128xbf16>,
    } else {
    }
    return
  }
  func.func @transform_0(%arg0: i32, %arg1: i32, %arg2: i32) -> (i32, i32) {
    %c0_i32 = arith.constant 0 : i32
    return %arg0, %arg2 : i32, i32
  }
  func.func @transform_1(%arg0: i32, %arg1: i32, %arg2: i32) -> (i32, i32) {
    %c0_i32 = arith.constant 0 : i32
    return %arg2, %arg1 : i32, i32
  }
  func.func @transform_2(%arg0: i32, %arg1: i32, %arg2: i32) -> (i32, i32) {
    %c0_i32 = arith.constant 0 : i32
    %c0_i32_0 = arith.constant 0 : i32
    return %c0_i32, %arg1 : i32, i32
  }
  func.func @transform_3(%arg0: i32, %arg1: i32, %arg2: i32) -> (i32, i32) {
    %c0_i32 = arith.constant 0 : i32
    return %arg0, %arg1 : i32, i32
  }
}

module attributes {stable_mosaic.version = 11 : i64} {
  func.func @_matmul_kernel(%arg0: i32, %arg1: i32, %arg2: i32, %arg3: memref<16x128xbf16, #tpu.memory_space<vmem>>, %arg4: memref<128x32xbf16, #tpu.memory_space<vmem>>, %arg5: memref<1x32xf32, #tpu.memory_space<vmem>>, %arg6: memref<16x32xbf16, #tpu.memory_space<vmem>>, %arg7: memref<16x32xbf16, #tpu.memory_space<vmem>>, %arg8: memref<16x32xf32, #tpu.memory_space<vmem>>) attributes {dimension_semantics = [#tpu.dimension_semantics<parallel>, #tpu.dimension_semantics<parallel>, #tpu.dimension_semantics<arbitrary>], iteration_bounds = array<i64: 1, 1, 1>, scalar_prefetch = 0 : i64, scratch_operands = 1 : i64, tpu.core_type = #tpu.core_type<tc>, window_params = [{transform_indices = @transform_0, window_bounds = array<i64: 16, 128>}, {transform_indices = @transform_1, window_bounds = array<i64: 128, 32>}, {transform_indices = @transform_2, window_bounds = array<i64: 1, 32>}, {transform_indices = @transform_3, window_bounds = array<i64: 16, 32>}, {transform_indices = @transform_4, window_bounds = array<i64: 16, 32>}]} {
    %c0_i32 = arith.constant 0 : i32
    %0 = arith.cmpi eq, %arg2, %c0_i32 : i32
    %1 = arith.extui %0 : i1 to i32
    %c0_i32_0 = arith.constant 0 : i32
    %2 = arith.cmpi ne, %1, %c0_i32_0 : i32
    scf.if %2 {
      %cst_10 = arith.constant 0.000000e+00 : f32
      %12 = vector.broadcast %cst_10 : f32 to vector<16x32xf32>
      %c0_11 = arith.constant 0 : index
      %c0_12 = arith.constant 0 : index
      %13 = vector.load %arg8[%c0_11, %c0_12] : memref<16x32xf32, #tpu.memory_space<vmem>>, vector<16x32xf32>
      tpu.vector_store %arg8[%c0_11, %c0_12], %12 {strides = array<i32>} : memref<16x32xf32, #tpu.memory_space<vmem>>, vector<16x32xf32>,
    } else {
    }
    %c0 = arith.constant 0 : index
    %c0_1 = arith.constant 0 : index
    %3 = vector.load %arg8[%c0, %c0_1] : memref<16x32xf32, #tpu.memory_space<vmem>>, vector<16x32xf32>
    %c0_2 = arith.constant 0 : index
    %c0_3 = arith.constant 0 : index
    %4 = vector.load %arg3[%c0_2, %c0_3] : memref<16x128xbf16, #tpu.memory_space<vmem>>, vector<16x128xbf16>
    %c0_4 = arith.constant 0 : index
    %c0_5 = arith.constant 0 : index
    %5 = vector.load %arg4[%c0_4, %c0_5] : memref<128x32xbf16, #tpu.memory_space<vmem>>, vector<128x32xbf16>
    %cst = arith.constant dense<0.000000e+00> : vector<16x32xf32>
    %6 = tpu.matmul %4, %5, %cst {dimension_numbers = #tpu.dot_dimension_numbers<[1], [0], [0], [1], [0, 0, 1, 1], [], []>} : vector<16x128xbf16>, vector<128x32xbf16>, vector<16x32xf32> -> vector<16x32xf32>
    %7 = arith.addf %3, %6 : vector<16x32xf32>
    %c0_6 = arith.constant 0 : index
    %c0_7 = arith.constant 0 : index
    %8 = vector.load %arg8[%c0_6, %c0_7] : memref<16x32xf32, #tpu.memory_space<vmem>>, vector<16x32xf32>
    tpu.vector_store %arg8[%c0_6, %c0_7], %7 {strides = array<i32>} : memref<16x32xf32, #tpu.memory_space<vmem>>, vector<16x32xf32>,
    %c0_i32_8 = arith.constant 0 : i32
    %9 = arith.cmpi eq, %arg2, %c0_i32_8 : i32
    %10 = arith.extui %9 : i1 to i32
    %c0_i32_9 = arith.constant 0 : i32
    %11 = arith.cmpi ne, %10, %c0_i32_9 : i32
    scf.if %11 {
      %c0_10 = arith.constant 0 : index
      %c0_11 = arith.constant 0 : index
      %12 = vector.load %arg8[%c0_10, %c0_11] : memref<16x32xf32, #tpu.memory_space<vmem>>, vector<16x32xf32>
      %c0_12 = arith.constant 0 : index
      %c0_13 = arith.constant 0 : index
      %13 = vector.load %arg5[%c0_12, %c0_13] : memref<1x32xf32, #tpu.memory_space<vmem>>, vector<1x32xf32>
      %14 = vector.broadcast %13 : vector<1x32xf32> to vector<16x32xf32>
      %15 = arith.addf %12, %14 : vector<16x32xf32>
      %c0_14 = arith.constant 0 : index
      %c0_15 = arith.constant 0 : index
      %16 = vector.load %arg6[%c0_14, %c0_15] : memref<16x32xbf16, #tpu.memory_space<vmem>>, vector<16x32xbf16>
      %17 = arith.extf %16 : vector<16x32xbf16> to vector<16x32xf32>
      %18 = arith.addf %15, %17 : vector<16x32xf32>
      %19 = arith.truncf %18 : vector<16x32xf32> to vector<16x32xbf16>
      %c0_16 = arith.constant 0 : index
      %c0_17 = arith.constant 0 : index
      %20 = vector.load %arg7[%c0_16, %c0_17] : memref<16x32xbf16, #tpu.memory_space<vmem>>, vector<16x32xbf16>
      tpu.vector_store %arg7[%c0_16, %c0_17], %19 {strides = array<i32>} : memref<16x32xbf16, #tpu.memory_space<vmem>>, vector<16x32xbf16>,
    } else {
    }
    return
  }
  func.func @transform_0(%arg0: i32, %arg1: i32, %arg2: i32) -> (i32, i32) {
    %c0_i32 = arith.constant 0 : i32
    return %arg0, %arg2 : i32, i32
  }
  func.func @transform_1(%arg0: i32, %arg1: i32, %arg2: i32) -> (i32, i32) {
    %c0_i32 = arith.constant 0 : i32
    return %arg2, %arg1 : i32, i32
  }
  func.func @transform_2(%arg0: i32, %arg1: i32, %arg2: i32) -> (i32, i32) {
    %c0_i32 = arith.constant 0 : i32
    %c0_i32_0 = arith.constant 0 : i32
    return %c0_i32, %arg1 : i32, i32
  }
  func.func @transform_3(%arg0: i32, %arg1: i32, %arg2: i32) -> (i32, i32) {
    %c0_i32 = arith.constant 0 : i32
    return %arg0, %arg1 : i32, i32
  }
  func.func @transform_4(%arg0: i32, %arg1: i32, %arg2: i32) -> (i32, i32) {
    %c0_i32 = arith.constant 0 : i32
    return %arg0, %arg1 : i32, i32
  }
}

module attributes {stable_mosaic.version = 11 : i64} {
  func.func @_matmul_kernel(%arg0: i32, %arg1: i32, %arg2: i32, %arg3: memref<16x32xbf16, #tpu.memory_space<vmem>>, %arg4: memref<64x32xbf16, #tpu.memory_space<vmem>>, %arg5: memref<16x64xf32, #tpu.memory_space<vmem>>, %arg6: memref<16x64xf32, #tpu.memory_space<vmem>>) attributes {dimension_semantics = [#tpu.dimension_semantics<parallel>, #tpu.dimension_semantics<parallel>, #tpu.dimension_semantics<arbitrary>], iteration_bounds = array<i64: 1, 1, 1>, scalar_prefetch = 0 : i64, scratch_operands = 1 : i64, tpu.core_type = #tpu.core_type<tc>, window_params = [{transform_indices = @transform_0, window_bounds = array<i64: 16, 32>}, {transform_indices = @transform_1, window_bounds = array<i64: 64, 32>}, {transform_indices = @transform_2, window_bounds = array<i64: 16, 64>}]} {
    %c0_i32 = arith.constant 0 : i32
    %0 = arith.cmpi eq, %arg2, %c0_i32 : i32
    %1 = arith.extui %0 : i1 to i32
    %c0_i32_0 = arith.constant 0 : i32
    %2 = arith.cmpi ne, %1, %c0_i32_0 : i32
    scf.if %2 {
      %cst_10 = arith.constant 0.000000e+00 : f32
      %12 = vector.broadcast %cst_10 : f32 to vector<16x64xf32>
      %c0_11 = arith.constant 0 : index
      %c0_12 = arith.constant 0 : index
      %13 = vector.load %arg6[%c0_11, %c0_12] : memref<16x64xf32, #tpu.memory_space<vmem>>, vector<16x64xf32>
      tpu.vector_store %arg6[%c0_11, %c0_12], %12 {strides = array<i32>} : memref<16x64xf32, #tpu.memory_space<vmem>>, vector<16x64xf32>,
    } else {
    }
    %c0 = arith.constant 0 : index
    %c0_1 = arith.constant 0 : index
    %3 = vector.load %arg6[%c0, %c0_1] : memref<16x64xf32, #tpu.memory_space<vmem>>, vector<16x64xf32>
    %c0_2 = arith.constant 0 : index
    %c0_3 = arith.constant 0 : index
    %4 = vector.load %arg3[%c0_2, %c0_3] : memref<16x32xbf16, #tpu.memory_space<vmem>>, vector<16x32xbf16>
    %c0_4 = arith.constant 0 : index
    %c0_5 = arith.constant 0 : index
    %5 = vector.load %arg4[%c0_4, %c0_5] : memref<64x32xbf16, #tpu.memory_space<vmem>>, vector<64x32xbf16>
    %cst = arith.constant dense<0.000000e+00> : vector<16x64xf32>
    %6 = tpu.matmul %4, %5, %cst {dimension_numbers = #tpu.dot_dimension_numbers<[1], [1], [0], [0], [0, 0, 1, 0], [], []>} : vector<16x32xbf16>, vector<64x32xbf16>, vector<16x64xf32> -> vector<16x64xf32>
    %7 = arith.addf %3, %6 : vector<16x64xf32>
    %c0_6 = arith.constant 0 : index
    %c0_7 = arith.constant 0 : index
    %8 = vector.load %arg6[%c0_6, %c0_7] : memref<16x64xf32, #tpu.memory_space<vmem>>, vector<16x64xf32>
    tpu.vector_store %arg6[%c0_6, %c0_7], %7 {strides = array<i32>} : memref<16x64xf32, #tpu.memory_space<vmem>>, vector<16x64xf32>,
    %c0_i32_8 = arith.constant 0 : i32
    %9 = arith.cmpi eq, %arg2, %c0_i32_8 : i32
    %10 = arith.extui %9 : i1 to i32
    %c0_i32_9 = arith.constant 0 : i32
    %11 = arith.cmpi ne, %10, %c0_i32_9 : i32
    scf.if %11 {
      %c0_10 = arith.constant 0 : index
      %c0_11 = arith.constant 0 : index
      %12 = vector.load %arg6[%c0_10, %c0_11] : memref<16x64xf32, #tpu.memory_space<vmem>>, vector<16x64xf32>
      %c0_12 = arith.constant 0 : index
      %c0_13 = arith.constant 0 : index
      %13 = vector.load %arg5[%c0_12, %c0_13] : memref<16x64xf32, #tpu.memory_space<vmem>>, vector<16x64xf32>
      tpu.vector_store %arg5[%c0_12, %c0_13], %12 {strides = array<i32>} : memref<16x64xf32, #tpu.memory_space<vmem>>, vector<16x64xf32>,
    } else {
    }
    return
  }
  func.func @transform_0(%arg0: i32, %arg1: i32, %arg2: i32) -> (i32, i32) {
    %c0_i32 = arith.constant 0 : i32
    return %arg0, %arg2 : i32, i32
  }
  func.func @transform_1(%arg0: i32, %arg1: i32, %arg2: i32) -> (i32, i32) {
    %c0_i32 = arith.constant 0 : i32
    return %arg1, %arg2 : i32, i32
  }
  func.func @transform_2(%arg0: i32, %arg1: i32, %arg2: i32) -> (i32, i32) {
    %c0_i32 = arith.constant 0 : i32
    return %arg0, %arg1 : i32, i32
  }
}

</mosaic_0001>

<bundles_post_ra>
// kernel: decoder_forward.26
= control target key start
LH: loop header
LB: loop body
LE: loop exit
PB: predicated region body
PF: predicated region fallthrough
CT: control target
= control target key end

     0   :  { %8 = vsyncpa [#allocation3], 0  ;;  %s336_s0 = inlined_call_operand.hbm [shape: bf16[16,32], index: 0, kind: input, shape index: {}]   ;;  %s337_s1 = inlined_call_operand.hbm [shape: f32[1,32], index: 1, kind: input, shape index: {}]   ;;  %s338_s2 = inlined_call_operand.hbm [shape: f32[1,32], index: 2, kind: input, shape index: {}]   ;;  %s339_s3 = inlined_call_operand.hbm [shape: bf16[16,32], index: 3, kind: output, shape index: {}]  }
   0x1   :  { %9 = vsyncpa [#allocation6], 0 }
   0x2   :  { %10 = vsyncpa [#allocation4], 0  ;;  %s245_s12 = smov [#allocation5]   ;;  %s246_s14 = smov [#allocation2]  }
   0x3   :  { %s29_s13 = sshll.u32 %s245_s12, 4  ;;  %s16_s15 = sshll.u32 %s246_s14, 4  ;;  %s30_s13 = int_to_ptr.vmem [resolvable:$true] %s29_s13  ;;  %s271_s15 = int_to_ptr.vmem [resolvable:$true] %s16_s15 }
   0x4   :  { %s151_s18 = scalar_lea.hbm %s337_s1, 16 }
   0x5   :  { %p152_p0 = scmp.ne.s32.totalorder %s337_s1, %s151_s18  ;;  %p155_p1 = scmp.lt.u32.totalorder %s151_s18, %s337_s1 }
   0x7   :  { %p157_p2 = pnand %p155_p1, %p152_p0 }
   0x9   :  { %160 = shalt.err (!%p157_p2)
}
   0xa   :  { %s161_s23 = scalar_lea.vmem %s30_s13, 16  ;;  %s165_s24 = scalar_lea.vmem %s30_s13, 32 }
   0xb   :  { %p162_p3 = scmp.ne.s32.totalorder %s30_s13, %s161_s23  ;;  %p166_p4 = scmp.lt.s32.totalorder %s30_s13, %s30_s13 }
   0xc   :  { %p167_p5 = scmp.lt.s32.totalorder %s165_s24, %s161_s23 }
   0xe   :  { %p168_p6 = por %p167_p5, %p166_p4 }
  0x10   :  { %p169_p7 = pnand %p168_p6, %p162_p3 }
  0x12   :  { %172 = shalt.err (!%p169_p7)
}
  0x13   :  { %32 = dma.hbm_to_vmem [thread:$0]  %s337_s1, 16, %s30_s13, [#allocation6]  }
  0x14   :  { %s173_s29 = scalar_lea.hbm %s336_s0, 128 }
  0x15   :  { %p174_p8 = scmp.ne.s32.totalorder %s336_s0, %s173_s29  ;;  %p177_p9 = scmp.lt.u32.totalorder %s173_s29, %s336_s0 }
  0x17   :  { %p179_p10 = pnand %p177_p9, %p174_p8 }
  0x19   :  { %182 = shalt.err (!%p179_p10)
}
  0x1a   :  { %s183_s7 = scalar_lea.vmem %s271_s15, 128  ;;  %p188_p12 = scmp.lt.s32.totalorder %s271_s15, %s271_s15 }
  0x1b   :  { %p184_p11 = scmp.ne.s32.totalorder %s271_s15, %s183_s7  ;;  %p189_p13 = scmp.lt.s32.totalorder %s183_s7, %s183_s7 }
  0x1d   :  { %p190_p0 = por %p189_p13, %p188_p12 }
  0x1f   :  { %p191_p1 = pnand %p190_p0, %p184_p11 }
  0x21   :  { %194 = shalt.err (!%p191_p1)
}
  0x22   :  { %s247_s1 = smov 64   ;;  %s248_s8 = smov 4  }
  0x23   :  { %22 = dma.hbm_to_vmem [thread:$0]  %s336_s0, 128, %s271_s15, [#allocation3], %s247_s1, %s247_s1, %s248_s8  }
  0x24   :  { %s249_s11 = smov [#allocation7]   ;;  %s195_s16 = scalar_lea.hbm %s338_s2, 16 }
  0x25   :  { %s39_s12 = sshll.u32 %s249_s11, 4  ;;  %p196_p2 = scmp.ne.s32.totalorder %s338_s2, %s195_s16  ;;  %s40_s12 = int_to_ptr.vmem [resolvable:$true] %s39_s12 }
  0x26   :  { %p199_p3 = scmp.lt.u32.totalorder %s195_s16, %s338_s2 }
  0x28   :  { %p201_p4 = pnand %p199_p3, %p196_p2 }
  0x2a   :  { %204 = shalt.err (!%p201_p4)
}
  0x2b   :  { %s205_s21 = scalar_lea.vmem %s40_s12, 16  ;;  %s209_s0 = scalar_lea.vmem %s40_s12, 32 }
  0x2c   :  { %p206_p5 = scmp.ne.s32.totalorder %s40_s12, %s205_s21  ;;  %p210_p6 = scmp.lt.s32.totalorder %s40_s12, %s40_s12 }
  0x2d   :  { %p211_p7 = scmp.lt.s32.totalorder %s209_s0, %s205_s21 }
  0x2f   :  { %p212_p8 = por %p211_p7, %p210_p6 }
  0x31   :  { %p213_p9 = pnand %p212_p8, %p206_p5 }
  0x33   :  { %216 = shalt.err (!%p213_p9)
}
  0x34   :  { %42 = dma.hbm_to_vmem [thread:$0]  %s338_s2, 16, %s40_s12, [#allocation6]  }
  0x35   :  { %239 = dma.done.wait [#allocation3], 128  }
  0x36   :  { %240 = vsyncadd [#allocation3], 4294967168 }
  0x37   :  { %241 = dma.done.wait [#allocation6], 32  }
  0x38   :  { %242 = vsyncadd [#allocation6], 4294967264  ;;  %v138_v0 = vld [vmem:[#allocation2] sm:$0xff]   ;;  %vm56_vm0 = vcmask 261120   ;;  %v131_v22 = vld [vmem:[#allocation5] ss:$0 sm:$0xff] }
  0x39   :  { %v139_v1 = vunpack.c.l.bf16 %v138_v0  ;;  %v140_v2 = vunpack.c.h.bf16 %v138_v0  ;;  %v132_v24 = vld [vmem:[#allocation7] ss:$0 sm:$0xff]  ;;  %vm110_vm1 = vcmask 257024   ;;  %s250_s2 = smov [#allocation8]  }
  0x3a   :  { %s118_s23 = sshll.u32 %s250_s2, 4  ;;  %s119_s23 = int_to_ptr.vmem [resolvable:$true] %s118_s23 }
  0x3b   :  { %v57_v3 = vsel %vm56_vm0, %v139_v1, 0.0  ;;  %v60_v4 = vsel %vm56_vm0, %v140_v2, 0.0  ;;  %s217_s24 = scalar_lea.vmem %s119_s23, 128  ;;  %p222_p11 = scmp.lt.s32.totalorder %s119_s23, %s119_s23 }
  0x3c   :  { %58 = vadd.xlane.f32.xlu0 %v57_v3  ;;  %p218_p10 = scmp.ne.s32.totalorder %s119_s23, %s217_s24  ;;  %p223_p12 = scmp.lt.s32.totalorder %s217_s24, %s217_s24 }
  0x3e   :  { %p224_p13 = por %p223_p12, %p222_p11 }
  0x40   :  { %61 = vadd.xlane.f32.xlu0 %v60_v4  ;;  %p225_p0 = pnand %p224_p13, %p218_p10 }
  0xc9   :  { %v59_v5 = vpop.xlane.xlu0 %58 }
  0xca   :  { %v64_v6 = vmul.f32 0.03125, %v59_v5 }
  0xcc   :  { %v66_v7 = vsub.f32 %v139_v1, %v64_v6 }
  0xcd   :  { %v62_v8 = vpop.xlane.xlu0 %61 }
  0xce   :  { %v65_v9 = vmul.f32 0.03125, %v62_v8  ;;  %v68_v10 = vmul.f32 %v66_v7, %v66_v7 }
  0xd0   :  { %v67_v11 = vsub.f32 %v140_v2, %v65_v9  ;;  %v70_v12 = vsel %vm56_vm0, %v68_v10, 0.0 }
  0xd1   :  { %71 = vadd.xlane.f32.xlu1 %v70_v12 }
  0xd2   :  { %v69_v13 = vmul.f32 %v67_v11, %v67_v11 }
  0xd4   :  { %v73_v14 = vsel %vm56_vm0, %v69_v13, 0.0 }
  0xd5   :  { %74 = vadd.xlane.f32.xlu1 %v73_v14 }
 0x15e   :  { %v72_v15 = vpop.xlane.xlu1 %71 }
 0x15f   :  { %v76_v16 = vmul.f32 0.03125, %v72_v15 }
 0x161   :  { %v78_v17 = vadd.f32 1e-05, %v76_v16 }
 0x162   :  { %v75_v18 = vpop.xlane.xlu1 %74 }
 0x163   :  { %147 = vrsqrt.f32 %v78_v17  ;;  %v77_v19 = vmul.f32 0.03125, %v75_v18 }
 0x165   :  { %v79_v20 = vadd.f32 1e-05, %v77_v19 }
 0x167   :  { %149 = vrsqrt.f32 %v79_v20 }
 0x16d   :  { %v148_v21 = vpop.eup %147 }
 0x16e   :  { %v82_v23 = vmul.f32 %v148_v21, %v66_v7 }
 0x170   :  { %v91_v25 = vmul.f32 %v131_v22, %v82_v23 }
 0x171   :  { %v150_v26 = vpop.eup %149 }
 0x172   :  { %v83_v27 = vmul.f32 %v150_v26, %v67_v11  ;;  %v100_v28 = vadd.f32 %v132_v24, %v91_v25 }
 0x174   :  { %v92_v29 = vmul.f32 %v131_v22, %v83_v27  ;;  %v135_v30 = vpack.c.bf16 %v100_v28, %v100_v28 }
 0x176   :  { %v101_v31 = vadd.f32 %v132_v24, %v92_v29  ;;  %111 = vst.msk [vmem:[#allocation8] sm:$0xf] %vm110_vm1, %v135_v30 }
 0x178   :  { %v136_v32 = vpack.c.bf16 %v101_v31, %v101_v31 }
 0x17a   :  { %112 = vst.msk [vmem:[#allocation8 + $0x4] sm:$0xf] %vm110_vm1, %v136_v32 }
 0x17b   :  { %228 = shalt.err (!%p225_p0)
}
 0x17c   :  { %s229_s27 = scalar_lea.hbm %s339_s3, 128 }
 0x17d   :  { %p230_p1 = scmp.ne.s32.totalorder %s339_s3, %s229_s27  ;;  %p233_p2 = scmp.lt.u32.totalorder %s229_s27, %s339_s3 }
 0x17f   :  { %p235_p3 = pnand %p233_p2, %p230_p1 }
 0x181   :  { %238 = shalt.err (!%p235_p3)
}
 0x182   :  { %124 = dma.vmem_to_hbm [thread:$0]  %s119_s23, 128, %s339_s3, [#allocation4], %s247_s1, %s247_s1, %s248_s8  }
 0x183   :  { %243 = dma.done.wait [#allocation4], 128  }
 0x184   :  { %244 = vsyncadd [#allocation4], 4294967168 }
 0x185   :  { %128 = vsyncpa [#allocation3], 1 }
 0x186   :  { %129 = vsyncpa [#allocation6], 1 }
 0x187   :  { %130 = vsyncpa [#allocation4], 1 }

// kernel: decoder_forward.29
= control target key start
LH: loop header
LB: loop body
LE: loop exit
PB: predicated region body
PF: predicated region fallthrough
CT: control target
= control target key end

     0   :  { %9 = vsyncpa [#allocation4], 0  ;;  %s482_s0 = inlined_call_operand.hbm [shape: bf16[16,32], index: 0, kind: input, shape index: {}]   ;;  %s483_s1 = inlined_call_operand.hbm [shape: bf16[32,32], index: 1, kind: input, shape index: {}]   ;;  %s484_s2 = inlined_call_operand.hbm [shape: f32[1,32], index: 2, kind: input, shape index: {}]   ;;  %s485_s3 = inlined_call_operand.hbm [shape: bf16[16,32], index: 3, kind: input, shape index: {}]   ;;  %s486_s4 = inlined_call_operand.hbm [shape: bf16[16,32], index: 4, kind: output, shape index: {}]  }
   0x1   :  { %10 = vsyncpa [#allocation7], 0 }
   0x2   :  { %11 = vsyncpa [#allocation10], 0 }
   0x3   :  { %12 = vsyncpa [#allocation5], 0  ;;  %s357_s15 = smov [#allocation6]   ;;  %s358_s17 = smov [#allocation3]  }
   0x4   :  { %s30_s16 = sshll.u32 %s357_s15, 4  ;;  %s18_s18 = sshll.u32 %s358_s17, 4  ;;  %s31_s16 = int_to_ptr.vmem [resolvable:$true] %s30_s16  ;;  %s391_s18 = int_to_ptr.vmem [resolvable:$true] %s18_s18 }
   0x5   :  { %s239_s21 = scalar_lea.hbm %s483_s1, 256 }
   0x6   :  { %p240_p0 = scmp.ne.s32.totalorder %s483_s1, %s239_s21  ;;  %p243_p1 = scmp.lt.u32.totalorder %s239_s21, %s483_s1 }
   0x8   :  { %p245_p2 = pnand %p243_p1, %p240_p0 }
   0xa   :  { %248 = shalt.err (!%p245_p2)
}
   0xb   :  { %s249_s26 = scalar_lea.vmem %s31_s16, 256  ;;  %p254_p4 = scmp.lt.s32.totalorder %s31_s16, %s31_s16 }
   0xc   :  { %p250_p3 = scmp.ne.s32.totalorder %s31_s16, %s249_s26  ;;  %p255_p5 = scmp.lt.s32.totalorder %s249_s26, %s249_s26 }
   0xe   :  { %p256_p6 = por %p255_p5, %p254_p4 }
  0x10   :  { %p257_p7 = pnand %p256_p6, %p250_p3 }
  0x12   :  { %260 = shalt.err (!%p257_p7)
}
  0x13   :  { %s359_s27 = smov 64   ;;  %s360_s28 = smov 4  }
  0x14   :  { %36 = dma.hbm_to_vmem [thread:$0]  %s483_s1, 256, %s31_s16, [#allocation7], %s359_s27, %s359_s27, %s360_s28  }
  0x15   :  { %s261_s7 = scalar_lea.hbm %s482_s0, 128 }
  0x16   :  { %p262_p8 = scmp.ne.s32.totalorder %s482_s0, %s261_s7  ;;  %p265_p9 = scmp.lt.u32.totalorder %s261_s7, %s482_s0 }
  0x18   :  { %p267_p10 = pnand %p265_p9, %p262_p8 }
  0x1a   :  { %270 = shalt.err (!%p267_p10)
}
  0x1b   :  { %s271_s12 = scalar_lea.vmem %s391_s18, 128  ;;  %p276_p12 = scmp.lt.s32.totalorder %s391_s18, %s391_s18 }
  0x1c   :  { %p272_p11 = scmp.ne.s32.totalorder %s391_s18, %s271_s12  ;;  %p277_p13 = scmp.lt.s32.totalorder %s271_s12, %s271_s12 }
  0x1e   :  { %p278_p0 = por %p277_p13, %p276_p12 }
  0x20   :  { %p279_p1 = pnand %p278_p0, %p272_p11 }
  0x22   :  { %282 = shalt.err (!%p279_p1)
}
  0x23   :  { %24 = dma.hbm_to_vmem [thread:$0]  %s482_s0, 128, %s391_s18, [#allocation4], %s359_s27, %s359_s27, %s360_s28  }
  0x24   :  { %s361_s14 = smov [#allocation8]   ;;  %s362_s16 = smov [#allocation9]  }
  0x25   :  { %s43_s15 = sshll.u32 %s361_s14, 4  ;;  %s52_s17 = sshll.u32 %s362_s16, 4  ;;  %s44_s15 = int_to_ptr.vmem [resolvable:$true] %s43_s15  ;;  %s428_s17 = int_to_ptr.vmem [resolvable:$true] %s52_s17 }
  0x26   :  { %s283_s21 = scalar_lea.hbm %s484_s2, 16 }
  0x27   :  { %p284_p2 = scmp.ne.s32.totalorder %s484_s2, %s283_s21  ;;  %p287_p3 = scmp.lt.u32.totalorder %s283_s21, %s484_s2 }
  0x29   :  { %p289_p4 = pnand %p287_p3, %p284_p2 }
  0x2b   :  { %292 = shalt.err (!%p289_p4)
}
  0x2c   :  { %s293_s0 = scalar_lea.vmem %s44_s15, 16  ;;  %s297_s18 = scalar_lea.vmem %s44_s15, 32 }
  0x2d   :  { %p294_p5 = scmp.ne.s32.totalorder %s44_s15, %s293_s0  ;;  %p298_p6 = scmp.lt.s32.totalorder %s44_s15, %s44_s15 }
  0x2e   :  { %p299_p7 = scmp.lt.s32.totalorder %s297_s18, %s293_s0 }
  0x30   :  { %p300_p8 = por %p299_p7, %p298_p6 }
  0x32   :  { %p301_p9 = pnand %p300_p8, %p294_p5 }
  0x34   :  { %304 = shalt.err (!%p301_p9)
}
  0x35   :  { %46 = dma.hbm_to_vmem [thread:$0]  %s484_s2, 16, %s44_s15, [#allocation7]  }
  0x36   :  { %s305_s6 = scalar_lea.hbm %s485_s3, 128 }
  0x37   :  { %p306_p10 = scmp.ne.s32.totalorder %s485_s3, %s305_s6  ;;  %p309_p11 = scmp.lt.u32.totalorder %s305_s6, %s485_s3 }
  0x39   :  { %p311_p12 = pnand %p309_p11, %p306_p10 }
  0x3b   :  { %314 = shalt.err (!%p311_p12)
}
  0x3c   :  { %s315_s11 = scalar_lea.vmem %s428_s17, 128  ;;  %p320_p0 = scmp.lt.s32.totalorder %s428_s17, %s428_s17 }
  0x3d   :  { %p316_p13 = scmp.ne.s32.totalorder %s428_s17, %s315_s11  ;;  %p321_p1 = scmp.lt.s32.totalorder %s315_s11, %s315_s11 }
  0x3f   :  { %p322_p2 = por %p321_p1, %p320_p0 }
  0x41   :  { %p323_p3 = pnand %p322_p2, %p316_p13 }
  0x43   :  { %326 = shalt.err (!%p323_p3)
}
  0x44   :  { %58 = dma.hbm_to_vmem [thread:$0]  %s485_s3, 128, %s428_s17, [#allocation10], %s359_s27, %s359_s27, %s360_s28  }
  0x45   :  { %349 = dma.done.wait [#allocation4], 128  }
  0x46   :  { %350 = vsyncadd [#allocation4], 4294967168 }
  0x47   :  { %351 = dma.done.wait [#allocation7], 272  }
  0x48   :  { %352 = vsyncadd [#allocation7], 4294967024 }
  0x49   :  { %353 = dma.done.wait [#allocation10], 128  }
  0x4a   :  { %354 = vsyncadd [#allocation10], 4294967168  ;;  %vm76_vm0 = vcmask 261120   ;;  %v363_v0 = vmov 0.0   ;;  %vm364_vm1 = vmmov 0   ;;  %v236_v1 = vld [vmem:[#allocation6] sm:$0xff]  }
  0x4b   :  { %219 = vmatprep.subr.bf16.mxu0 %v363_v0  ;;  %223 = vmatprep.mubr.msk.bf16.mxu0 %vm364_vm1, %v363_v0  ;;  %77 = vst.msk [vmem:[#allocation2] sm:$0xff] %vm76_vm0, %v363_v0  ;;  %78 = vst.msk [vmem:[#allocation2 + $0x8] sm:$0xff] %vm76_vm0, %v363_v0  ;;  %v237_v2 = vld [vmem:[#allocation6 + $0x8] sm:$0xff]   ;;  %v238_v3 = vld [vmem:[#allocation3] sm:$0xff]   ;;  %vm181_vm2 = vcmask 257024   ;;  %s365_s3 = smov [#allocation11]  }
  0x4c   :  { %220 = vmatpush3.bf16.msra.mxu0 %v236_v1  ;;  %v213_v12 = vld [vmem:[#allocation9] sm:$0xff]   ;;  %v207_v13 = vld [vmem:[#allocation8] ss:$0 sm:$0xff]  ;;  %s189_s1 = sshll.u32 %s365_s3, 4  ;;  %s190_s1 = int_to_ptr.vmem [resolvable:$true] %s189_s1 }
  0x4d   :  { %221 = vmatprep.subr.bf16.mxu0 %v363_v0  ;;  %v214_v14 = vunpack.c.l.bf16 %v213_v12  ;;  %v215_v17 = vunpack.c.h.bf16 %v213_v12  ;;  %s327_s13 = scalar_lea.vmem %s190_s1, 128  ;;  %p332_p5 = scmp.lt.s32.totalorder %s190_s1, %s190_s1 }
  0x4e   :  { %p328_p4 = scmp.ne.s32.totalorder %s190_s1, %s327_s13  ;;  %p333_p6 = scmp.lt.s32.totalorder %s327_s13, %s327_s13 }
  0x50   :  { %222 = vmatpush3.bf16.msra.mxu0 %v237_v2  ;;  %p334_p7 = por %p333_p6, %p332_p5 }
  0x52   :  { %v79_v4 = vld [vmem:[#allocation2] sm:$0xff]  ;;  %v80_v6 = vld [vmem:[#allocation2 + $0x8] sm:$0xff]  ;;  %p335_p8 = pnand %p334_p7, %p328_p4 }
  0x53   :  { %224 = vmatmul.mubr.msk.bf16.vlgmr.msra.gmra.mrb[0].mxu0 %vm76_vm0, %v238_v3 }
 0x126   :  { %v142_v5 = vpop.f32.mrb[0].mxu0 }
 0x127   :  { %v149_v7 = vadd.f32 %v142_v5, %v79_v4  ;;  %v225_v8 = vpop.f32.mrb[1].mxu0 }
 0x128   :  { %v145_v9 = vpop.f32.mrb[2].mxu0 }
 0x129   :  { %151 = vst.msk [vmem:[#allocation2] sm:$0xff] %vm76_vm0, %v149_v7  ;;  %v150_v10 = vadd.f32 %v145_v9, %v80_v6  ;;  %v226_v11 = vpop.f32.mrb[3].mxu0 }
 0x12b   :  { %152 = vst.msk [vmem:[#allocation2 + $0x8] sm:$0xff] %vm76_vm0, %v150_v10 }
 0x130   :  { %v156_v15 = vld [vmem:[#allocation2] sm:$0xff] }
 0x131   :  { %v165_v16 = vadd.f32 %v207_v13, %v156_v15 }
 0x132   :  { %v157_v18 = vld [vmem:[#allocation2 + $0x8] sm:$0xff] }
 0x133   :  { %v166_v19 = vadd.f32 %v207_v13, %v157_v18  ;;  %v171_v20 = vadd.f32 %v214_v14, %v165_v16 }
 0x135   :  { %v172_v21 = vadd.f32 %v215_v17, %v166_v19  ;;  %v210_v22 = vpack.c.bf16 %v171_v20, %v171_v20 }
 0x137   :  { %v211_v23 = vpack.c.bf16 %v172_v21, %v172_v21  ;;  %182 = vst.msk [vmem:[#allocation11] sm:$0xf] %vm181_vm2, %v210_v22 }
 0x139   :  { %183 = vst.msk [vmem:[#allocation11 + $0x4] sm:$0xf] %vm181_vm2, %v211_v23 }
 0x13a   :  { %338 = shalt.err (!%p335_p8)
}
 0x13b   :  { %s339_s16 = scalar_lea.hbm %s486_s4, 128 }
 0x13c   :  { %p340_p9 = scmp.ne.s32.totalorder %s486_s4, %s339_s16  ;;  %p343_p10 = scmp.lt.u32.totalorder %s339_s16, %s486_s4 }
 0x13e   :  { %p345_p11 = pnand %p343_p10, %p340_p9 }
 0x140   :  { %348 = shalt.err (!%p345_p11)
}
 0x141   :  { %195 = dma.vmem_to_hbm [thread:$0]  %s190_s1, 128, %s486_s4, [#allocation5], %s359_s27, %s359_s27, %s360_s28  }
 0x142   :  { %355 = dma.done.wait [#allocation5], 128  }
 0x143   :  { %356 = vsyncadd [#allocation5], 4294967168 }
 0x144   :  { %199 = vsyncpa [#allocation4], 1 }
 0x145   :  { %200 = vsyncpa [#allocation7], 1 }
 0x146   :  { %201 = vsyncpa [#allocation10], 1 }
 0x147   :  { %202 = vsyncpa [#allocation5], 1 }

// kernel: decoder_forward.27
= control target key start
LH: loop header
LB: loop body
LE: loop exit
PB: predicated region body
PF: predicated region fallthrough
CT: control target
= control target key end

     0   :  { %8 = vsyncpa [#allocation4], 0  ;;  %s401_s0 = inlined_call_operand.hbm [shape: bf16[16,32], index: 0, kind: input, shape index: {}]   ;;  %s402_s1 = inlined_call_operand.hbm [shape: bf16[32,96], index: 1, kind: input, shape index: {}]   ;;  %s403_s2 = inlined_call_operand.hbm [shape: f32[1,96], index: 2, kind: input, shape index: {}]   ;;  %s404_s3 = inlined_call_operand.hbm [shape: bf16[16,96], index: 3, kind: output, shape index: {}]  }
   0x1   :  { %9 = vsyncpa [#allocation7], 0 }
   0x2   :  { %10 = vsyncpa [#allocation5], 0  ;;  %s305_s12 = smov [#allocation6]   ;;  %s306_s14 = smov [#allocation3]  }
   0x3   :  { %s28_s13 = sshll.u32 %s305_s12, 4  ;;  %s16_s15 = sshll.u32 %s306_s14, 4  ;;  %s29_s13 = int_to_ptr.vmem [resolvable:$true] %s28_s13  ;;  %s333_s15 = int_to_ptr.vmem [resolvable:$true] %s16_s15 }
   0x4   :  { %s211_s18 = scalar_lea.hbm %s402_s1, 256 }
   0x5   :  { %p212_p0 = scmp.ne.s32.totalorder %s402_s1, %s211_s18  ;;  %p215_p1 = scmp.lt.u32.totalorder %s211_s18, %s402_s1 }
   0x7   :  { %p217_p2 = pnand %p215_p1, %p212_p0 }
   0x9   :  { %220 = shalt.err (!%p217_p2)
}
   0xa   :  { %s221_s23 = scalar_lea.vmem %s29_s13, 256  ;;  %p226_p4 = scmp.lt.s32.totalorder %s29_s13, %s29_s13 }
   0xb   :  { %p222_p3 = scmp.ne.s32.totalorder %s29_s13, %s221_s23  ;;  %p227_p5 = scmp.lt.s32.totalorder %s221_s23, %s221_s23 }
   0xd   :  { %p228_p6 = por %p227_p5, %p226_p4 }
   0xf   :  { %p229_p7 = pnand %p228_p6, %p222_p3 }
  0x11   :  { %232 = shalt.err (!%p229_p7)
}
  0x12   :  { %s307_s24 = smov 64   ;;  %s308_s25 = smov 4  }
  0x13   :  { %34 = dma.hbm_to_vmem [thread:$0]  %s402_s1, 256, %s29_s13, [#allocation7], %s307_s24, %s307_s24, %s308_s25  }
  0x14   :  { %s233_s30 = scalar_lea.hbm %s401_s0, 128 }
  0x15   :  { %p234_p8 = scmp.ne.s32.totalorder %s401_s0, %s233_s30  ;;  %p237_p9 = scmp.lt.u32.totalorder %s233_s30, %s401_s0 }
  0x17   :  { %p239_p10 = pnand %p237_p9, %p234_p8 }
  0x19   :  { %242 = shalt.err (!%p239_p10)
}
  0x1a   :  { %s243_s8 = scalar_lea.vmem %s333_s15, 128  ;;  %p248_p12 = scmp.lt.s32.totalorder %s333_s15, %s333_s15 }
  0x1b   :  { %p244_p11 = scmp.ne.s32.totalorder %s333_s15, %s243_s8  ;;  %p249_p13 = scmp.lt.s32.totalorder %s243_s8, %s243_s8 }
  0x1d   :  { %p250_p0 = por %p249_p13, %p248_p12 }
  0x1f   :  { %p251_p1 = pnand %p250_p0, %p244_p11 }
  0x21   :  { %254 = shalt.err (!%p251_p1)
}
  0x22   :  { %22 = dma.hbm_to_vmem [thread:$0]  %s401_s0, 128, %s333_s15, [#allocation4], %s307_s24, %s307_s24, %s308_s25  }
  0x23   :  { %s309_s10 = smov [#allocation8]   ;;  %s255_s14 = scalar_lea.hbm %s403_s2, 16 }
  0x24   :  { %s41_s11 = sshll.u32 %s309_s10, 4  ;;  %p256_p2 = scmp.ne.s32.totalorder %s403_s2, %s255_s14  ;;  %s42_s11 = int_to_ptr.vmem [resolvable:$true] %s41_s11 }
  0x25   :  { %p259_p3 = scmp.lt.u32.totalorder %s255_s14, %s403_s2 }
  0x27   :  { %p261_p4 = pnand %p259_p3, %p256_p2 }
  0x29   :  { %264 = shalt.err (!%p261_p4)
}
  0x2a   :  { %s265_s20 = scalar_lea.vmem %s42_s11, 16  ;;  %s269_s0 = scalar_lea.vmem %s42_s11, 32 }
  0x2b   :  { %p266_p5 = scmp.ne.s32.totalorder %s42_s11, %s265_s20  ;;  %p270_p6 = scmp.lt.s32.totalorder %s42_s11, %s42_s11 }
  0x2c   :  { %p271_p7 = scmp.lt.s32.totalorder %s269_s0, %s265_s20 }
  0x2e   :  { %p272_p8 = por %p271_p7, %p270_p6 }
  0x30   :  { %p273_p9 = pnand %p272_p8, %p266_p5 }
  0x32   :  { %276 = shalt.err (!%p273_p9)
}
  0x33   :  { %44 = dma.hbm_to_vmem [thread:$0]  %s403_s2, 16, %s42_s11, [#allocation7]  }
  0x34   :  { %299 = dma.done.wait [#allocation4], 128  }
  0x35   :  { %300 = vsyncadd [#allocation4], 4294967168 }
  0x36   :  { %301 = dma.done.wait [#allocation7], 272  }
  0x37   :  { %302 = vsyncadd [#allocation7], 4294967024  ;;  %vm59_vm0 = vcmask 785408   ;;  %v310_v0 = vmov 0.0   ;;  %vm311_vm1 = vmmov 0   ;;  %v208_v1 = vld [vmem:[#allocation6] sm:$0xff]  }
  0x38   :  { %60 = vst.msk [vmem:[#allocation2] sm:$0xff] %vm59_vm0, %v310_v0  ;;  %61 = vst.msk [vmem:[#allocation2 + $0x8] sm:$0xff] %vm59_vm0, %v310_v0  ;;  %192 = vmatprep.subr.bf16.mxu0 %v310_v0  ;;  %196 = vmatprep.mubr.msk.bf16.mxu0 %vm311_vm1, %v310_v0  ;;  %v209_v2 = vld [vmem:[#allocation6 + $0x8] sm:$0xff]   ;;  %v210_v3 = vld [vmem:[#allocation3] sm:$0xff]   ;;  %vm87_vm2 = vcmask 261120   ;;  %vm159_vm3 = vcmask 781312  }
  0x39   :  { %193 = vmatpush3.bf16.msra.mxu0 %v208_v1  ;;  %v184_v12 = vld [vmem:[#allocation8] ss:$0 sm:$0xff]  ;;  %s312_s2 = smov [#allocation9]  }
  0x3a   :  { %194 = vmatprep.subr.bf16.mxu0 %v310_v0  ;;  %s167_s22 = sshll.u32 %s312_s2, 4  ;;  %s168_s22 = int_to_ptr.vmem [resolvable:$true] %s167_s22 }
  0x3b   :  { %s277_s23 = scalar_lea.vmem %s168_s22, 128  ;;  %p282_p11 = scmp.lt.s32.totalorder %s168_s22, %s168_s22 }
  0x3c   :  { %p278_p10 = scmp.ne.s32.totalorder %s168_s22, %s277_s23  ;;  %p283_p12 = scmp.lt.s32.totalorder %s277_s23, %s277_s23 }
  0x3d   :  { %195 = vmatpush3.bf16.msra.mxu0 %v209_v2 }
  0x3e   :  { %p284_p13 = por %p283_p12, %p282_p11 }
  0x3f   :  { %v62_v4 = vld [vmem:[#allocation2] sm:$0xff]  ;;  %v63_v6 = vld [vmem:[#allocation2 + $0x8] sm:$0xff] }
  0x40   :  { %197 = vmatmul.mubr.msk.bf16.vlgmr.msra.gmra.mrb[0].mxu0 %vm87_vm2, %v210_v3  ;;  %p285_p0 = pnand %p284_p13, %p278_p10 }
 0x113   :  { %v125_v5 = vpop.f32.mrb[0].mxu0 }
 0x114   :  { %v132_v7 = vadd.f32 %v125_v5, %v62_v4  ;;  %v198_v8 = vpop.f32.mrb[1].mxu0 }
 0x115   :  { %v128_v9 = vpop.f32.mrb[2].mxu0 }
 0x116   :  { %135 = vst.msk [vmem:[#allocation2] sm:$0xff] %vm59_vm0, %v132_v7  ;;  %v133_v10 = vadd.f32 %v128_v9, %v63_v6  ;;  %v199_v11 = vpop.f32.mrb[3].mxu0 }
 0x118   :  { %136 = vst.msk [vmem:[#allocation2 + $0x8] sm:$0xff] %vm59_vm0, %v133_v10 }
 0x11d   :  { %v140_v13 = vld [vmem:[#allocation2] sm:$0xff] }
 0x11e   :  { %v149_v14 = vadd.f32 %v184_v12, %v140_v13 }
 0x11f   :  { %v141_v15 = vld [vmem:[#allocation2 + $0x8] sm:$0xff] }
 0x120   :  { %v150_v16 = vadd.f32 %v184_v12, %v141_v15  ;;  %v187_v17 = vpack.c.bf16 %v149_v14, %v149_v14 }
 0x122   :  { %v188_v18 = vpack.c.bf16 %v150_v16, %v150_v16  ;;  %160 = vst.msk [vmem:[#allocation9] sm:$0xf] %vm159_vm3, %v187_v17 }
 0x124   :  { %161 = vst.msk [vmem:[#allocation9 + $0x4] sm:$0xf] %vm159_vm3, %v188_v18 }
 0x125   :  { %288 = shalt.err (!%p285_p0)
}
 0x126   :  { %s289_s28 = scalar_lea.hbm %s404_s3, 128 }
 0x127   :  { %p290_p1 = scmp.ne.s32.totalorder %s404_s3, %s289_s28  ;;  %p293_p2 = scmp.lt.u32.totalorder %s289_s28, %s404_s3 }
 0x129   :  { %p295_p3 = pnand %p293_p2, %p290_p1 }
 0x12b   :  { %298 = shalt.err (!%p295_p3)
}
 0x12c   :  { %173 = dma.vmem_to_hbm [thread:$0]  %s168_s22, 128, %s404_s3, [#allocation5], %s307_s24, %s307_s24, %s308_s25  }
 0x12d   :  { %303 = dma.done.wait [#allocation5], 128  }
 0x12e   :  { %304 = vsyncadd [#allocation5], 4294967168 }
 0x12f   :  { %177 = vsyncpa [#allocation4], 1 }
 0x130   :  { %178 = vsyncpa [#allocation7], 1 }
 0x131   :  { %179 = vsyncpa [#allocation5], 1 }

// kernel: decoder_forward.28
= control target key start
LH: loop header
LB: loop body
LE: loop exit
PB: predicated region body
PF: predicated region fallthrough
CT: control target
= control target key end

     0   :  { %s1977_s0 = inlined_call_operand.hbm [shape: bf16[2,8,96], index: 0, kind: input, shape index: {}, may-alias: {0,1,2}]   ;;  %s1978_s1 = inlined_call_operand.hbm [shape: bf16[2,8,96], index: 1, kind: input, shape index: {}, may-alias: {0,1,2}]   ;;  %s1979_s2 = inlined_call_operand.hbm [shape: bf16[2,8,96], index: 2, kind: input, shape index: {}, may-alias: {0,1,2}]   ;;  %s1980_s3 = inlined_call_operand.hbm [shape: bf16[2,8,32], index: 3, kind: output, shape index: {0}]   ;;  %s1981_s4 = inlined_call_operand.hbm [shape: bf16[2,4,8,8], index: 4, kind: output, shape index: {1}]  }
   0x1   :  { %1990 = sst [smem:[#allocation19_spill]] %s1978_s1 }
   0x2   :  { %10 = vsyncpa [#allocation3], 0 }
   0x3   :  { %12 = vsyncpa [#allocation3 + $0x1], 0 }
   0x4   :  { %13 = vsyncpa [#allocation6], 0 }
   0x5   :  { %15 = vsyncpa [#allocation6 + $0x1], 0 }
   0x6   :  { %16 = vsyncpa [#allocation4], 0 }
   0x7   :  { %18 = vsyncpa [#allocation4 + $0x1], 0 }
   0x8   :  { %19 = vsyncpa [#allocation10], 0 }
   0x9   :  { %21 = vsyncpa [#allocation10 + $0x1], 0  ;;  %s1574_s15 = smov 0   ;;  %s1576_s16 = smov 0  }
   0xa   :  { %s1578_s17 = smov 0   ;;  %s1580_s18 = smov 0  }
   0xb   :  { %s1582_s19 = smov 0   ;;  %s1584_s20 = smov 0  }
   0xc LB: > { %1991 = sst [smem:[#allocation15_spill]] %s1521_s19  ;;  %s1605_s21 = sadd.s32 4294967295, %s1525_s20   ;;  %s1525_s20 = sphi %s1584_s20, %s27_s20   ;;  %s1521_s19 = sphi %s1582_s19, %s2015_s19   ;;  %s1517_s18 = sphi %s1580_s18, %s2014_s18   ;;  %s1513_s17 = sphi %s1578_s17, %s2018_s17   ;;  %s1509_s16 = sphi %s1576_s16, %s2017_s16   ;;  %s1505_s15 = sphi %s1574_s15, %s2016_s15  }
   0xd   : > { %1992 = sst [smem:[#allocation16_spill]] %s1525_s20  ;;  %s1081_s22 = sadd.s32 4294967294, %s1525_s20  }
   0xe   : > { %s46_s23 = sadd.s32 1, %s1521_s19  ;;  %s55_s24 = sadd.s32 1, %s1513_s17 }
   0xf   : > { %p48_p0 = scmp.ge.s32.totalorder %s46_s23, 2  ;;  %p62_p1 = scmp.ne.s32.totalorder %s1513_s17, %s1509_s16 }
  0x10   : > { %p63_p2 = scmp.eq.s32.totalorder %s1525_s20, 0  ;;  %p68_p3 = scmp.ne.s32.totalorder %s1509_s16, %s1505_s15 }
  0x11   : > { %s2020_s23 = smov (%p48_p0, %s46_s23), 0  ;;  %p69_p5 = scmp.eq.s32.totalorder %s1605_s21, 0 }
  0x12   : > { %1993 = sst [smem:[#allocation17_spill]] %s2020_s23  ;;  %p1617_p4 = por %p63_p2, %p62_p1 }
  0x13   : > { %s50_s26 = ssub.s32 %s1521_s19, %s2020_s23  ;;  %p148_p6 = scmp.eq.s32.totalorder %s1605_s21, 1 }
  0x14   : > { %p53_p7 = scmp.eq.s32.totalorder %s50_s26, 0  ;;  %p1625_p8 = por %p69_p5, %p68_p3 }
  0x15   : > { %p1629_p9 = por %p148_p6, %p62_p1  ;;  %p154_p10 = scmp.eq.s32.totalorder %s1081_s22, 1 }
  0x16   : > { %s1995_s27 = scalar_select %p1625_p8, 1, 0 }
  0x17   : > { %s1996_s28 = scalar_select %p1629_p9, 1, 0 }
  0x18   : > { %s1634_s29 = scalar_select %p53_p7, %s1513_s17, %s55_s24  }
  0x19   : > { %p1636_p11 = por %p154_p10, %p68_p3  ;;  %p1223_p13 = scmp.lt.s32.totalorder %s1525_s20, 2 }
  0x1a   : > { %1997 = sst [smem:[#allocation18_spill]] %s1634_s29  ;;  %s1982_s5 = sand.u32 1, %s1513_s17  }
  0x1b   : > { %s1998_s30 = scalar_select %p1636_p11, 1, 0 }
  0x1c   : > { %s1645_s6 = sshll.u32 %s1982_s5, 2  ;;  %s1648_s7 = sshll.u32 %s1521_s19, 6 }
  0x1d   : > { %p1652_p0 = pnand %p1223_p13, %p1617_p4  ;;  %s223_s9 = sand.u32 1, %s1525_s20  }
  0x1e   : > { %s2000_s1 = sld [smem:[#allocation19_spill]]  ;;  %s227_s13 = scalar_lea.vmem [#allocation5], %s1645_s6 }
  0x1f   : > { %s1999_s8 = scalar_select %p1652_p0, 1, 0 }
  0x20   : > { %s234_s14 = sshll.u32 %s227_s13, 4  ;;  %s1668_s22 = scalar_lea.sflag [#allocation6], %s223_s9  ;;  %s1665_s14 = int_to_ptr.vmem [resolvable:$true] %s234_s14 }
  0x21   : > { %p1674_p4 = pneg %p1652_p0 }
  0x24   : > { %s1661_s12 = scalar_lea.hbm %s2000_s1, %s1648_s7  ;;  %s1322_s11 = scalar_lea.hbm %s2000_s1, 128 }
  0x25   : > { %s1317_s24 = scalar_lea.hbm %s1661_s12, 64  ;;  %p1323_p7 = scmp.lt.u32.totalorder %s1661_s12, %s2000_s1 }
  0x26   : > { %p1318_p3 = scmp.ne.s32.totalorder %s1661_s12, %s1317_s24  ;;  %p1324_p10 = scmp.lt.u32.totalorder %s1322_s11, %s1317_s24 }
  0x27   : > { %p1326_p12 = scmp.lt.u32.totalorder %s1317_s24, %s1661_s12 }
  0x28   : > { %p1320_p5 = pnand %p1674_p4, %p1318_p3  ;;  %p1325_p13 = por %p1324_p10, %p1323_p7 }
  0x2a   : > { %p1321_p6 = pneg %p1320_p5  ;;  %p1327_p1 = por %p1326_p12, %p1325_p13 }
  0x2c   : > { %p1328_p2 = pnand %p1327_p1, %p1321_p6 }
  0x2e   : > { %1331 = shalt.err (!%p1328_p2)
}
  0x2f   : > { %s1332_s9 = scalar_lea.vmem %s1665_s14, 64  ;;  %s1527_s26 = smov [#allocation5]  }
  0x30   : > { %p1333_p3 = scmp.ne.s32.totalorder %s1665_s14, %s1332_s9  ;;  %s1337_s10 = sshll.u32 %s1527_s26, 4  ;;  %s1338_s10 = int_to_ptr.vmem [resolvable:$false] %s1337_s10 }
  0x31   : > { %s1339_s5 = scalar_lea.vmem %s1338_s10, 128  ;;  %p1340_p9 = scmp.lt.s32.totalorder %s1665_s14, %s1338_s10 }
  0x32   : > { %p1335_p5 = pnand %p1333_p3, %p1674_p4  ;;  %p1341_p8 = scmp.lt.s32.totalorder %s1339_s5, %s1332_s9 }
  0x34   : > { %p1336_p11 = pneg %p1335_p5  ;;  %p1342_p7 = por %p1341_p8, %p1340_p9 }
  0x36   : > { %p1343_p10 = pnand %p1342_p7, %p1336_p11 }
  0x38   : > { %1346 = shalt.err (!%p1343_p10)
}
  0x39   : > { %1212 = dma.hbm_to_vmem [thread:$0]  (!%p1652_p0), %s1661_s12, 64, %s1665_s14, %s1668_s22  }
  0x3a   : > { %p2002_p12 = scmp.lt.s32.totalorder %s1525_s20, 3  ;;  %p2003_p1 = scmp.ge.s32.totalorder %s1525_s20, 1 }
  0x3b   : > { %s1710_s9 = scalar_lea.hbm %s1977_s0, %s1648_s7  ;;  %s208_s26 = scalar_lea.vmem [#allocation2], %s1645_s6 }
  0x3c   : > { %p1702_p2 = pnand %p2003_p1, %p2002_p12  ;;  %s216_s10 = sshll.u32 %s208_s26, 4  ;;  %s1713_s10 = int_to_ptr.vmem [resolvable:$true] %s216_s10 }
  0x3d   : > { %s1719_s5 = scalar_lea.hbm %s1979_s2, %s1648_s7  ;;  %s2005_s1 = sand.u32 1, %s1513_s17  }
  0x3e   : > { %s2004_s24 = scalar_select %p1702_p2, 1, 0 }
  0x3f   : > { %s205_s23 = scalar_lea.sflag [#allocation3], %s2005_s1  ;;  %s1347_s19 = scalar_lea.hbm %s1710_s9, 64 }
  0x40   : > { %p1348_p8 = scmp.ne.s32.totalorder %s1710_s9, %s1347_s19  ;;  %s1352_s29 = scalar_lea.hbm %s1977_s0, 128 }
  0x41   : > { %p1353_p6 = scmp.lt.u32.totalorder %s1710_s9, %s1977_s0  ;;  %p1354_p13 = scmp.lt.u32.totalorder %s1352_s29, %s1347_s19 }
  0x42   : > { %p1350_p9 = pnand %p1348_p8, %p1674_p4  ;;  %p1356_p5 = scmp.lt.u32.totalorder %s1347_s19, %s1710_s9 }
  0x43   : > { %p1355_p3 = por %p1354_p13, %p1353_p6 }
  0x44   : > { %p1351_p11 = pneg %p1350_p9 }
  0x45   : > { %p1357_p7 = por %p1356_p5, %p1355_p3 }
  0x47   : > { %p1358_p10 = pnand %p1357_p7, %p1351_p11 }
  0x49   : > { %1361 = shalt.err (!%p1358_p10)
}
  0x4a   : > { %s1362_s1 = scalar_lea.vmem %s1713_s10, 64  ;;  %s1528_s7 = smov [#allocation2]  }
  0x4b   : > { %p1363_p12 = scmp.ne.s32.totalorder %s1713_s10, %s1362_s1  ;;  %s1367_s12 = sshll.u32 %s1528_s7, 4  ;;  %s1368_s12 = int_to_ptr.vmem [resolvable:$false] %s1367_s12 }
  0x4c   : > { %s1369_s20 = scalar_lea.vmem %s1368_s12, 128  ;;  %p1370_p9 = scmp.lt.s32.totalorder %s1713_s10, %s1368_s12 }
  0x4d   : > { %p1365_p1 = pnand %p1363_p12, %p1674_p4  ;;  %p1371_p2 = scmp.lt.s32.totalorder %s1369_s20, %s1362_s1 }
  0x4f   : > { %p1366_p8 = pneg %p1365_p1  ;;  %p1372_p6 = por %p1371_p2, %p1370_p9 }
  0x51   : > { %p1373_p13 = pnand %p1372_p6, %p1366_p8 }
  0x53   : > { %1376 = shalt.err (!%p1373_p13)
}
  0x54   : > { %1209 = dma.hbm_to_vmem [thread:$0]  (!%p1652_p0), %s1710_s9, 64, %s1713_s10, %s205_s23  }
  0x55   : > { %s245_s19 = scalar_lea.vmem [#allocation7], %s1645_s6  ;;  %s1377_s14 = scalar_lea.hbm %s1719_s5, 64 }
  0x56   : > { %s252_s29 = sshll.u32 %s245_s19, 4  ;;  %p1378_p11 = scmp.ne.s32.totalorder %s1719_s5, %s1377_s14  ;;  %s253_s29 = int_to_ptr.vmem [resolvable:$true] %s252_s29 }
  0x57   : > { %s1382_s26 = scalar_lea.hbm %s1979_s2, 128  ;;  %p1383_p5 = scmp.lt.u32.totalorder %s1719_s5, %s1979_s2 }
  0x58   : > { %p1380_p2 = pnand %p1378_p11, %p1674_p4  ;;  %p1384_p7 = scmp.lt.u32.totalorder %s1382_s26, %s1377_s14 }
  0x59   : > { %p1386_p12 = scmp.lt.u32.totalorder %s1377_s14, %s1719_s5 }
  0x5a   : > { %p1381_p3 = pneg %p1380_p2  ;;  %p1385_p10 = por %p1384_p7, %p1383_p5 }
  0x5c   : > { %p1387_p1 = por %p1386_p12, %p1385_p10 }
  0x5e   : > { %p1388_p8 = pnand %p1387_p1, %p1381_p3 }
  0x60   : > { %1391 = shalt.err (!%p1388_p8)
}
  0x61   : > { %s1392_s23 = scalar_lea.vmem %s253_s29, 64  ;;  %s1529_s6 = smov [#allocation7]  }
  0x62   : > { %p1393_p9 = scmp.ne.s32.totalorder %s253_s29, %s1392_s23  ;;  %s1397_s9 = sshll.u32 %s1529_s6, 4  ;;  %s1398_s9 = int_to_ptr.vmem [resolvable:$false] %s1397_s9 }
  0x63   : > { %s1399_s10 = scalar_lea.vmem %s1398_s9, 128  ;;  %p1400_p11 = scmp.lt.s32.totalorder %s253_s29, %s1398_s9 }
  0x64   : > { %p1395_p6 = pnand %p1393_p9, %p1674_p4  ;;  %p1401_p2 = scmp.lt.s32.totalorder %s1399_s10, %s1392_s23 }
  0x66   : > { %p1396_p13 = pneg %p1395_p6  ;;  %p1402_p0 = por %p1401_p2, %p1400_p11 }
  0x68   : > { %p1403_p5 = pnand %p1402_p0, %p1396_p13 }
  0x6a   : > { %1406 = shalt.err (!%p1403_p5)
}
  0x6b   : > { %p2006_p7 = scmp.ne.s32.totalorder %s1999_s8, 0  ;;  %p2007_p3 = scmp.ne.s32.totalorder %s2004_s24, 0 }
  0x6c   : > { %s1766_s25 = sand.u32 (!%p2007_p3), 1, %s1509_s16   ;;  %p2008_p0 = scmp.ne.s32.totalorder (!%p2007_p3), %s1995_s27, 0 }
  0x6d   : > { %1215 = dma.hbm_to_vmem [thread:$0]  (!%p2006_p7), %s1719_s5, 64, %s253_s29, %s1668_s22  }
  0x6e   : > { %261 = sbr.rel (%p2007_p3) target bundleno = 1739 (0x6cb), region = 32  ;;  %s1769_s12 = sshll.u32 (!%p2007_p3), %s1766_s25, 2 }
  0x6f   : > { %s264_s20 = scalar_lea.sflag (!%p2007_p3), [#allocation3], %s1766_s25  ;;  %s1773_s19 = scalar_lea.vmem (!%p2007_p3), [#allocation2], %s1769_s12 }
  0x75   : > { %1488 = dma.done.wait (%p2008_p0), %s264_s20, 64  }
  0x76   : > { %1490 = vsyncadd (%p2008_p0), %s264_s20, 4294967232  ;;  %s272_s8 = sand.u32 1, %s1605_s21   ;;  %s1781_s24 = scalar_lea.vmem [#allocation5], %s1769_s12 }
  0x77   : > { %s273_s22 = scalar_lea.sflag [#allocation6], %s272_s8 }
  0x78   : > { %1492 = dma.done.wait (%p2008_p0), %s273_s22, 128  }
  0x79   : > { %1494 = vsyncadd (%p2008_p0), %s273_s22, 4294967168  ;;  %v1530_v0 = vmov 0.0   ;;  %vm1531_vm0 = vmmov 0   ;;  %v1290_v1 = vld [vmem:[%s1781_s24] ss:$0 sps:$4 sm:$0xff]   ;;  %s1532_s21 = smov 96   ;;  %v328_v7 = vlaneseq }
  0x7a   : > { %1148 = vmatprep.subr.bf16.mxu0 %v1530_v0  ;;  %1150 = vmatprep.mubr.msk.bf16.mxu0 %vm1531_vm0, %v1530_v0  ;;  %vm343_vm1 = vcmask 64512   ;;  %v335_v4 = vld [vmem:[%s1773_s19] sm:$0xf]  ;;  %s1801_s27 = scalar_lea.vmem [#allocation7], %s1769_s12  ;;  %s1533_s5 = smov 64   ;;  %vm417_vm3 = vcmask 1043456  }
  0x7b   : > { %1154 = vmatprep.subr.bf16.mxu1 %v1530_v0  ;;  %1156 = vmatprep.mubr.msk.bf16.mxu1 %vm1531_vm0, %v1530_v0  ;;  %v1291_v5 = vld [vmem:[%s1801_s27] ss:$0 sps:$4 sm:$0xff]   ;;  %v1292_v6 = vld [vmem:[%s1781_s24] ss:$0 sps:$4 sm:$0xff]   ;;  %s1534_s29 = smov 88   ;;  %v1806_v8 = vshrl.u32 %v328_v7, 7 }
  0x7c   : > { %341 = vrot.lane.b32.xlu0 %v1290_v1, %s1532_s21  ;;  %412 = vrot.lane.b32.xlu1 %v1291_v5, %s1533_s5  ;;  %v1808_v9 = vand.u32 127, %v328_v7  ;;  %v1295_v17 = vld [vmem:[%s1781_s24] ss:$0 sps:$4 sm:$0xff]   ;;  %s1535_s14 = smov 72   ;;  %v1293_v27 = vld [vmem:[%s1773_s19] ss:$0 sps:$4 sm:$0xff]  }
  0x7d   : > { %s1536_s11 = smov 120   ;;  %v1294_v28 = vld [vmem:[%s1781_s24] ss:$0 sps:$4 sm:$0xff]   ;;  %s1537_s13 = smov 80   ;;  %v1296_v29 = vld [vmem:[%s1773_s19] ss:$0 sps:$4 sm:$0xff]  }
  0x7e   : > { %vm334_vm2 = vcmp.ge.s32.totalorder %v1806_v8, %v1808_v9  ;;  %s1538_s26 = smov 112   ;;  %v1297_v30 = vld [vmem:[%s1773_s19] ss:$0 sps:$4 sm:$0xff]   ;;  %s1539_s1 = smov 104   ;;  %vm407_vm4 = vcmask 60416  }
  0x7f   : > { %s1095_s7 = sshll.u32 %s1766_s25, 4  ;;  %s1845_s6 = scalar_lea.vmem [#allocation8], %s1769_s12 }
  0x80   : > { %474 = vrot.lane.b32.xlu1 %v1292_v6, %s1534_s29  ;;  %s1827_s23 = scalar_lea.vmem [#allocation9], %s1095_s7  ;;  %s1540_s9 = smov 56  }
  0x81   : > { %s1541_s10 = smov 48   ;;  %s1542_s12 = smov 40  }
  0x82   : > { %s1543_s20 = smov 8   ;;  %s1131_s19 = sshll.u32 %s1517_s18, 8 }
  0x83   : > { %s914_s8 = sshll.u32 %s1827_s23, 4  ;;  %s1890_s21 = scalar_lea.hbm %s1981_s4, %s1131_s19  ;;  %s1892_s8 = int_to_ptr.vmem [resolvable:$true] %s914_s8 }
  0x84   : > { %s883_s29 = scalar_lea.sflag [#allocation10], %s1766_s25  ;;  %p2009_p10 = scmp.ne.s32.totalorder %s1996_s28, 0 }
  0xee   : > { %v342_v2 = vpop.permute.xlu0 %341  ;;  %v413_v18 = vpop.permute.xlu1 %412 }
  0xef   : > { %v348_v3 = vsel %vm343_vm1, %v342_v2, 0  ;;  %v419_v19 = vsel %vm417_vm3, %v413_v18, 0 }
  0xf0   : > { %1149 = vmatpush3.bf16.xpose.msra.mxu0 %v348_v3  ;;  %1155 = vmatpush3.bf16.msra.mxu1 %v419_v19 }
  0xf1   : > { %1166 = vmatprep.subr.bf16.mxu0 %v1530_v0  ;;  %1160 = vmatprep.subr.bf16.mxu1 %v1530_v0 }
  0xf2   : > { %v475_v31 = vpop.permute.xlu1 %474 }
  0xf3   : > { %v480_v37 = vsel %vm343_vm1, %v475_v31, 0 }
  0xf7   : > { %1151 = vmatmul.mubr.msk.bf16.vlgmr.msra.gmra.mrb[0].mxu0 %vm343_vm1, %v335_v4 }
  0xf8   : > { %1168 = vmatprep.mubr.msk.bf16.mxu0 %vm1531_vm0, %v1530_v0 }
 0x1ca   : > { %v384_v10 = vpop.f32.mrb[0].mxu0 }
 0x1cb   : > { %v390_v11 = vmul.f32 0.35355338, %v384_v10  ;;  %v1152_v12 = vpop.f32.mrb[1].mxu0 }
 0x1cc   : > { %v387_v13 = vpop.f32.mrb[2].mxu0 }
 0x1cd   : > { %v1153_v14 = vpop.f32.mrb[3].mxu0  ;;  %v391_v15 = vsel %vm334_vm2, %v390_v11, -1e+30 }
 0x1ce   : > { %v392_v16 = vsel %vm343_vm1, %v391_v15, -inf }
 0x1cf   : > { %393 = vmax.xlane.f32.xlu0 %v392_v16 }
 0x1e5   : > { %750 = vrot.lane.b32.xlu0 %v1295_v17, %s1535_s14  ;;  %s1407_s14 = scalar_lea.vmem %s1892_s8, 256 }
 0x1e6   : > { %p1408_p4 = scmp.ne.s32.totalorder %s1892_s8, %s1407_s14 }
 0x1e8   : > { %p1409_p12 = pnand %p1408_p4, %p2009_p10 }
 0x1ea   : > { %p1410_p1 = pneg %p1409_p12 }
 0x25c   : > { %v394_v20 = vpop.xlane.xlu0 %393 }
 0x25d   : > { %v395_v21 = vsub.f32 %v391_v15, %v394_v20  ;;  %v1298_v20 = vld [vmem:[%s1801_s27] ss:$0 sps:$4 sm:$0xff]  }
 0x25f   : > { %v396_v22 = vpack.c.bf16 %v395_v21, %v395_v21 }
 0x260   : > { %v751_v40 = vpop.permute.xlu0 %750 }
 0x261   : > { %v398_v23 = vmul.bf16 1069105081, %v396_v22  ;;  %v756_v42 = vsel %vm343_vm1, %v751_v40, 0 }
 0x263   : > { %1301 = vpow.bf16 %v398_v23 }
 0x26e   : > { %v1302_v24 = vpop.eup %1301 }
 0x26f   : > { %v400_v25 = vunpack.c.l.bf16 %v1302_v24 }
 0x271   : > { %v401_v26 = vsel %vm343_vm1, %v400_v25, 0.0 }
 0x272   : > { %402 = vadd.xlane.f32.xlu1 %v401_v26  ;;  %v1299_v26 = vld [vmem:[%s1801_s27] ss:$0 sps:$4 sm:$0xff]  }
 0x283   : > { %469 = vrot.lane.b32.xlu1 %v1293_v27, %s1536_s11  ;;  %s1545_s11 = smov [#allocation9]  }
 0x287   : > { %612 = vrot.lane.b32.xlu1 %v1294_v28, %s1537_s13  ;;  %s1411_s13 = sshll.u32 %s1545_s11, 4  ;;  %s1412_s13 = int_to_ptr.vmem [resolvable:$false] %s1411_s13 }
 0x288   : > { %p1414_p8 = scmp.lt.s32.totalorder %s1892_s8, %s1412_s13 }
 0x28b   : > { %607 = vrot.lane.b32.xlu1 %v1296_v29, %s1538_s26  ;;  %s1413_s26 = scalar_lea.vmem %s1412_s13, 512 }
 0x28c   : > { %p1415_p9 = scmp.lt.s32.totalorder %s1413_s26, %s1407_s14 }
 0x28e   : > { %p1416_p6 = por %p1415_p9, %p1414_p8 }
 0x28f   : > { %745 = vrot.lane.b32.xlu1 %v1297_v30, %s1539_s1  ;;  %v1300_v30 = vld [vmem:[%s1801_s27] ss:$0 sps:$4 sm:$0xff]   ;;  %s1544_s27 = smov 16  }
 0x290   : > { %p1417_p13 = pnand %p1416_p6, %p1410_p1 }
 0x2ff   : > { %v403_v32 = vpop.xlane.xlu1 %402 }
 0x300   : > { %1303 = vrcp.f32 %v403_v32 }
 0x303   : > { %v470_v35 = vpop.permute.xlu1 %469 }
 0x307   : > { %v613_v38 = vpop.permute.xlu1 %612 }
 0x308   : > { %v618_v39 = vsel %vm343_vm1, %v613_v38, 0 }
 0x30a   : > { %v1304_v33 = vpop.eup %1303 }
 0x30b   : > { %v405_v34 = vmul.f32 %v1304_v33, %v400_v25  ;;  %v608_v41 = vpop.permute.xlu1 %607 }
 0x30d   : > { %v406_v36 = vpack.c.bf16 %v405_v34, %v405_v34 }
 0x30f   : > { %1157 = vmatmul.mubr.msk.bf16.vlgmr.msra.gmra.mrb[0].mxu1 %vm343_vm1, %v406_v36  ;;  %408 = vst.msk [vmem:[%s1827_s23] sm:$0xf] %vm407_vm4, %v406_v36  ;;  %v746_v43 = vpop.permute.xlu1 %745 }
 0x310   : > { %1161 = vmatpush3.bf16.xpose.msra.mxu1 %v480_v37  ;;  %1162 = vmatprep.mubr.msk.bf16.mxu1 %vm1531_vm0, %v1530_v0 }
 0x311   : > { %1172 = vmatprep.subr.bf16.mxu1 %v1530_v0 }
 0x317   : > { %1163 = vmatmul.mubr.msk.bf16.vlgmr.msra.gmra.mrb[4].mxu1 %vm343_vm1, %v470_v35 }
 0x318   : > { %1173 = vmatpush3.bf16.xpose.msra.mxu1 %v618_v39  ;;  %1174 = vmatprep.mubr.msk.bf16.mxu1 %vm1531_vm0, %v1530_v0 }
 0x319   : > { %1184 = vmatprep.subr.bf16.mxu1 %v1530_v0 }
 0x31f   : > { %1175 = vmatmul.mubr.msk.bf16.vlgmr.msra.gmra.mrb[8].mxu1 %vm343_vm1, %v608_v41 }
 0x320   : > { %1185 = vmatpush3.bf16.xpose.msra.mxu1 %v756_v42  ;;  %1186 = vmatprep.mubr.msk.bf16.mxu1 %vm1531_vm0, %v1530_v0 }
 0x327   : > { %1187 = vmatmul.mubr.msk.bf16.vlgmr.msra.gmra.mrb[12].mxu1 %vm343_vm1, %v746_v43 }
 0x3e2   : > { %v455_v44 = vpop.f32.mrb[0].mxu1 }
 0x3e3   : > { %v461_v45 = vpack.c.bf16 %v455_v44, %v455_v44  ;;  %v1158_v46 = vpop.f32.mrb[1].mxu1 }
 0x3e4   : > { %v458_v47 = vpop.f32.mrb[2].mxu1 }
 0x3e5   : > { %462 = vst.msk [vmem:[%s1845_s6] sm:$0xf] %vm407_vm4, %v461_v45  ;;  %v1159_v48 = vpop.f32.mrb[3].mxu1 }
 0x3ea   : > { %v516_v49 = vpop.f32.mrb[4].mxu1 }
 0x3eb   : > { %v522_v50 = vmul.f32 0.35355338, %v516_v49  ;;  %v1164_v51 = vpop.f32.mrb[5].mxu1 }
 0x3ec   : > { %v519_v52 = vpop.f32.mrb[6].mxu1 }
 0x3ed   : > { %v1165_v53 = vpop.f32.mrb[7].mxu1  ;;  %v523_v54 = vsel %vm334_vm2, %v522_v50, -1e+30 }
 0x3ee   : > { %v524_v55 = vsel %vm343_vm1, %v523_v54, -inf }
 0x3ef   : > { %525 = vmax.xlane.f32.xlu1 %v524_v55 }
 0x3f2   : > { %v654_v56 = vpop.f32.mrb[8].mxu1 }
 0x3f3   : > { %v660_v57 = vmul.f32 0.35355338, %v654_v56  ;;  %v1176_v58 = vpop.f32.mrb[9].mxu1 }
 0x3f4   : > { %v657_v59 = vpop.f32.mrb[10].mxu1 }
 0x3f5   : > { %v661_v60 = vsel %vm334_vm2, %v660_v57, -1e+30  ;;  %v1177_v61 = vpop.f32.mrb[11].mxu1 }
 0x3f6   : > { %v662_v62 = vsel %vm343_vm1, %v661_v60, -inf }
 0x3f7   : > { %663 = vmax.xlane.f32.xlu0 %v662_v62 }
 0x3fa   : > { %v792_v63 = vpop.f32.mrb[12].mxu1 }
 0x3fb   : > { %v798_v1 = vmul.f32 0.35355338, %v792_v63  ;;  %v1188_v2 = vpop.f32.mrb[13].mxu1 }
 0x3fc   : > { %v795_v3 = vpop.f32.mrb[14].mxu1 }
 0x3fd   : > { %v799_v4 = vsel %vm334_vm2, %v798_v1, -1e+30  ;;  %v1189_v5 = vpop.f32.mrb[15].mxu1 }
 0x3fe   : > { %v800_v6 = vsel %vm343_vm1, %v799_v4, -inf }
 0x3ff   : > { %801 = vmax.xlane.f32.xlu1 %v800_v6 }
 0x47c   : > { %v526_v7 = vpop.xlane.xlu1 %525 }
 0x47d   : > { %v527_v10 = vsub.f32 %v523_v54, %v526_v7 }
 0x47f   : > { %v528_v11 = vpack.c.bf16 %v527_v10, %v527_v10 }
 0x481   : > { %v530_v12 = vmul.bf16 1069105081, %v528_v11 }
 0x483   : > { %1305 = vpow.bf16 %v530_v12 }
 0x484   : > { %v664_v22 = vpop.xlane.xlu0 %663 }
 0x485   : > { %v665_v23 = vsub.f32 %v661_v60, %v664_v22 }
 0x487   : > { %v666_v24 = vpack.c.bf16 %v665_v23, %v665_v23 }
 0x489   : > { %v668_v25 = vmul.bf16 1069105081, %v666_v24 }
 0x48c   : > { %v802_v13 = vpop.xlane.xlu1 %801 }
 0x48d   : > { %v803_v14 = vsub.f32 %v799_v4, %v802_v13 }
 0x48e   : > { %v1306_v15 = vpop.eup %1305 }
 0x48f   : > { %v804_v16 = vpack.c.bf16 %v803_v14, %v803_v14  ;;  %v532_v17 = vunpack.c.l.bf16 %v1306_v15 }
 0x491   : > { %v806_v18 = vmul.bf16 1069105081, %v804_v16  ;;  %v533_v8 = vsel %vm343_vm1, %v532_v17, 0.0 }
 0x492   : > { %534 = vadd.xlane.f32.xlu1 %v533_v8 }
 0x493   : > { %1307 = vpow.bf16 %v806_v18 }
 0x494   : > { %1309 = vpow.bf16 %v668_v25 }
 0x49e   : > { %v1308_v9 = vpop.eup %1307 }
 0x49f   : > { %v808_v19 = vunpack.c.l.bf16 %v1308_v9  ;;  %v1310_v27 = vpop.eup %1309 }
 0x4a0   : > { %v670_v28 = vunpack.c.l.bf16 %v1310_v27 }
 0x4a1   : > { %v809_v21 = vsel %vm343_vm1, %v808_v19, 0.0 }
 0x4a2   : > { %810 = vadd.xlane.f32.xlu0 %v809_v21  ;;  %v671_v29 = vsel %vm343_vm1, %v670_v28, 0.0 }
 0x4a3   : > { %544 = vrot.lane.b32.xlu1 %v1298_v20, %s1540_s9 }
 0x4b8   : > { %682 = vrot.lane.b32.xlu0 %v1299_v26, %s1541_s10 }
 0x4c7   : > { %672 = vadd.xlane.f32.xlu1 %v671_v29 }
 0x4d8   : > { %820 = vrot.lane.b32.xlu1 %v1300_v30, %s1542_s12 }
 0x51f   : > { %v535_v31 = vpop.xlane.xlu1 %534 }
 0x520   : > { %1311 = vrcp.f32 %v535_v31 }
 0x523   : > { %v545_v32 = vpop.permute.xlu1 %544 }
 0x524   : > { %v550_v33 = vsel %vm417_vm3, %v545_v32, 0 }
 0x525   : > { %1167 = vmatpush3.bf16.msra.mxu0 %v550_v33 }
 0x526   : > { %1178 = vmatprep.subr.bf16.mxu0 %v1530_v0 }
 0x52a   : > { %v1312_v34 = vpop.eup %1311 }
 0x52b   : > { %v537_v35 = vmul.f32 %v1312_v34, %v532_v17 }
 0x52d   : > { %v538_v36 = vpack.c.bf16 %v537_v35, %v537_v35 }
 0x52f   : > { %1103 = vst.msk [vmem:[%s1827_s23 + $0x4] sm:$0xf] %vm407_vm4, %v538_v36  ;;  %1169 = vmatmul.mubr.msk.bf16.vlgmr.msra.gmra.mrb[4].mxu0 %vm343_vm1, %v538_v36  ;;  %v811_v37 = vpop.xlane.xlu0 %810 }
 0x530   : > { %1313 = vrcp.f32 %v811_v37  ;;  %1180 = vmatprep.mubr.msk.bf16.mxu0 %vm1531_vm0, %v1530_v0 }
 0x533   : > { %v683_v38 = vpop.permute.xlu0 %682 }
 0x534   : > { %v688_v39 = vsel %vm417_vm3, %v683_v38, 0 }
 0x535   : > { %1179 = vmatpush3.bf16.msra.mxu0 %v688_v39 }
 0x536   : > { %1190 = vmatprep.subr.bf16.mxu0 %v1530_v0 }
 0x53a   : > { %v1314_v40 = vpop.eup %1313 }
 0x53b   : > { %v813_v41 = vmul.f32 %v1314_v40, %v808_v19 }
 0x53d   : > { %v814_v42 = vpack.c.bf16 %v813_v41, %v813_v41 }
 0x53f   : > { %1117 = vst.msk [vmem:[%s1827_s23 + $0xc] sm:$0xf] %vm407_vm4, %v814_v42 }
 0x554   : > { %v673_v43 = vpop.xlane.xlu1 %672 }
 0x555   : > { %1315 = vrcp.f32 %v673_v43 }
 0x558   : > { %v821_v45 = vpop.permute.xlu1 %820 }
 0x559   : > { %v826_v47 = vsel %vm417_vm3, %v821_v45, 0 }
 0x55f   : > { %v1316_v44 = vpop.eup %1315 }
 0x560   : > { %v675_v46 = vmul.f32 %v1316_v44, %v670_v28 }
 0x562   : > { %v676_v48 = vpack.c.bf16 %v675_v46, %v675_v46 }
 0x564   : > { %1110 = vst.msk [vmem:[%s1827_s23 + $0x8] sm:$0xf] %vm407_vm4, %v676_v48  ;;  %1181 = vmatmul.mubr.msk.bf16.vlgmr.msra.gmra.mrb[8].mxu0 %vm343_vm1, %v676_v48 }
 0x565   : > { %1191 = vmatpush3.bf16.msra.mxu0 %v826_v47  ;;  %1192 = vmatprep.mubr.msk.bf16.mxu0 %vm1531_vm0, %v1530_v0 }
 0x56c   : > { %1193 = vmatmul.mubr.msk.bf16.vlgmr.msra.gmra.mrb[12].mxu0 %vm343_vm1, %v814_v42 }
 0x602   : > { %v586_v49 = vpop.f32.mrb[4].mxu0 }
 0x603   : > { %v1128_v50 = vpack.c.bf16 %v586_v49, %v586_v49  ;;  %v1170_v51 = vpop.f32.mrb[5].mxu0 }
 0x604   : > { %v589_v52 = vpop.f32.mrb[6].mxu0 }
 0x605   : > { %596 = vrot.lane.b32.xlu1 %v1128_v50, %s1543_s20  ;;  %v1171_v53 = vpop.f32.mrb[7].mxu0 }
 0x637   : > { %v724_v54 = vpop.f32.mrb[8].mxu0 }
 0x638   : > { %v1129_v55 = vpack.c.bf16 %v724_v54, %v724_v54  ;;  %v1182_v56 = vpop.f32.mrb[9].mxu0 }
 0x639   : > { %v727_v57 = vpop.f32.mrb[10].mxu0 }
 0x63a   : > { %734 = vrot.lane.b32.xlu0 %v1129_v55, %s1544_s27  ;;  %v1183_v0 = vpop.f32.mrb[11].mxu0 }
 0x63b   : > { %1420 = shalt.err (!%p1417_p13)
}
 0x63c   : > { %s1421_s1 = scalar_lea.hbm %s1890_s21, 256  ;;  %s1425_s9 = scalar_lea.hbm %s1981_s4, 512 }
 0x63d   : > { %p1422_p11 = scmp.ne.s32.totalorder %s1890_s21, %s1421_s1  ;;  %p1426_p7 = scmp.lt.u32.totalorder %s1890_s21, %s1981_s4 }
 0x63e   : > { %p1427_p3 = scmp.lt.u32.totalorder %s1425_s9, %s1421_s1  ;;  %p1429_p4 = scmp.lt.u32.totalorder %s1421_s1, %s1890_s21 }
 0x63f   : > { %p1423_p2 = pnand %p1422_p11, %p2009_p10 }
 0x640   : > { %p1428_p0 = por %p1427_p3, %p1426_p7 }
 0x641   : > { %p1424_p5 = pneg %p1423_p2 }
 0x642   : > { %p1430_p12 = por %p1429_p4, %p1428_p0 }
 0x644   : > { %p1431_p1 = pnand %p1430_p12, %p1424_p5 }
 0x646   : > { %1434 = shalt.err (!%p1431_p1)
}
 0x647   : > { %s1546_s20 = smov 4   ;;  %v862_v58 = vpop.f32.mrb[12].mxu0  ;;  %s1547_s19 = smov 24   ;;  %vm599_vm5 = vcmask 126016   ;;  %vm737_vm6 = vcmask 191616   ;;  %vm875_vm7 = vcmask 257216  }
 0x648   : > { %1203 = dma.vmem_to_hbm [thread:$0]  (%p2009_p10), %s1892_s8, 256, %s1890_s21, %s883_s29, %s1533_s5, %s1533_s5, %s1546_s20   ;;  %v1130_v59 = vpack.c.bf16 %v862_v58, %v862_v58  ;;  %v1194_v60 = vpop.f32.mrb[13].mxu0 }
 0x649   : > { %v865_v61 = vpop.f32.mrb[14].mxu0  ;;  %s1123_s22 = sshll.u32 %s1517_s18, 6  ;;  %s898_s24 = sshll.u32 %s1845_s6, 4  ;;  %s1929_s24 = int_to_ptr.vmem [resolvable:$true] %s898_s24 }
 0x64a   : > { %872 = vrot.lane.b32.xlu1 %v1130_v59, %s1547_s19  ;;  %v1195_v62 = vpop.f32.mrb[15].mxu0  ;;  %s1927_s21 = scalar_lea.hbm %s1980_s3, %s1123_s22  ;;  %s878_s27 = scalar_lea.sflag [#allocation4], %s1766_s25 }
 0x64b   : > { %s1435_s29 = scalar_lea.vmem %s1929_s24, 64  ;;  %s1548_s18 = smov [#allocation8]  }
 0x64c   : > { %p1436_p8 = scmp.ne.s32.totalorder %s1929_s24, %s1435_s29  ;;  %s1439_s14 = sshll.u32 %s1548_s18, 4  ;;  %s1440_s14 = int_to_ptr.vmem [resolvable:$false] %s1439_s14 }
 0x64d   : > { %s1441_s11 = scalar_lea.vmem %s1440_s14, 128  ;;  %p1442_p13 = scmp.lt.s32.totalorder %s1929_s24, %s1440_s14 }
 0x64e   : > { %p1437_p9 = pnand %p1436_p8, %p2009_p10  ;;  %p1443_p11 = scmp.lt.s32.totalorder %s1441_s11, %s1435_s29 }
 0x650   : > { %p1438_p6 = pneg %p1437_p9  ;;  %p1444_p2 = por %p1443_p11, %p1442_p13 }
 0x652   : > { %p1445_p5 = pnand %p1444_p2, %p1438_p6 }
 0x677   : > { %v597_v63 = vpop.permute.xlu1 %596 }
 0x678   : > { %600 = vst.msk [vmem:[%s1845_s6] sm:$0xf] %vm599_vm5, %v597_v63 }
 0x6ac   : > { %v735_v1 = vpop.permute.xlu0 %734 }
 0x6ad   : > { %738 = vst.msk [vmem:[%s1845_s6] sm:$0xf] %vm737_vm6, %v735_v1 }
 0x6bc   : > { %v873_v2 = vpop.permute.xlu1 %872 }
 0x6bd   : > { %876 = vst.msk [vmem:[%s1845_s6] sm:$0xf] %vm875_vm7, %v873_v2 }
 0x6be   : > { %1448 = shalt.err (!%p1445_p5)
}
 0x6bf   : > { %s1449_s25 = scalar_lea.hbm %s1927_s21, 64  ;;  %s1453_s26 = scalar_lea.hbm %s1980_s3, 128 }
 0x6c0   : > { %p1450_p7 = scmp.ne.s32.totalorder %s1927_s21, %s1449_s25  ;;  %p1454_p4 = scmp.lt.u32.totalorder %s1927_s21, %s1980_s3 }
 0x6c1   : > { %p1455_p12 = scmp.lt.u32.totalorder %s1453_s26, %s1449_s25  ;;  %p1457_p8 = scmp.lt.u32.totalorder %s1449_s25, %s1927_s21 }
 0x6c2   : > { %p1451_p3 = pnand %p1450_p7, %p2009_p10 }
 0x6c3   : > { %p1456_p1 = por %p1455_p12, %p1454_p4 }
 0x6c4   : > { %p1452_p0 = pneg %p1451_p3 }
 0x6c5   : > { %p1458_p9 = por %p1457_p8, %p1456_p1 }
 0x6c7   : > { %p1459_p6 = pnand %p1458_p9, %p1452_p0 }
 0x6c9   : > { %1462 = shalt.err (!%p1459_p6)
}
 0x6ca   : > { %1202 = dma.vmem_to_hbm [thread:$0]  (%p2009_p10), %s1929_s24, 64, %s1927_s21, %s878_s27  }
 0x6cb PF: > { %s2010_s23 = sld [smem:[#allocation16_spill]]  ;;  %s929_s9 = sand.u32 1, %s1505_s15  }
 0x6cc   : > { %p2011_p13 = scmp.ne.s32.totalorder %s1998_s30, 0  ;;  %s930_s10 = scalar_lea.sflag [#allocation4], %s929_s9 }
 0x6d1   : > { %p2012_p11 = scmp.ge.s32.totalorder %s2010_s23, 2 }
 0x6d3   : > { %p1217_p2 = pnand %p2012_p11, %p2011_p13 }
 0x6d5   : > { %1496 = dma.done.wait (!%p1217_p2), %s930_s10, 64  }
 0x6d6   : > { %1498 = vsyncadd (!%p1217_p2), %s930_s10, 4294967232  ;;  %s939_s12 = scalar_lea.sflag [#allocation10], %s929_s9 }
 0x6d7   : > { %1500 = dma.done.wait (!%p1217_p2), %s939_s12, 256  }
 0x6d8   : > { %1502 = vsyncadd (!%p1217_p2), %s939_s12, 4294967040  ;;  %s27_s20 = sadd.s32 1, %s2010_s23   ;;  %s2013_s28 = sld [smem:[#allocation18_spill]] }
 0x6d9   : > { %p24_p5 = scmp.ge.s32.totalorder %s27_s20, 4   ;;  %s2014_s18 = sld [smem:[#allocation15_spill]] }
 0x6da   : > { %s2015_s19 = sld [smem:[#allocation17_spill]]  ;;  %s2016_s15 = smov %s1509_s16 }
 0x6db   : > { %s2017_s16 = smov %s1513_s17  ;;  %26 = sbr.rel (!%p24_p5) target bundleno = 12 (0xc), region = 121 }
 0x6de   : > { %s2018_s17 = smov %s2013_s28 }
 0x6e2   :  { %944 = vsyncpa [#allocation3], 1 }
 0x6e3   :  { %946 = vsyncpa [#allocation3 + $0x1], 1 }
 0x6e4   :  { %947 = vsyncpa [#allocation6], 1 }
 0x6e5   :  { %949 = vsyncpa [#allocation6 + $0x1], 1 }
 0x6e6   :  { %950 = vsyncpa [#allocation4], 1 }
 0x6e7   :  { %952 = vsyncpa [#allocation4 + $0x1], 1 }
 0x6e8   :  { %953 = vsyncpa [#allocation10], 1 }
 0x6e9   :  { %955 = vsyncpa [#allocation10 + $0x1], 1 }

// kernel: decoder_forward.32
= control target key start
LH: loop header
LB: loop body
LE: loop exit
PB: predicated region body
PF: predicated region fallthrough
CT: control target
= control target key end

     0   :  { %8 = vsyncpa [#allocation4], 0  ;;  %s401_s0 = inlined_call_operand.hbm [shape: bf16[16,32], index: 0, kind: input, shape index: {}]   ;;  %s402_s1 = inlined_call_operand.hbm [shape: bf16[32,64], index: 1, kind: input, shape index: {}]   ;;  %s403_s2 = inlined_call_operand.hbm [shape: f32[1,64], index: 2, kind: input, shape index: {}]   ;;  %s404_s3 = inlined_call_operand.hbm [shape: bf16[16,64], index: 3, kind: output, shape index: {}]  }
   0x1   :  { %9 = vsyncpa [#allocation7], 0 }
   0x2   :  { %10 = vsyncpa [#allocation5], 0  ;;  %s305_s12 = smov [#allocation6]   ;;  %s306_s14 = smov [#allocation3]  }
   0x3   :  { %s28_s13 = sshll.u32 %s305_s12, 4  ;;  %s16_s15 = sshll.u32 %s306_s14, 4  ;;  %s29_s13 = int_to_ptr.vmem [resolvable:$true] %s28_s13  ;;  %s333_s15 = int_to_ptr.vmem [resolvable:$true] %s16_s15 }
   0x4   :  { %s211_s18 = scalar_lea.hbm %s402_s1, 256 }
   0x5   :  { %p212_p0 = scmp.ne.s32.totalorder %s402_s1, %s211_s18  ;;  %p215_p1 = scmp.lt.u32.totalorder %s211_s18, %s402_s1 }
   0x7   :  { %p217_p2 = pnand %p215_p1, %p212_p0 }
   0x9   :  { %220 = shalt.err (!%p217_p2)
}
   0xa   :  { %s221_s23 = scalar_lea.vmem %s29_s13, 256  ;;  %p226_p4 = scmp.lt.s32.totalorder %s29_s13, %s29_s13 }
   0xb   :  { %p222_p3 = scmp.ne.s32.totalorder %s29_s13, %s221_s23  ;;  %p227_p5 = scmp.lt.s32.totalorder %s221_s23, %s221_s23 }
   0xd   :  { %p228_p6 = por %p227_p5, %p226_p4 }
   0xf   :  { %p229_p7 = pnand %p228_p6, %p222_p3 }
  0x11   :  { %232 = shalt.err (!%p229_p7)
}
  0x12   :  { %s307_s24 = smov 64   ;;  %s308_s25 = smov 4  }
  0x13   :  { %34 = dma.hbm_to_vmem [thread:$0]  %s402_s1, 256, %s29_s13, [#allocation7], %s307_s24, %s307_s24, %s308_s25  }
  0x14   :  { %s233_s30 = scalar_lea.hbm %s401_s0, 128 }
  0x15   :  { %p234_p8 = scmp.ne.s32.totalorder %s401_s0, %s233_s30  ;;  %p237_p9 = scmp.lt.u32.totalorder %s233_s30, %s401_s0 }
  0x17   :  { %p239_p10 = pnand %p237_p9, %p234_p8 }
  0x19   :  { %242 = shalt.err (!%p239_p10)
}
  0x1a   :  { %s243_s8 = scalar_lea.vmem %s333_s15, 128  ;;  %p248_p12 = scmp.lt.s32.totalorder %s333_s15, %s333_s15 }
  0x1b   :  { %p244_p11 = scmp.ne.s32.totalorder %s333_s15, %s243_s8  ;;  %p249_p13 = scmp.lt.s32.totalorder %s243_s8, %s243_s8 }
  0x1d   :  { %p250_p0 = por %p249_p13, %p248_p12 }
  0x1f   :  { %p251_p1 = pnand %p250_p0, %p244_p11 }
  0x21   :  { %254 = shalt.err (!%p251_p1)
}
  0x22   :  { %22 = dma.hbm_to_vmem [thread:$0]  %s401_s0, 128, %s333_s15, [#allocation4], %s307_s24, %s307_s24, %s308_s25  }
  0x23   :  { %s309_s10 = smov [#allocation8]   ;;  %s255_s14 = scalar_lea.hbm %s403_s2, 16 }
  0x24   :  { %s41_s11 = sshll.u32 %s309_s10, 4  ;;  %p256_p2 = scmp.ne.s32.totalorder %s403_s2, %s255_s14  ;;  %s42_s11 = int_to_ptr.vmem [resolvable:$true] %s41_s11 }
  0x25   :  { %p259_p3 = scmp.lt.u32.totalorder %s255_s14, %s403_s2 }
  0x27   :  { %p261_p4 = pnand %p259_p3, %p256_p2 }
  0x29   :  { %264 = shalt.err (!%p261_p4)
}
  0x2a   :  { %s265_s20 = scalar_lea.vmem %s42_s11, 16  ;;  %s269_s0 = scalar_lea.vmem %s42_s11, 32 }
  0x2b   :  { %p266_p5 = scmp.ne.s32.totalorder %s42_s11, %s265_s20  ;;  %p270_p6 = scmp.lt.s32.totalorder %s42_s11, %s42_s11 }
  0x2c   :  { %p271_p7 = scmp.lt.s32.totalorder %s269_s0, %s265_s20 }
  0x2e   :  { %p272_p8 = por %p271_p7, %p270_p6 }
  0x30   :  { %p273_p9 = pnand %p272_p8, %p266_p5 }
  0x32   :  { %276 = shalt.err (!%p273_p9)
}
  0x33   :  { %44 = dma.hbm_to_vmem [thread:$0]  %s403_s2, 16, %s42_s11, [#allocation7]  }
  0x34   :  { %299 = dma.done.wait [#allocation4], 128  }
  0x35   :  { %300 = vsyncadd [#allocation4], 4294967168 }
  0x36   :  { %301 = dma.done.wait [#allocation7], 272  }
  0x37   :  { %302 = vsyncadd [#allocation7], 4294967024  ;;  %vm59_vm0 = vcmask 523264   ;;  %v310_v0 = vmov 0.0   ;;  %vm311_vm1 = vmmov 0   ;;  %v208_v1 = vld [vmem:[#allocation6] sm:$0xff]  }
  0x38   :  { %60 = vst.msk [vmem:[#allocation2] sm:$0xff] %vm59_vm0, %v310_v0  ;;  %61 = vst.msk [vmem:[#allocation2 + $0x8] sm:$0xff] %vm59_vm0, %v310_v0  ;;  %192 = vmatprep.subr.bf16.mxu0 %v310_v0  ;;  %196 = vmatprep.mubr.msk.bf16.mxu0 %vm311_vm1, %v310_v0  ;;  %v209_v2 = vld [vmem:[#allocation6 + $0x8] sm:$0xff]   ;;  %v210_v3 = vld [vmem:[#allocation3] sm:$0xff]   ;;  %vm87_vm2 = vcmask 261120   ;;  %vm159_vm3 = vcmask 519168  }
  0x39   :  { %193 = vmatpush3.bf16.msra.mxu0 %v208_v1  ;;  %v184_v12 = vld [vmem:[#allocation8] ss:$0 sm:$0xff]  ;;  %s312_s2 = smov [#allocation9]  }
  0x3a   :  { %194 = vmatprep.subr.bf16.mxu0 %v310_v0  ;;  %s167_s22 = sshll.u32 %s312_s2, 4  ;;  %s168_s22 = int_to_ptr.vmem [resolvable:$true] %s167_s22 }
  0x3b   :  { %s277_s23 = scalar_lea.vmem %s168_s22, 128  ;;  %p282_p11 = scmp.lt.s32.totalorder %s168_s22, %s168_s22 }
  0x3c   :  { %p278_p10 = scmp.ne.s32.totalorder %s168_s22, %s277_s23  ;;  %p283_p12 = scmp.lt.s32.totalorder %s277_s23, %s277_s23 }
  0x3d   :  { %195 = vmatpush3.bf16.msra.mxu0 %v209_v2 }
  0x3e   :  { %p284_p13 = por %p283_p12, %p282_p11 }
  0x3f   :  { %v62_v4 = vld [vmem:[#allocation2] sm:$0xff]  ;;  %v63_v6 = vld [vmem:[#allocation2 + $0x8] sm:$0xff] }
  0x40   :  { %197 = vmatmul.mubr.msk.bf16.vlgmr.msra.gmra.mrb[0].mxu0 %vm87_vm2, %v210_v3  ;;  %p285_p0 = pnand %p284_p13, %p278_p10 }
 0x113   :  { %v125_v5 = vpop.f32.mrb[0].mxu0 }
 0x114   :  { %v132_v7 = vadd.f32 %v125_v5, %v62_v4  ;;  %v198_v8 = vpop.f32.mrb[1].mxu0 }
 0x115   :  { %v128_v9 = vpop.f32.mrb[2].mxu0 }
 0x116   :  { %135 = vst.msk [vmem:[#allocation2] sm:$0xff] %vm59_vm0, %v132_v7  ;;  %v133_v10 = vadd.f32 %v128_v9, %v63_v6  ;;  %v199_v11 = vpop.f32.mrb[3].mxu0 }
 0x118   :  { %136 = vst.msk [vmem:[#allocation2 + $0x8] sm:$0xff] %vm59_vm0, %v133_v10 }
 0x11d   :  { %v140_v13 = vld [vmem:[#allocation2] sm:$0xff] }
 0x11e   :  { %v149_v14 = vadd.f32 %v184_v12, %v140_v13 }
 0x11f   :  { %v141_v15 = vld [vmem:[#allocation2 + $0x8] sm:$0xff] }
 0x120   :  { %v150_v16 = vadd.f32 %v184_v12, %v141_v15  ;;  %v187_v17 = vpack.c.bf16 %v149_v14, %v149_v14 }
 0x122   :  { %v188_v18 = vpack.c.bf16 %v150_v16, %v150_v16  ;;  %160 = vst.msk [vmem:[#allocation9] sm:$0xf] %vm159_vm3, %v187_v17 }
 0x124   :  { %161 = vst.msk [vmem:[#allocation9 + $0x4] sm:$0xf] %vm159_vm3, %v188_v18 }
 0x125   :  { %288 = shalt.err (!%p285_p0)
}
 0x126   :  { %s289_s28 = scalar_lea.hbm %s404_s3, 128 }
 0x127   :  { %p290_p1 = scmp.ne.s32.totalorder %s404_s3, %s289_s28  ;;  %p293_p2 = scmp.lt.u32.totalorder %s289_s28, %s404_s3 }
 0x129   :  { %p295_p3 = pnand %p293_p2, %p290_p1 }
 0x12b   :  { %298 = shalt.err (!%p295_p3)
}
 0x12c   :  { %173 = dma.vmem_to_hbm [thread:$0]  %s168_s22, 128, %s404_s3, [#allocation5], %s307_s24, %s307_s24, %s308_s25  }
 0x12d   :  { %303 = dma.done.wait [#allocation5], 128  }
 0x12e   :  { %304 = vsyncadd [#allocation5], 4294967168 }
 0x12f   :  { %177 = vsyncpa [#allocation4], 1 }
 0x130   :  { %178 = vsyncpa [#allocation7], 1 }
 0x131   :  { %179 = vsyncpa [#allocation5], 1 }

// kernel: decoder_forward.31
= control target key start
LH: loop header
LB: loop body
LE: loop exit
PB: predicated region body
PF: predicated region fallthrough
CT: control target
= control target key end

     0   :  { %8 = vsyncpa [#allocation4], 0  ;;  %s401_s0 = inlined_call_operand.hbm [shape: bf16[16,32], index: 0, kind: input, shape index: {}]   ;;  %s402_s1 = inlined_call_operand.hbm [shape: bf16[32,32], index: 1, kind: input, shape index: {}]   ;;  %s403_s2 = inlined_call_operand.hbm [shape: f32[1,32], index: 2, kind: input, shape index: {}]   ;;  %s404_s3 = inlined_call_operand.hbm [shape: bf16[16,32], index: 3, kind: output, shape index: {}]  }
   0x1   :  { %9 = vsyncpa [#allocation7], 0 }
   0x2   :  { %10 = vsyncpa [#allocation5], 0  ;;  %s304_s12 = smov [#allocation6]   ;;  %s305_s14 = smov [#allocation3]  }
   0x3   :  { %s28_s13 = sshll.u32 %s304_s12, 4  ;;  %s16_s15 = sshll.u32 %s305_s14, 4  ;;  %s29_s13 = int_to_ptr.vmem [resolvable:$true] %s28_s13  ;;  %s332_s15 = int_to_ptr.vmem [resolvable:$true] %s16_s15 }
   0x4   :  { %s210_s18 = scalar_lea.hbm %s402_s1, 256 }
   0x5   :  { %p211_p0 = scmp.ne.s32.totalorder %s402_s1, %s210_s18  ;;  %p214_p1 = scmp.lt.u32.totalorder %s210_s18, %s402_s1 }
   0x7   :  { %p216_p2 = pnand %p214_p1, %p211_p0 }
   0x9   :  { %219 = shalt.err (!%p216_p2)
}
   0xa   :  { %s220_s23 = scalar_lea.vmem %s29_s13, 256  ;;  %p225_p4 = scmp.lt.s32.totalorder %s29_s13, %s29_s13 }
   0xb   :  { %p221_p3 = scmp.ne.s32.totalorder %s29_s13, %s220_s23  ;;  %p226_p5 = scmp.lt.s32.totalorder %s220_s23, %s220_s23 }
   0xd   :  { %p227_p6 = por %p226_p5, %p225_p4 }
   0xf   :  { %p228_p7 = pnand %p227_p6, %p221_p3 }
  0x11   :  { %231 = shalt.err (!%p228_p7)
}
  0x12   :  { %s306_s24 = smov 64   ;;  %s307_s25 = smov 4  }
  0x13   :  { %34 = dma.hbm_to_vmem [thread:$0]  %s402_s1, 256, %s29_s13, [#allocation7], %s306_s24, %s306_s24, %s307_s25  }
  0x14   :  { %s232_s30 = scalar_lea.hbm %s401_s0, 128 }
  0x15   :  { %p233_p8 = scmp.ne.s32.totalorder %s401_s0, %s232_s30  ;;  %p236_p9 = scmp.lt.u32.totalorder %s232_s30, %s401_s0 }
  0x17   :  { %p238_p10 = pnand %p236_p9, %p233_p8 }
  0x19   :  { %241 = shalt.err (!%p238_p10)
}
  0x1a   :  { %s242_s8 = scalar_lea.vmem %s332_s15, 128  ;;  %p247_p12 = scmp.lt.s32.totalorder %s332_s15, %s332_s15 }
  0x1b   :  { %p243_p11 = scmp.ne.s32.totalorder %s332_s15, %s242_s8  ;;  %p248_p13 = scmp.lt.s32.totalorder %s242_s8, %s242_s8 }
  0x1d   :  { %p249_p0 = por %p248_p13, %p247_p12 }
  0x1f   :  { %p250_p1 = pnand %p249_p0, %p243_p11 }
  0x21   :  { %253 = shalt.err (!%p250_p1)
}
  0x22   :  { %22 = dma.hbm_to_vmem [thread:$0]  %s401_s0, 128, %s332_s15, [#allocation4], %s306_s24, %s306_s24, %s307_s25  }
  0x23   :  { %s308_s10 = smov [#allocation8]   ;;  %s254_s14 = scalar_lea.hbm %s403_s2, 16 }
  0x24   :  { %s41_s11 = sshll.u32 %s308_s10, 4  ;;  %p255_p2 = scmp.ne.s32.totalorder %s403_s2, %s254_s14  ;;  %s42_s11 = int_to_ptr.vmem [resolvable:$true] %s41_s11 }
  0x25   :  { %p258_p3 = scmp.lt.u32.totalorder %s254_s14, %s403_s2 }
  0x27   :  { %p260_p4 = pnand %p258_p3, %p255_p2 }
  0x29   :  { %263 = shalt.err (!%p260_p4)
}
  0x2a   :  { %s264_s20 = scalar_lea.vmem %s42_s11, 16  ;;  %s268_s0 = scalar_lea.vmem %s42_s11, 32 }
  0x2b   :  { %p265_p5 = scmp.ne.s32.totalorder %s42_s11, %s264_s20  ;;  %p269_p6 = scmp.lt.s32.totalorder %s42_s11, %s42_s11 }
  0x2c   :  { %p270_p7 = scmp.lt.s32.totalorder %s268_s0, %s264_s20 }
  0x2e   :  { %p271_p8 = por %p270_p7, %p269_p6 }
  0x30   :  { %p272_p9 = pnand %p271_p8, %p265_p5 }
  0x32   :  { %275 = shalt.err (!%p272_p9)
}
  0x33   :  { %44 = dma.hbm_to_vmem [thread:$0]  %s403_s2, 16, %s42_s11, [#allocation7]  }
  0x34   :  { %298 = dma.done.wait [#allocation4], 128  }
  0x35   :  { %299 = vsyncadd [#allocation4], 4294967168 }
  0x36   :  { %300 = dma.done.wait [#allocation7], 272  }
  0x37   :  { %301 = vsyncadd [#allocation7], 4294967024  ;;  %vm59_vm0 = vcmask 261120   ;;  %v309_v0 = vmov 0.0   ;;  %vm310_vm1 = vmmov 0   ;;  %v207_v1 = vld [vmem:[#allocation6] sm:$0xff]  }
  0x38   :  { %191 = vmatprep.subr.bf16.mxu0 %v309_v0  ;;  %195 = vmatprep.mubr.msk.bf16.mxu0 %vm310_vm1, %v309_v0  ;;  %60 = vst.msk [vmem:[#allocation2] sm:$0xff] %vm59_vm0, %v309_v0  ;;  %61 = vst.msk [vmem:[#allocation2 + $0x8] sm:$0xff] %vm59_vm0, %v309_v0  ;;  %v208_v2 = vld [vmem:[#allocation6 + $0x8] sm:$0xff]   ;;  %v209_v3 = vld [vmem:[#allocation3] sm:$0xff]   ;;  %vm158_vm2 = vcmask 257024   ;;  %s311_s2 = smov [#allocation9]  }
  0x39   :  { %192 = vmatpush3.bf16.msra.mxu0 %v207_v1  ;;  %v183_v12 = vld [vmem:[#allocation8] ss:$0 sm:$0xff]  ;;  %s166_s22 = sshll.u32 %s311_s2, 4  ;;  %s167_s22 = int_to_ptr.vmem [resolvable:$true] %s166_s22 }
  0x3a   :  { %193 = vmatprep.subr.bf16.mxu0 %v309_v0  ;;  %s276_s23 = scalar_lea.vmem %s167_s22, 128  ;;  %p281_p11 = scmp.lt.s32.totalorder %s167_s22, %s167_s22 }
  0x3b   :  { %p277_p10 = scmp.ne.s32.totalorder %s167_s22, %s276_s23  ;;  %p282_p12 = scmp.lt.s32.totalorder %s276_s23, %s276_s23 }
  0x3d   :  { %194 = vmatpush3.bf16.msra.mxu0 %v208_v2  ;;  %p283_p13 = por %p282_p12, %p281_p11 }
  0x3f   :  { %v62_v4 = vld [vmem:[#allocation2] sm:$0xff]  ;;  %v63_v6 = vld [vmem:[#allocation2 + $0x8] sm:$0xff]  ;;  %p284_p0 = pnand %p283_p13, %p277_p10 }
  0x40   :  { %196 = vmatmul.mubr.msk.bf16.vlgmr.msra.gmra.mrb[0].mxu0 %vm59_vm0, %v209_v3 }
 0x113   :  { %v125_v5 = vpop.f32.mrb[0].mxu0 }
 0x114   :  { %v132_v7 = vadd.f32 %v125_v5, %v62_v4  ;;  %v197_v8 = vpop.f32.mrb[1].mxu0 }
 0x115   :  { %v128_v9 = vpop.f32.mrb[2].mxu0 }
 0x116   :  { %134 = vst.msk [vmem:[#allocation2] sm:$0xff] %vm59_vm0, %v132_v7  ;;  %v133_v10 = vadd.f32 %v128_v9, %v63_v6  ;;  %v198_v11 = vpop.f32.mrb[3].mxu0 }
 0x118   :  { %135 = vst.msk [vmem:[#allocation2 + $0x8] sm:$0xff] %vm59_vm0, %v133_v10 }
 0x11d   :  { %v139_v13 = vld [vmem:[#allocation2] sm:$0xff] }
 0x11e   :  { %v148_v14 = vadd.f32 %v183_v12, %v139_v13 }
 0x11f   :  { %v140_v15 = vld [vmem:[#allocation2 + $0x8] sm:$0xff] }
 0x120   :  { %v149_v16 = vadd.f32 %v183_v12, %v140_v15  ;;  %v186_v17 = vpack.c.bf16 %v148_v14, %v148_v14 }
 0x122   :  { %v187_v18 = vpack.c.bf16 %v149_v16, %v149_v16  ;;  %159 = vst.msk [vmem:[#allocation9] sm:$0xf] %vm158_vm2, %v186_v17 }
 0x124   :  { %160 = vst.msk [vmem:[#allocation9 + $0x4] sm:$0xf] %vm158_vm2, %v187_v18 }
 0x125   :  { %287 = shalt.err (!%p284_p0)
}
 0x126   :  { %s288_s28 = scalar_lea.hbm %s404_s3, 128 }
 0x127   :  { %p289_p1 = scmp.ne.s32.totalorder %s404_s3, %s288_s28  ;;  %p292_p2 = scmp.lt.u32.totalorder %s288_s28, %s404_s3 }
 0x129   :  { %p294_p3 = pnand %p292_p2, %p289_p1 }
 0x12b   :  { %297 = shalt.err (!%p294_p3)
}
 0x12c   :  { %172 = dma.vmem_to_hbm [thread:$0]  %s167_s22, 128, %s404_s3, [#allocation5], %s306_s24, %s306_s24, %s307_s25  }
 0x12d   :  { %302 = dma.done.wait [#allocation5], 128  }
 0x12e   :  { %303 = vsyncadd [#allocation5], 4294967168 }
 0x12f   :  { %176 = vsyncpa [#allocation4], 1 }
 0x130   :  { %177 = vsyncpa [#allocation7], 1 }
 0x131   :  { %178 = vsyncpa [#allocation5], 1 }

// kernel: decoder_forward.36
= control target key start
LH: loop header
LB: loop body
LE: loop exit
PB: predicated region body
PF: predicated region fallthrough
CT: control target
= control target key end

     0   :  { %8 = vsyncpa [#allocation4], 0  ;;  %s421_s0 = inlined_call_operand.hbm [shape: bf16[16,32], index: 0, kind: input, shape index: {}]   ;;  %s422_s1 = inlined_call_operand.hbm [shape: bf16[32,128], index: 1, kind: input, shape index: {}]   ;;  %s423_s2 = inlined_call_operand.hbm [shape: f32[1,128], index: 2, kind: input, shape index: {}]   ;;  %s424_s3 = inlined_call_operand.hbm [shape: bf16[16,128], index: 3, kind: output, shape index: {}]  }
   0x1   :  { %9 = vsyncpa [#allocation7], 0 }
   0x2   :  { %10 = vsyncpa [#allocation5], 0  ;;  %s329_s12 = smov [#allocation6]   ;;  %s330_s14 = smov [#allocation3]  }
   0x3   :  { %s28_s13 = sshll.u32 %s329_s12, 4  ;;  %s16_s15 = sshll.u32 %s330_s14, 4  ;;  %s29_s13 = int_to_ptr.vmem [resolvable:$true] %s28_s13  ;;  %s357_s15 = int_to_ptr.vmem [resolvable:$true] %s16_s15 }
   0x4   :  { %s235_s18 = scalar_lea.hbm %s422_s1, 256 }
   0x5   :  { %p236_p0 = scmp.ne.s32.totalorder %s422_s1, %s235_s18  ;;  %p239_p1 = scmp.lt.u32.totalorder %s235_s18, %s422_s1 }
   0x7   :  { %p241_p2 = pnand %p239_p1, %p236_p0 }
   0x9   :  { %244 = shalt.err (!%p241_p2)
}
   0xa   :  { %s245_s23 = scalar_lea.vmem %s29_s13, 256  ;;  %p250_p4 = scmp.lt.s32.totalorder %s29_s13, %s29_s13 }
   0xb   :  { %p246_p3 = scmp.ne.s32.totalorder %s29_s13, %s245_s23  ;;  %p251_p5 = scmp.lt.s32.totalorder %s245_s23, %s245_s23 }
   0xd   :  { %p252_p6 = por %p251_p5, %p250_p4 }
   0xf   :  { %p253_p7 = pnand %p252_p6, %p246_p3 }
  0x11   :  { %256 = shalt.err (!%p253_p7)
}
  0x12   :  { %s331_s24 = smov 64   ;;  %s332_s25 = smov 4  }
  0x13   :  { %34 = dma.hbm_to_vmem [thread:$0]  %s422_s1, 256, %s29_s13, [#allocation7], %s331_s24, %s331_s24, %s332_s25  }
  0x14   :  { %s257_s30 = scalar_lea.hbm %s421_s0, 128 }
  0x15   :  { %p258_p8 = scmp.ne.s32.totalorder %s421_s0, %s257_s30  ;;  %p261_p9 = scmp.lt.u32.totalorder %s257_s30, %s421_s0 }
  0x17   :  { %p263_p10 = pnand %p261_p9, %p258_p8 }
  0x19   :  { %266 = shalt.err (!%p263_p10)
}
  0x1a   :  { %s267_s8 = scalar_lea.vmem %s357_s15, 128  ;;  %p272_p12 = scmp.lt.s32.totalorder %s357_s15, %s357_s15 }
  0x1b   :  { %p268_p11 = scmp.ne.s32.totalorder %s357_s15, %s267_s8  ;;  %p273_p13 = scmp.lt.s32.totalorder %s267_s8, %s267_s8 }
  0x1d   :  { %p274_p0 = por %p273_p13, %p272_p12 }
  0x1f   :  { %p275_p1 = pnand %p274_p0, %p268_p11 }
  0x21   :  { %278 = shalt.err (!%p275_p1)
}
  0x22   :  { %22 = dma.hbm_to_vmem [thread:$0]  %s421_s0, 128, %s357_s15, [#allocation4], %s331_s24, %s331_s24, %s332_s25  }
  0x23   :  { %s333_s10 = smov [#allocation8]   ;;  %s279_s14 = scalar_lea.hbm %s423_s2, 16 }
  0x24   :  { %s41_s11 = sshll.u32 %s333_s10, 4  ;;  %p280_p2 = scmp.ne.s32.totalorder %s423_s2, %s279_s14  ;;  %s42_s11 = int_to_ptr.vmem [resolvable:$true] %s41_s11 }
  0x25   :  { %p283_p3 = scmp.lt.u32.totalorder %s279_s14, %s423_s2 }
  0x27   :  { %p285_p4 = pnand %p283_p3, %p280_p2 }
  0x29   :  { %288 = shalt.err (!%p285_p4)
}
  0x2a   :  { %s289_s20 = scalar_lea.vmem %s42_s11, 16  ;;  %s293_s0 = scalar_lea.vmem %s42_s11, 32 }
  0x2b   :  { %p290_p5 = scmp.ne.s32.totalorder %s42_s11, %s289_s20  ;;  %p294_p6 = scmp.lt.s32.totalorder %s42_s11, %s42_s11 }
  0x2c   :  { %p295_p7 = scmp.lt.s32.totalorder %s293_s0, %s289_s20 }
  0x2e   :  { %p296_p8 = por %p295_p7, %p294_p6 }
  0x30   :  { %p297_p9 = pnand %p296_p8, %p290_p5 }
  0x32   :  { %300 = shalt.err (!%p297_p9)
}
  0x33   :  { %44 = dma.hbm_to_vmem [thread:$0]  %s423_s2, 16, %s42_s11, [#allocation7]  }
  0x34   :  { %323 = dma.done.wait [#allocation4], 128  }
  0x35   :  { %324 = vsyncadd [#allocation4], 4294967168 }
  0x36   :  { %325 = dma.done.wait [#allocation7], 272  }
  0x37   :  { %326 = vsyncadd [#allocation7], 4294967024  ;;  %v334_v0 = vmov 0.0   ;;  %vm335_vm0 = vmmov 0   ;;  %v228_v1 = vld [vmem:[#allocation6] sm:$0xff]   ;;  %v229_v2 = vld [vmem:[#allocation6 + $0x8] sm:$0xff]  }
  0x38   :  { %212 = vmatprep.subr.bf16.mxu0 %v334_v0  ;;  %216 = vmatprep.mubr.msk.bf16.mxu0 %vm335_vm0, %v334_v0  ;;  %v230_v3 = vld [vmem:[#allocation3] sm:$0xff]   ;;  %vm86_vm1 = vcmask 261120   ;;  %v199_v4 = vld [vmem:[#allocation8] ss:$0 sm:$0xff]  ;;  %s336_s2 = smov [#allocation9]  }
  0x39   :  { %213 = vmatpush3.bf16.msra.mxu0 %v228_v1  ;;  %s182_s22 = sshll.u32 %s336_s2, 4  ;;  %s183_s22 = int_to_ptr.vmem [resolvable:$true] %s182_s22 }
  0x3a   :  { %214 = vmatprep.subr.bf16.mxu0 %v334_v0  ;;  %s301_s23 = scalar_lea.vmem %s183_s22, 128  ;;  %p306_p11 = scmp.lt.s32.totalorder %s183_s22, %s183_s22 }
  0x3b   :  { %p302_p10 = scmp.ne.s32.totalorder %s183_s22, %s301_s23  ;;  %p307_p12 = scmp.lt.s32.totalorder %s301_s23, %s301_s23 }
  0x3d   :  { %215 = vmatpush3.bf16.msra.mxu0 %v229_v2  ;;  %p308_p13 = por %p307_p12, %p306_p11 }
  0x3f   :  { %p309_p0 = pnand %p308_p13, %p302_p10 }
  0x40   :  { %217 = vmatmul.mubr.msk.bf16.vlgmr.msra.gmra.mrb[0].mxu0 %vm86_vm1, %v230_v3 }
 0x113   :  { %v124_v5 = vpop.f32.mrb[0].mxu0 }
 0x114   :  { %v147_v6 = vadd.f32 %v199_v4, %v124_v5  ;;  %v218_v7 = vpop.f32.mrb[1].mxu0 }
 0x115   :  { %v127_v8 = vpop.f32.mrb[2].mxu0 }
 0x116   :  { %v151_v9 = vmul.f32 0.044715, %v147_v6  ;;  %v148_v10 = vadd.f32 %v199_v4, %v127_v8  ;;  %v219_v11 = vpop.f32.mrb[3].mxu0  ;;  %v149_v24 = vmul.f32 0.5, %v147_v6 }
 0x118   :  { %v153_v12 = vmul.f32 %v151_v9, %v147_v6  ;;  %v152_v13 = vmul.f32 0.044715, %v148_v10  ;;  %v150_v25 = vmul.f32 0.5, %v148_v10 }
 0x11a   :  { %v155_v14 = vmul.f32 %v153_v12, %v147_v6  ;;  %v154_v15 = vmul.f32 %v152_v13, %v148_v10 }
 0x11c   :  { %v156_v16 = vmul.f32 %v154_v15, %v148_v10  ;;  %v157_v17 = vadd.f32 %v155_v14, %v147_v6 }
 0x11e   :  { %v158_v18 = vadd.f32 %v156_v16, %v148_v10  ;;  %v159_v19 = vmul.f32 0.7978846, %v157_v17 }
 0x120   :  { %v160_v20 = vmul.f32 0.7978846, %v158_v18  ;;  %231 = vtanh.f32 %v159_v19 }
 0x122   :  { %233 = vtanh.f32 %v160_v20 }
 0x12a   :  { %v232_v21 = vpop.eup %231 }
 0x12b   :  { %v163_v22 = vadd.f32 1.0, %v232_v21 }
 0x12c   :  { %v234_v23 = vpop.eup %233 }
 0x12d   :  { %v164_v26 = vadd.f32 1.0, %v234_v23  ;;  %v165_v27 = vmul.f32 %v163_v22, %v149_v24 }
 0x12f   :  { %v166_v28 = vmul.f32 %v164_v26, %v150_v25 }
 0x131   :  { %v207_v29 = vpack.c.bf16 %v166_v28, %v165_v27 }
 0x133   :  { %208 = vst [vmem:[#allocation9] sm:$0xff] %v207_v29  }
 0x134   :  { %312 = shalt.err (!%p309_p0)
}
 0x135   :  { %s313_s28 = scalar_lea.hbm %s424_s3, 128 }
 0x136   :  { %p314_p1 = scmp.ne.s32.totalorder %s424_s3, %s313_s28  ;;  %p317_p2 = scmp.lt.u32.totalorder %s313_s28, %s424_s3 }
 0x138   :  { %p319_p3 = pnand %p317_p2, %p314_p1 }
 0x13a   :  { %322 = shalt.err (!%p319_p3)
}
 0x13b   :  { %188 = dma.vmem_to_hbm [thread:$0]  %s183_s22, 128, %s424_s3, [#allocation5], %s331_s24, %s331_s24, %s332_s25  }
 0x13c   :  { %327 = dma.done.wait [#allocation5], 128  }
 0x13d   :  { %328 = vsyncadd [#allocation5], 4294967168 }
 0x13e   :  { %192 = vsyncpa [#allocation4], 1 }
 0x13f   :  { %193 = vsyncpa [#allocation7], 1 }
 0x140   :  { %194 = vsyncpa [#allocation5], 1 }

// kernel: decoder_forward.33
= control target key start
LH: loop header
LB: loop body
LE: loop exit
PB: predicated region body
PF: predicated region fallthrough
CT: control target
= control target key end

     0   :  { %s2119_s0 = inlined_call_operand.hbm [shape: bf16[2,8,32], index: 0, kind: input, shape index: {}]   ;;  %s2120_s1 = inlined_call_operand.hbm [shape: bf16[2,8,64], index: 1, kind: input, shape index: {}, may-alias: {1,2}]   ;;  %s2121_s2 = inlined_call_operand.hbm [shape: bf16[2,8,64], index: 2, kind: input, shape index: {}, may-alias: {1,2}]   ;;  %s2122_s3 = inlined_call_operand.hbm [shape: bf16[2,1,8], index: 3, kind: input, shape index: {}]   ;;  %s2123_s4 = inlined_call_operand.hbm [shape: bf16[2,8,32], index: 4, kind: output, shape index: {0}]   ;;  %s2124_s5 = inlined_call_operand.hbm [shape: bf16[2,4,8,8], index: 5, kind: output, shape index: {1}]  }
   0x1   :  { %2135 = sst [smem:[#allocation24_spill]] %s2120_s1 }
   0x2   :  { %11 = vsyncpa [#allocation3], 0 }
   0x3   :  { %13 = vsyncpa [#allocation3 + $0x1], 0 }
   0x4   :  { %14 = vsyncpa [#allocation6], 0 }
   0x5   :  { %16 = vsyncpa [#allocation6 + $0x1], 0 }
   0x6   :  { %17 = vsyncpa [#allocation9], 0 }
   0x7   :  { %19 = vsyncpa [#allocation9 + $0x1], 0 }
   0x8   :  { %20 = vsyncpa [#allocation4], 0 }
   0x9   :  { %22 = vsyncpa [#allocation4 + $0x1], 0 }
   0xa   :  { %23 = vsyncpa [#allocation12], 0 }
   0xb   :  { %25 = vsyncpa [#allocation12 + $0x1], 0  ;;  %s1695_s18 = smov 0   ;;  %s1697_s19 = smov 0  }
   0xc   :  { %s1699_s20 = smov 0   ;;  %s1701_s21 = smov 0  }
   0xd   :  { %s1703_s22 = smov 0   ;;  %s1705_s23 = smov 0  }
   0xe LB: > { %2136 = sst [smem:[#allocation18_spill]] %s1622_s18  ;;  %s1726_s24 = sadd.s32 4294967295, %s1642_s23   ;;  %s1642_s23 = sphi %s1705_s23, %s31_s23   ;;  %s1638_s22 = sphi %s1703_s22, %s2168_s22   ;;  %s1634_s21 = sphi %s1701_s21, %s2167_s21   ;;  %s1630_s20 = sphi %s1699_s20, %s2163_s20   ;;  %s1626_s19 = sphi %s1697_s19, %s2166_s19   ;;  %s1622_s18 = sphi %s1695_s18, %s2165_s18  }
   0xf   : > { %2137 = sst [smem:[#allocation19_spill]] %s1630_s20  ;;  %s1162_s25 = sadd.s32 4294967294, %s1642_s23  }
  0x10   : > { %2138 = sst [smem:[#allocation20_spill]] %s1642_s23  ;;  %s50_s26 = sadd.s32 1, %s1638_s22 }
  0x11   : > { %s59_s27 = sadd.s32 1, %s1630_s20  ;;  %p52_p0 = scmp.ge.s32.totalorder %s50_s26, 2 }
  0x12   : > { %p66_p1 = scmp.ne.s32.totalorder %s1630_s20, %s1626_s19  ;;  %p67_p2 = scmp.eq.s32.totalorder %s1642_s23, 0 }
  0x13   : > { %p72_p3 = scmp.ne.s32.totalorder %s1626_s19, %s1622_s18  ;;  %s2170_s26 = smov (%p52_p0, %s50_s26), 0 }
  0x14   : > { %2139 = sst [smem:[#allocation21_spill]] %s2170_s26  ;;  %p1738_p4 = por %p67_p2, %p66_p1 }
  0x15   : > { %p73_p5 = scmp.eq.s32.totalorder %s1726_s24, 0  ;;  %s54_s29 = ssub.s32 %s1638_s22, %s2170_s26 }
  0x16   : > { %p178_p6 = scmp.eq.s32.totalorder %s1726_s24, 1  ;;  %p57_p7 = scmp.eq.s32.totalorder %s54_s29, 0 }
  0x17   : > { %p1746_p8 = por %p73_p5, %p72_p3  ;;  %p184_p10 = scmp.eq.s32.totalorder %s1162_s25, 1 }
  0x18   : > { %p1750_p9 = por %p178_p6, %p66_p1  ;;  %p1309_p13 = scmp.lt.s32.totalorder %s1642_s23, 2 }
  0x19   : > { %s2141_s30 = scalar_select %p1746_p8, 1, 0 }
  0x1a   : > { %s2142_s6 = scalar_select %p1750_p9, 1, 0 }
  0x1b   : > { %s1755_s7 = scalar_select %p57_p7, %s1630_s20, %s59_s27  }
  0x1c   : > { %p1757_p11 = por %p184_p10, %p72_p3  ;;  %s1764_s9 = sand.u32 1, %s1630_s20  }
  0x1d   : > { %2143 = sst [smem:[#allocation22_spill]] %s1755_s7  ;;  %s1767_s10 = sshll.u32 %s1764_s9, 2 }
  0x1e   : > { %s2144_s8 = scalar_select %p1757_p11, 1, 0 }
  0x1f   : > { %s1770_s11 = sshll.u32 %s1638_s22, 6  ;;  %p1774_p0 = pnand %p1309_p13, %p1738_p4 }
  0x20   : > { %2145 = sst [smem:[#allocation23_spill]] %s2144_s8  ;;  %s253_s13 = sand.u32 1, %s1642_s23  }
  0x21   : > { %s2146_s12 = scalar_select %p1774_p0, 1, 0 }
  0x22   : > { %s2147_s1 = sld [smem:[#allocation24_spill]]  ;;  %s257_s17 = scalar_lea.vmem [#allocation5], %s1767_s10 }
  0x23   : > { %s264_s25 = sshll.u32 %s257_s17, 4  ;;  %s1790_s27 = scalar_lea.sflag [#allocation6], %s253_s13  ;;  %s1787_s25 = int_to_ptr.vmem [resolvable:$true] %s264_s25 }
  0x24   : > { %p1796_p4 = pneg %p1774_p0 }
  0x28   : > { %s1783_s16 = scalar_lea.hbm %s2147_s1, %s1770_s11  ;;  %s1405_s17 = scalar_lea.hbm %s2147_s1, 128 }
  0x29   : > { %s1400_s28 = scalar_lea.hbm %s1783_s16, 64  ;;  %p1406_p7 = scmp.lt.u32.totalorder %s1783_s16, %s2147_s1 }
  0x2a   : > { %p1401_p3 = scmp.ne.s32.totalorder %s1783_s16, %s1400_s28  ;;  %p1407_p10 = scmp.lt.u32.totalorder %s1405_s17, %s1400_s28 }
  0x2b   : > { %p1409_p12 = scmp.lt.u32.totalorder %s1400_s28, %s1783_s16 }
  0x2c   : > { %p1403_p5 = pnand %p1796_p4, %p1401_p3  ;;  %p1408_p13 = por %p1407_p10, %p1406_p7 }
  0x2e   : > { %p1404_p6 = pneg %p1403_p5  ;;  %p1410_p1 = por %p1409_p12, %p1408_p13 }
  0x30   : > { %p1411_p2 = pnand %p1410_p1, %p1404_p6 }
  0x32   : > { %1414 = shalt.err (!%p1411_p2)
}
  0x33   : > { %s1415_s13 = scalar_lea.vmem %s1787_s25, 64  ;;  %s1644_s14 = smov [#allocation5]  }
  0x34   : > { %p1416_p3 = scmp.ne.s32.totalorder %s1787_s25, %s1415_s13  ;;  %s1420_s15 = sshll.u32 %s1644_s14, 4  ;;  %s1421_s15 = int_to_ptr.vmem [resolvable:$false] %s1420_s15 }
  0x35   : > { %s1422_s26 = scalar_lea.vmem %s1421_s15, 128  ;;  %p1423_p9 = scmp.lt.s32.totalorder %s1787_s25, %s1421_s15 }
  0x36   : > { %p1418_p5 = pnand %p1416_p3, %p1796_p4  ;;  %p1424_p8 = scmp.lt.s32.totalorder %s1422_s26, %s1415_s13 }
  0x38   : > { %p1419_p11 = pneg %p1418_p5  ;;  %p1425_p7 = por %p1424_p8, %p1423_p9 }
  0x3a   : > { %p1426_p10 = pnand %p1425_p7, %p1419_p11 }
  0x3c   : > { %1429 = shalt.err (!%p1426_p10)
}
  0x3d   : > { %1295 = dma.hbm_to_vmem [thread:$0]  (!%p1774_p0), %s1783_s16, 64, %s1787_s25, %s1790_s27  }
  0x3e   : > { %p2149_p12 = scmp.lt.s32.totalorder %s1642_s23, 3  ;;  %p2150_p1 = scmp.ge.s32.totalorder %s1642_s23, 1 }
  0x3f   : > { %s1832_s13 = scalar_lea.hbm %s2119_s0, %s1770_s11  ;;  %s238_s14 = scalar_lea.vmem [#allocation2], %s1767_s10 }
  0x40   : > { %p1824_p2 = pnand %p2150_p1, %p2149_p12  ;;  %s246_s15 = sshll.u32 %s238_s14, 4  ;;  %s1835_s15 = int_to_ptr.vmem [resolvable:$true] %s246_s15 }
  0x41   : > { %s1841_s26 = scalar_lea.hbm %s2121_s2, %s1770_s11  ;;  %s235_s1 = scalar_lea.sflag [#allocation3], %s1764_s9 }
  0x42   : > { %s2151_s7 = scalar_select %p1824_p2, 1, 0 }
  0x43   : > { %s1430_s20 = scalar_lea.hbm %s1832_s13, 64  ;;  %s1435_s23 = scalar_lea.hbm %s2119_s0, 128 }
  0x44   : > { %p1431_p8 = scmp.ne.s32.totalorder %s1832_s13, %s1430_s20  ;;  %p1436_p6 = scmp.lt.u32.totalorder %s1832_s13, %s2119_s0 }
  0x45   : > { %p1437_p13 = scmp.lt.u32.totalorder %s1435_s23, %s1430_s20  ;;  %p1439_p5 = scmp.lt.u32.totalorder %s1430_s20, %s1832_s13 }
  0x46   : > { %p1433_p9 = pnand %p1431_p8, %p1796_p4 }
  0x47   : > { %p1438_p3 = por %p1437_p13, %p1436_p6 }
  0x48   : > { %p1434_p11 = pneg %p1433_p9 }
  0x49   : > { %p1440_p7 = por %p1439_p5, %p1438_p3 }
  0x4b   : > { %p1441_p10 = pnand %p1440_p7, %p1434_p11 }
  0x4d   : > { %1444 = shalt.err (!%p1441_p10)
}
  0x4e   : > { %s1445_s11 = scalar_lea.vmem %s1835_s15, 64  ;;  %s1645_s14 = smov [#allocation2]  }
  0x4f   : > { %p1446_p12 = scmp.ne.s32.totalorder %s1835_s15, %s1445_s11  ;;  %s1450_s16 = sshll.u32 %s1645_s14, 4  ;;  %s1451_s16 = int_to_ptr.vmem [resolvable:$false] %s1450_s16 }
  0x50   : > { %s1452_s18 = scalar_lea.vmem %s1451_s16, 128  ;;  %p1453_p9 = scmp.lt.s32.totalorder %s1835_s15, %s1451_s16 }
  0x51   : > { %p1448_p1 = pnand %p1446_p12, %p1796_p4  ;;  %p1454_p2 = scmp.lt.s32.totalorder %s1452_s18, %s1445_s11 }
  0x53   : > { %p1449_p8 = pneg %p1448_p1  ;;  %p1455_p6 = por %p1454_p2, %p1453_p9 }
  0x55   : > { %p1456_p13 = pnand %p1455_p6, %p1449_p8 }
  0x57   : > { %1459 = shalt.err (!%p1456_p13)
}
  0x58   : > { %1292 = dma.hbm_to_vmem [thread:$0]  (!%p1774_p0), %s1832_s13, 64, %s1835_s15, %s235_s1  }
  0x59   : > { %s275_s20 = scalar_lea.vmem [#allocation7], %s1767_s10  ;;  %s1460_s8 = scalar_lea.hbm %s1841_s26, 64 }
  0x5a   : > { %s282_s23 = sshll.u32 %s275_s20, 4  ;;  %p1461_p11 = scmp.ne.s32.totalorder %s1841_s26, %s1460_s8  ;;  %s283_s23 = int_to_ptr.vmem [resolvable:$true] %s282_s23 }
  0x5b   : > { %s1465_s17 = scalar_lea.hbm %s2121_s2, 128  ;;  %p1466_p5 = scmp.lt.u32.totalorder %s1841_s26, %s2121_s2 }
  0x5c   : > { %p1463_p2 = pnand %p1461_p11, %p1796_p4  ;;  %p1467_p7 = scmp.lt.u32.totalorder %s1465_s17, %s1460_s8 }
  0x5d   : > { %p1469_p12 = scmp.lt.u32.totalorder %s1460_s8, %s1841_s26 }
  0x5e   : > { %p1464_p3 = pneg %p1463_p2  ;;  %p1468_p10 = por %p1467_p7, %p1466_p5 }
  0x60   : > { %p1470_p1 = por %p1469_p12, %p1468_p10 }
  0x62   : > { %p1471_p8 = pnand %p1470_p1, %p1464_p3 }
  0x64   : > { %1474 = shalt.err (!%p1471_p8)
}
  0x65   : > { %s1475_s1 = scalar_lea.vmem %s283_s23, 64  ;;  %s1646_s10 = smov [#allocation7]  }
  0x66   : > { %p1476_p9 = scmp.ne.s32.totalorder %s283_s23, %s1475_s1  ;;  %s1480_s13 = sshll.u32 %s1646_s10, 4  ;;  %s1481_s13 = int_to_ptr.vmem [resolvable:$false] %s1480_s13 }
  0x67   : > { %s1482_s15 = scalar_lea.vmem %s1481_s13, 128  ;;  %p1483_p11 = scmp.lt.s32.totalorder %s283_s23, %s1481_s13 }
  0x68   : > { %p1478_p6 = pnand %p1476_p9, %p1796_p4  ;;  %p1484_p2 = scmp.lt.s32.totalorder %s1482_s15, %s1475_s1 }
  0x6a   : > { %p1479_p13 = pneg %p1478_p6  ;;  %p1485_p0 = por %p1484_p2, %p1483_p11 }
  0x6c   : > { %p1486_p5 = pnand %p1485_p0, %p1479_p13 }
  0x6e   : > { %1489 = shalt.err (!%p1486_p5)
}
  0x6f   : > { %p2152_p7 = scmp.ne.s32.totalorder %s2146_s12, 0  ;;  %s1171_s16 = sshll.u32 %s1638_s22, 4 }
  0x70   : > { %s292_s18 = scalar_lea.vmem [#allocation8], %s1764_s9  ;;  %s1889_s28 = scalar_lea.hbm %s2122_s3, %s1171_s16 }
  0x71   : > { %1298 = dma.hbm_to_vmem [thread:$0]  (!%p2152_p7), %s1841_s26, 64, %s283_s23, %s1790_s27  }
  0x72   : > { %s299_s20 = sshll.u32 %s292_s18, 4  ;;  %s290_s17 = scalar_lea.sflag [#allocation9], %s1764_s9  ;;  %s300_s20 = int_to_ptr.vmem [resolvable:$true] %s299_s20 }
  0x73   : > { %s1490_s11 = scalar_lea.hbm %s1889_s28, 16  ;;  %s1495_s23 = scalar_lea.hbm %s2122_s3, 32 }
  0x74   : > { %p1491_p0 = scmp.ne.s32.totalorder %s1889_s28, %s1490_s11  ;;  %p1496_p12 = scmp.lt.u32.totalorder %s1889_s28, %s2122_s3 }
  0x75   : > { %p1497_p1 = scmp.lt.u32.totalorder %s1495_s23, %s1490_s11  ;;  %p1499_p9 = scmp.lt.u32.totalorder %s1490_s11, %s1889_s28 }
  0x76   : > { %p1493_p3 = pnand %p1491_p0, %p1796_p4 }
  0x77   : > { %p1498_p8 = por %p1497_p1, %p1496_p12 }
  0x78   : > { %p1494_p10 = pneg %p1493_p3 }
  0x79   : > { %p1500_p6 = por %p1499_p9, %p1498_p8 }
  0x7b   : > { %p1501_p13 = pnand %p1500_p6, %p1494_p10 }
  0x7d   : > { %1504 = shalt.err (!%p1501_p13)
}
  0x7e   : > { %s1505_s9 = scalar_lea.vmem %s300_s20, 16  ;;  %s1647_s10 = smov [#allocation8]  }
  0x7f   : > { %p1506_p11 = scmp.ne.s32.totalorder %s300_s20, %s1505_s9  ;;  %s1510_s13 = sshll.u32 %s1647_s10, 4  ;;  %s1511_s13 = int_to_ptr.vmem [resolvable:$false] %s1510_s13 }
  0x80   : > { %s1512_s15 = scalar_lea.vmem %s1511_s13, 32  ;;  %p1513_p0 = scmp.lt.s32.totalorder %s300_s20, %s1511_s13 }
  0x81   : > { %p1508_p2 = pnand %p1506_p11, %p1796_p4  ;;  %p1514_p3 = scmp.lt.s32.totalorder %s1512_s15, %s1505_s9 }
  0x83   : > { %p1509_p5 = pneg %p1508_p2  ;;  %p1515_p7 = por %p1514_p3, %p1513_p0 }
  0x85   : > { %p1516_p1 = pnand %p1515_p7, %p1509_p5 }
  0x87   : > { %1519 = shalt.err (!%p1516_p1)
}
  0x88   : > { %p2153_p12 = scmp.ne.s32.totalorder %s2146_s12, 0  ;;  %p2154_p10 = scmp.ne.s32.totalorder %s2151_s7, 0 }
  0x89   : > { %s1912_s29 = sand.u32 (!%p2154_p10), 1, %s1626_s19   ;;  %p2155_p4 = scmp.ne.s32.totalorder (!%p2154_p10), %s2141_s30, 0 }
  0x8a   : > { %1301 = dma.hbm_to_vmem [thread:$0]  (!%p2153_p12), %s1889_s28, 16, %s300_s20, %s290_s17  }
  0x8b   : > { %308 = sbr.rel (%p2154_p10) target bundleno = 1611 (0x64b), region = 36  ;;  %s1915_s16 = sshll.u32 (!%p2154_p10), %s1912_s29, 2 }
  0x8c   : > { %s311_s18 = scalar_lea.sflag (!%p2154_p10), [#allocation3], %s1912_s29  ;;  %s1919_s8 = scalar_lea.vmem (!%p2154_p10), [#allocation2], %s1915_s16 }
  0x92   : > { %1601 = dma.done.wait (%p2155_p4), %s311_s18, 64  }
  0x93   : > { %1603 = vsyncadd (%p2155_p4), %s311_s18, 4294967232  ;;  %s319_s12 = sand.u32 1, %s1726_s24   ;;  %s1927_s20 = scalar_lea.vmem [#allocation5], %s1915_s16 }
  0x94   : > { %s320_s7 = scalar_lea.sflag [#allocation6], %s319_s12 }
  0x95   : > { %1605 = dma.done.wait (%p2155_p4), %s320_s7, 128  }
  0x96   : > { %1607 = vsyncadd (%p2155_p4), %s320_s7, 4294967168  ;;  %s1934_s25 = scalar_lea.vmem [#allocation7], %s1915_s16  ;;  %s338_s28 = scalar_lea.sflag [#allocation9], %s1912_s29 }
  0x97   : > { %s340_s17 = scalar_lea.vmem [#allocation8], %s1912_s29 }
  0x98   : > { %1609 = dma.done.wait (%p2155_p4), %s338_s28, 16  }
  0x99   : > { %1611 = vsyncadd (%p2155_p4), %s338_s28, 4294967280  ;;  %v1648_v0 = vmov 0.0   ;;  %vm1649_vm0 = vmmov 0   ;;  %vm395_vm1 = vcmask 64512   ;;  %v393_v1 = vld [vmem:[%s1927_s20] sm:$0xf]  ;;  %v447_v7 = vlaneseq }
  0x9a   : > { %1229 = vmatprep.subr.bf16.mxu0 %v1648_v0  ;;  %1231 = vmatprep.mubr.msk.bf16.mxu0 %vm1649_vm0, %v1648_v0  ;;  %v400_v2 = vsel %vm395_vm1, %v393_v1, 0  ;;  %v392_v3 = vld [vmem:[%s1919_s8] sm:$0xf]  ;;  %v1650_v5 = vmov 0   ;;  %v1374_v20 = vld [vmem:[%s1934_s25] ss:$0 sps:$4 sm:$0xff]  }
  0x9b   : > { %1235 = vmatprep.subr.bf16.mxu1 %v1648_v0  ;;  %1237 = vmatprep.mubr.msk.bf16.mxu1 %vm1649_vm0, %v1648_v0  ;;  %v390_v4 = vld [vmem:[%s340_s17] sm:$0x1]  ;;  %v448_v9 = vshrl.u32 %v447_v7, 7  ;;  %s1651_s24 = smov 96   ;;  %v1375_v21 = vld [vmem:[%s1927_s20] ss:$0 sps:$4 sm:$0xff]  }
  0x9c   : > { %1230 = vmatpush3.bf16.xpose.msra.mxu0 %v400_v2  ;;  %vm391_vm2 = vcmp.gt.bf16.partialorder %v390_v4, 0  ;;  %473 = vrot.lane.b32.xlu1 %v1374_v20, %s1651_s24  ;;  %s1652_s30 = smov 120   ;;  %v1376_v22 = vld [vmem:[%s1927_s20] ss:$0 sps:$4 sm:$0xff]   ;;  %s1653_s11 = smov 112   ;;  %vm478_vm5 = vcmask 1043456  }
  0x9d   : > { %1247 = vmatprep.subr.bf16.mxu0 %v1648_v0  ;;  %v443_v6 = vsel %vm391_vm2, 65537, %v1650_v5  ;;  %v449_v10 = vsub.s32 0, %v448_v9  ;;  %v1378_v23 = vld [vmem:[%s1919_s8] ss:$0 sps:$4 sm:$0xff]   ;;  %v1379_v24 = vld [vmem:[%s1927_s20] ss:$0 sps:$4 sm:$0xff]  }
  0x9e   : > { %v444_v8 = vunpack.c.l.b16 %v443_v6  ;;  %s1654_s27 = smov 104   ;;  %v1380_v25 = vld [vmem:[%s1919_s8] ss:$0 sps:$4 sm:$0xff]   ;;  %s1177_s26 = sshll.u32 %s1912_s29, 4  ;;  %vm468_vm6 = vcmask 60416  }
  0x9f   : > { %v1377_v35 = vld [vmem:[%s1919_s8] ss:$0 sps:$4 sm:$0xff]   ;;  %s1974_s23 = scalar_lea.vmem [#allocation11], %s1177_s26  ;;  %s1992_s14 = scalar_lea.vmem [#allocation10], %s1915_s16 }
  0xa0   : > { %vm445_vm3 = vcmp.ne.s32.totalorder %v444_v8, 0  ;;  %535 = vrot.lane.b32.xlu1 %v1375_v21, %s1652_s30  ;;  %s1655_s1 = smov 88   ;;  %s1656_s9 = smov 72  }
  0xa1   : > { %v446_v11 = vsel %vm445_vm3, 1, %v1650_v5  ;;  %s1657_s10 = smov 80   ;;  %s1658_s13 = smov 8  }
  0xa2   : > { %v1955_v12 = vrot.slane %v446_v11, %v449_v10  ;;  %s1212_s15 = sshll.u32 %s1634_s21, 8  ;;  %s975_s16 = sshll.u32 %s1974_s23, 4  ;;  %s2036_s16 = int_to_ptr.vmem [resolvable:$true] %s975_s16 }
  0xa3   : > { %1232 = vmatmul.mubr.msk.bf16.vlgmr.msra.gmra.mrb[0].mxu0 %vm395_vm1, %v392_v3  ;;  %s2034_s12 = scalar_lea.hbm %s2124_s5, %s1212_s15  ;;  %s1659_s7 = smov 16  }
  0xa4   : > { %1249 = vmatprep.mubr.msk.bf16.mxu0 %vm1649_vm0, %v1648_v0  ;;  %vm451_vm4 = vcmp.eq.s32.totalorder %v1955_v12, 1  ;;  %673 = vrot.lane.b32.xlu1 %v1376_v22, %s1653_s11  ;;  %s944_s20 = scalar_lea.sflag [#allocation12], %s1912_s29  ;;  %p2156_p8 = scmp.ne.s32.totalorder %s2142_s6, 0 }
  0xa5   : > { %s1660_s28 = smov [#allocation11]  }
  0xa6   : > { %s1524_s17 = sshll.u32 %s1660_s28, 4  ;;  %s1525_s17 = int_to_ptr.vmem [resolvable:$false] %s1524_s17 }
  0xa7   : > { %s1526_s24 = scalar_lea.vmem %s1525_s17, 512  ;;  %p1527_p13 = scmp.lt.s32.totalorder %s2036_s16, %s1525_s17 }
  0xa8   : > { %668 = vrot.lane.b32.xlu1 %v1378_v23, %s1653_s11 }
  0xac   : > { %811 = vrot.lane.b32.xlu1 %v1379_v24, %s1654_s27 }
  0xb0   : > { %806 = vrot.lane.b32.xlu1 %v1380_v25, %s1654_s27 }
 0x10e   : > { %v474_v33 = vpop.permute.xlu1 %473 }
 0x10f   : > { %v480_v34 = vsel %vm478_vm5, %v474_v33, 0 }
 0x110   : > { %1236 = vmatpush3.bf16.msra.mxu1 %v480_v34 }
 0x111   : > { %1241 = vmatprep.subr.bf16.mxu1 %v1648_v0 }
 0x112   : > { %v536_v38 = vpop.permute.xlu1 %535 }
 0x113   : > { %v541_v40 = vsel %vm395_vm1, %v536_v38, 0 }
 0x116   : > { %v674_v42 = vpop.permute.xlu1 %673 }
 0x117   : > { %v679_v45 = vsel %vm395_vm1, %v674_v42, 0 }
 0x11a   : > { %v669_v44 = vpop.permute.xlu1 %668 }
 0x11e   : > { %v812_v46 = vpop.permute.xlu1 %811 }
 0x11f   : > { %v817_v47 = vsel %vm395_vm1, %v812_v46, 0 }
 0x122   : > { %v807_v48 = vpop.permute.xlu1 %806 }
 0x176   : > { %v436_v13 = vpop.f32.mrb[0].mxu0 }
 0x177   : > { %v442_v14 = vmul.f32 0.35355338, %v436_v13  ;;  %v1233_v15 = vpop.f32.mrb[1].mxu0  ;;  %v1381_v13 = vld [vmem:[%s1934_s25] ss:$0 sps:$4 sm:$0xff]  }
 0x178   : > { %v439_v16 = vpop.f32.mrb[2].mxu0 }
 0x179   : > { %v1234_v17 = vpop.f32.mrb[3].mxu0  ;;  %v452_v18 = vsel %vm451_vm4, %v442_v14, -1e+30 }
 0x17a   : > { %v453_v19 = vsel %vm395_vm1, %v452_v18, -inf }
 0x17b   : > { %454 = vmax.xlane.f32.xlu0 %v453_v19 }
 0x208   : > { %v455_v26 = vpop.xlane.xlu0 %454 }
 0x209   : > { %v456_v27 = vsub.f32 %v452_v18, %v455_v26 }
 0x20b   : > { %v457_v28 = vpack.c.bf16 %v456_v27, %v456_v27 }
 0x20d   : > { %v459_v29 = vmul.bf16 1069105081, %v457_v28 }
 0x20f   : > { %1384 = vpow.bf16 %v459_v29 }
 0x21a   : > { %v1385_v30 = vpop.eup %1384 }
 0x21b   : > { %v461_v31 = vunpack.c.l.bf16 %v1385_v30 }
 0x21d   : > { %v462_v32 = vsel %vm395_vm1, %v461_v31, 0.0 }
 0x21e   : > { %463 = vadd.xlane.f32.xlu0 %v462_v32 }
 0x234   : > { %530 = vrot.lane.b32.xlu0 %v1377_v35, %s1652_s30 }
 0x2ab   : > { %v464_v36 = vpop.xlane.xlu0 %463 }
 0x2ac   : > { %1386 = vrcp.f32 %v464_v36  ;;  %v1383_v36 = vld [vmem:[%s1934_s25] ss:$0 sps:$4 sm:$0xff]  }
 0x2af   : > { %v531_v43 = vpop.permute.xlu0 %530 }
 0x2b6   : > { %v1387_v37 = vpop.eup %1386 }
 0x2b7   : > { %v466_v39 = vmul.f32 %v1387_v37, %v461_v31  ;;  %v1382_v37 = vld [vmem:[%s1934_s25] ss:$0 sps:$4 sm:$0xff]   ;;  %s1520_s25 = scalar_lea.vmem %s2036_s16, 256 }
 0x2b8   : > { %p1521_p7 = scmp.ne.s32.totalorder %s2036_s16, %s1520_s25  ;;  %p1528_p11 = scmp.lt.s32.totalorder %s1526_s24, %s1520_s25 }
 0x2b9   : > { %v467_v41 = vpack.c.bf16 %v466_v39, %v466_v39 }
 0x2ba   : > { %p1522_p9 = pnand %p1521_p7, %p2156_p8  ;;  %p1529_p2 = por %p1528_p11, %p1527_p13 }
 0x2bb   : > { %1238 = vmatmul.mubr.msk.bf16.vlgmr.msra.gmra.mrb[0].mxu1 %vm395_vm1, %v467_v41  ;;  %469 = vst.msk [vmem:[%s1974_s23] sm:$0xf] %vm468_vm6, %v467_v41 }
 0x2bc   : > { %1242 = vmatpush3.bf16.xpose.msra.mxu1 %v541_v40  ;;  %1243 = vmatprep.mubr.msk.bf16.mxu1 %vm1649_vm0, %v1648_v0  ;;  %p1523_p6 = pneg %p1522_p9 }
 0x2bd   : > { %1253 = vmatprep.subr.bf16.mxu1 %v1648_v0 }
 0x2be   : > { %p1530_p5 = pnand %p1529_p2, %p1523_p6 }
 0x2c3   : > { %1244 = vmatmul.mubr.msk.bf16.vlgmr.msra.gmra.mrb[4].mxu1 %vm395_vm1, %v531_v43 }
 0x2c4   : > { %1254 = vmatpush3.bf16.xpose.msra.mxu1 %v679_v45  ;;  %1255 = vmatprep.mubr.msk.bf16.mxu1 %vm1649_vm0, %v1648_v0 }
 0x2c5   : > { %1265 = vmatprep.subr.bf16.mxu1 %v1648_v0 }
 0x2cb   : > { %1256 = vmatmul.mubr.msk.bf16.vlgmr.msra.gmra.mrb[8].mxu1 %vm395_vm1, %v669_v44 }
 0x2cc   : > { %1266 = vmatpush3.bf16.xpose.msra.mxu1 %v817_v47  ;;  %1267 = vmatprep.mubr.msk.bf16.mxu1 %vm1649_vm0, %v1648_v0 }
 0x2d3   : > { %1268 = vmatmul.mubr.msk.bf16.vlgmr.msra.gmra.mrb[12].mxu1 %vm395_vm1, %v807_v48 }
 0x38e   : > { %v516_v49 = vpop.f32.mrb[0].mxu1 }
 0x38f   : > { %v522_v50 = vpack.c.bf16 %v516_v49, %v516_v49  ;;  %v1239_v51 = vpop.f32.mrb[1].mxu1 }
 0x390   : > { %v519_v52 = vpop.f32.mrb[2].mxu1 }
 0x391   : > { %523 = vst.msk [vmem:[%s1992_s14] sm:$0xf] %vm468_vm6, %v522_v50  ;;  %v1240_v53 = vpop.f32.mrb[3].mxu1 }
 0x396   : > { %v577_v54 = vpop.f32.mrb[4].mxu1 }
 0x397   : > { %v583_v55 = vmul.f32 0.35355338, %v577_v54  ;;  %v1245_v56 = vpop.f32.mrb[5].mxu1 }
 0x398   : > { %v580_v57 = vpop.f32.mrb[6].mxu1 }
 0x399   : > { %v1246_v58 = vpop.f32.mrb[7].mxu1  ;;  %v584_v59 = vsel %vm451_vm4, %v583_v55, -1e+30 }
 0x39a   : > { %v585_v60 = vsel %vm395_vm1, %v584_v59, -inf }
 0x39b   : > { %586 = vmax.xlane.f32.xlu1 %v585_v60 }
 0x39e   : > { %v715_v61 = vpop.f32.mrb[8].mxu1 }
 0x39f   : > { %v721_v62 = vmul.f32 0.35355338, %v715_v61  ;;  %v1257_v63 = vpop.f32.mrb[9].mxu1 }
 0x3a0   : > { %v718_v1 = vpop.f32.mrb[10].mxu1 }
 0x3a1   : > { %v1258_v2 = vpop.f32.mrb[11].mxu1  ;;  %v722_v3 = vsel %vm451_vm4, %v721_v62, -1e+30 }
 0x3a2   : > { %v723_v4 = vsel %vm395_vm1, %v722_v3, -inf }
 0x3a3   : > { %724 = vmax.xlane.f32.xlu0 %v723_v4 }
 0x3a6   : > { %v853_v5 = vpop.f32.mrb[12].mxu1 }
 0x3a7   : > { %v859_v6 = vmul.f32 0.35355338, %v853_v5  ;;  %v1269_v7 = vpop.f32.mrb[13].mxu1 }
 0x3a8   : > { %v856_v8 = vpop.f32.mrb[14].mxu1 }
 0x3a9   : > { %v1270_v9 = vpop.f32.mrb[15].mxu1  ;;  %v860_v10 = vsel %vm451_vm4, %v859_v6, -1e+30 }
 0x3aa   : > { %v861_v11 = vsel %vm395_vm1, %v860_v10, -inf }
 0x3ab   : > { %862 = vmax.xlane.f32.xlu1 %v861_v11 }
 0x3bc   : > { %605 = vrot.lane.b32.xlu1 %v1381_v13, %s1655_s1 }
 0x428   : > { %v587_v14 = vpop.xlane.xlu1 %586 }
 0x429   : > { %v588_v15 = vsub.f32 %v584_v59, %v587_v14 }
 0x42b   : > { %v589_v16 = vpack.c.bf16 %v588_v15, %v588_v15 }
 0x42d   : > { %v591_v17 = vmul.bf16 1069105081, %v589_v16 }
 0x42f   : > { %1388 = vpow.bf16 %v591_v17 }
 0x430   : > { %v725_v18 = vpop.xlane.xlu0 %724 }
 0x431   : > { %v726_v19 = vsub.f32 %v722_v3, %v725_v18 }
 0x433   : > { %v727_v20 = vpack.c.bf16 %v726_v19, %v726_v19 }
 0x435   : > { %v729_v21 = vmul.bf16 1069105081, %v727_v20 }
 0x437   : > { %1390 = vpow.bf16 %v729_v21 }
 0x438   : > { %v863_v22 = vpop.xlane.xlu1 %862 }
 0x439   : > { %v864_v23 = vsub.f32 %v860_v10, %v863_v22 }
 0x43a   : > { %v1389_v12 = vpop.eup %1388 }
 0x43b   : > { %v865_v24 = vpack.c.bf16 %v864_v23, %v864_v23  ;;  %v593_v25 = vunpack.c.l.bf16 %v1389_v12 }
 0x43c   : > { %v606_v26 = vpop.permute.xlu1 %605 }
 0x43d   : > { %v867_v27 = vmul.bf16 1069105081, %v865_v24  ;;  %v594_v28 = vsel %vm395_vm1, %v593_v25, 0.0  ;;  %v611_v29 = vsel %vm478_vm5, %v606_v26, 0 }
 0x43e   : > { %595 = vadd.xlane.f32.xlu0 %v594_v28  ;;  %1248 = vmatpush3.bf16.msra.mxu0 %v611_v29 }
 0x43f   : > { %1392 = vpow.bf16 %v867_v27  ;;  %1259 = vmatprep.subr.bf16.mxu0 %v1648_v0 }
 0x442   : > { %v1391_v30 = vpop.eup %1390 }
 0x443   : > { %v731_v31 = vunpack.c.l.bf16 %v1391_v30 }
 0x445   : > { %v732_v32 = vsel %vm395_vm1, %v731_v31, 0.0 }
 0x446   : > { %733 = vadd.xlane.f32.xlu1 %v732_v32 }
 0x44a   : > { %v1393_v33 = vpop.eup %1392 }
 0x44b   : > { %v869_v34 = vunpack.c.l.bf16 %v1393_v33 }
 0x44d   : > { %v870_v35 = vsel %vm395_vm1, %v869_v34, 0.0 }
 0x44e   : > { %871 = vadd.xlane.f32.xlu0 %v870_v35 }
 0x457   : > { %881 = vrot.lane.b32.xlu1 %v1383_v36, %s1656_s9 }
 0x464   : > { %743 = vrot.lane.b32.xlu0 %v1382_v37, %s1657_s10 }
 0x4cb   : > { %v596_v38 = vpop.xlane.xlu0 %595 }
 0x4cc   : > { %1394 = vrcp.f32 %v596_v38 }
 0x4d3   : > { %v734_v39 = vpop.xlane.xlu1 %733 }
 0x4d4   : > { %1396 = vrcp.f32 %v734_v39 }
 0x4d6   : > { %v1395_v40 = vpop.eup %1394 }
 0x4d7   : > { %v598_v41 = vmul.f32 %v1395_v40, %v593_v25  ;;  %v882_v47 = vpop.permute.xlu1 %881 }
 0x4d8   : > { %v887_v50 = vsel %vm478_vm5, %v882_v47, 0 }
 0x4d9   : > { %v599_v42 = vpack.c.bf16 %v598_v41, %v598_v41 }
 0x4db   : > { %v872_v43 = vpop.xlane.xlu0 %871  ;;  %1184 = vst.msk [vmem:[%s1974_s23 + $0x4] sm:$0xf] %vm468_vm6, %v599_v42  ;;  %1250 = vmatmul.mubr.msk.bf16.vlgmr.msra.gmra.mrb[4].mxu0 %vm395_vm1, %v599_v42 }
 0x4dc   : > { %1398 = vrcp.f32 %v872_v43  ;;  %1261 = vmatprep.mubr.msk.bf16.mxu0 %vm1649_vm0, %v1648_v0 }
 0x4de   : > { %v1397_v44 = vpop.eup %1396 }
 0x4df   : > { %v736_v45 = vmul.f32 %v1397_v44, %v731_v31  ;;  %v744_v46 = vpop.permute.xlu0 %743 }
 0x4e0   : > { %v749_v48 = vsel %vm478_vm5, %v744_v46, 0 }
 0x4e1   : > { %1260 = vmatpush3.bf16.msra.mxu0 %v749_v48  ;;  %v737_v49 = vpack.c.bf16 %v736_v45, %v736_v45 }
 0x4e2   : > { %1271 = vmatprep.subr.bf16.mxu0 %v1648_v0 }
 0x4e3   : > { %1191 = vst.msk [vmem:[%s1974_s23 + $0x8] sm:$0xf] %vm468_vm6, %v737_v49 }
 0x4e4   : > { %1262 = vmatmul.mubr.msk.bf16.vlgmr.msra.gmra.mrb[8].mxu0 %vm395_vm1, %v737_v49 }
 0x4e5   : > { %1272 = vmatpush3.bf16.msra.mxu0 %v887_v50  ;;  %1273 = vmatprep.mubr.msk.bf16.mxu0 %vm1649_vm0, %v1648_v0 }
 0x4e6   : > { %v1399_v51 = vpop.eup %1398 }
 0x4e7   : > { %v874_v52 = vmul.f32 %v1399_v51, %v869_v34 }
 0x4e9   : > { %v875_v53 = vpack.c.bf16 %v874_v52, %v874_v52 }
 0x4eb   : > { %1198 = vst.msk [vmem:[%s1974_s23 + $0xc] sm:$0xf] %vm468_vm6, %v875_v53 }
 0x4ec   : > { %1274 = vmatmul.mubr.msk.bf16.vlgmr.msra.gmra.mrb[12].mxu0 %vm395_vm1, %v875_v53 }
 0x5ae   : > { %v647_v54 = vpop.f32.mrb[4].mxu0 }
 0x5af   : > { %v1209_v55 = vpack.c.bf16 %v647_v54, %v647_v54  ;;  %v1251_v56 = vpop.f32.mrb[5].mxu0 }
 0x5b0   : > { %v650_v57 = vpop.f32.mrb[6].mxu0 }
 0x5b1   : > { %657 = vrot.lane.b32.xlu1 %v1209_v55, %s1658_s13  ;;  %v1252_v58 = vpop.f32.mrb[7].mxu0 }
 0x5b7   : > { %v785_v59 = vpop.f32.mrb[8].mxu0 }
 0x5b8   : > { %v1210_v0 = vpack.c.bf16 %v785_v59, %v785_v59  ;;  %v1263_v60 = vpop.f32.mrb[9].mxu0 }
 0x5b9   : > { %v788_v61 = vpop.f32.mrb[10].mxu0 }
 0x5ba   : > { %795 = vrot.lane.b32.xlu0 %v1210_v0, %s1659_s7  ;;  %v1264_v62 = vpop.f32.mrb[11].mxu0 }
 0x5bb   : > { %1533 = shalt.err (!%p1530_p5)
}
 0x5bc   : > { %s1534_s30 = scalar_lea.hbm %s2034_s12, 256  ;;  %s1538_s26 = scalar_lea.hbm %s2124_s5, 512 }
 0x5bd   : > { %p1535_p0 = scmp.ne.s32.totalorder %s2034_s12, %s1534_s30  ;;  %p1539_p12 = scmp.lt.u32.totalorder %s2034_s12, %s2124_s5 }
 0x5be   : > { %p1540_p10 = scmp.lt.u32.totalorder %s1538_s26, %s1534_s30  ;;  %p1542_p7 = scmp.lt.u32.totalorder %s1534_s30, %s2034_s12 }
 0x5bf   : > { %p1536_p3 = pnand %p1535_p0, %p2156_p8 }
 0x5c0   : > { %p1541_p4 = por %p1540_p10, %p1539_p12 }
 0x5c1   : > { %p1537_p1 = pneg %p1536_p3 }
 0x5c2   : > { %p1543_p9 = por %p1542_p7, %p1541_p4 }
 0x5c4   : > { %p1544_p6 = pnand %p1543_p9, %p1537_p1 }
 0x5c6   : > { %1547 = shalt.err (!%p1544_p6)
}
 0x5c7   : > { %s1661_s9 = smov 64   ;;  %s1662_s10 = smov 4   ;;  %v923_v63 = vpop.f32.mrb[12].mxu0  ;;  %vm660_vm7 = vcmask 126016   ;;  %vm798_vm8 = vcmask 191616   ;;  %vm936_vm9 = vcmask 257216  }
 0x5c8   : > { %1286 = dma.vmem_to_hbm [thread:$0]  (%p2156_p8), %s2036_s16, 256, %s2034_s12, %s944_s20, %s1661_s9, %s1661_s9, %s1662_s10   ;;  %v1211_v1 = vpack.c.bf16 %v923_v63, %v923_v63  ;;  %v1275_v2 = vpop.f32.mrb[13].mxu0 }
 0x5c9   : > { %v926_v3 = vpop.f32.mrb[14].mxu0  ;;  %s1663_s13 = smov 24   ;;  %s1204_s15 = sshll.u32 %s1634_s21, 6 }
 0x5ca   : > { %933 = vrot.lane.b32.xlu1 %v1211_v1, %s1663_s13  ;;  %v1276_v4 = vpop.f32.mrb[15].mxu0  ;;  %s959_s18 = sshll.u32 %s1992_s14, 4  ;;  %s2069_s12 = scalar_lea.hbm %s2123_s4, %s1204_s15  ;;  %s2071_s18 = int_to_ptr.vmem [resolvable:$true] %s959_s18 }
 0x5cb   : > { %s939_s7 = scalar_lea.sflag [#allocation4], %s1912_s29  ;;  %s1548_s20 = scalar_lea.vmem %s2071_s18, 64 }
 0x5cc   : > { %p1549_p13 = scmp.ne.s32.totalorder %s2071_s18, %s1548_s20  ;;  %s1664_s21 = smov [#allocation10]  }
 0x5cd   : > { %s1552_s25 = sshll.u32 %s1664_s21, 4  ;;  %s1553_s25 = int_to_ptr.vmem [resolvable:$false] %s1552_s25 }
 0x5ce   : > { %p1550_p11 = pnand %p1549_p13, %p2156_p8  ;;  %s1554_s28 = scalar_lea.vmem %s1553_s25, 128 }
 0x5cf   : > { %p1555_p5 = scmp.lt.s32.totalorder %s2071_s18, %s1553_s25  ;;  %p1556_p0 = scmp.lt.s32.totalorder %s1554_s28, %s1548_s20 }
 0x5d0   : > { %p1551_p2 = pneg %p1550_p11 }
 0x5d1   : > { %p1557_p3 = por %p1556_p0, %p1555_p5 }
 0x5d3   : > { %p1558_p1 = pnand %p1557_p3, %p1551_p2 }
 0x623   : > { %v658_v5 = vpop.permute.xlu1 %657 }
 0x624   : > { %661 = vst.msk [vmem:[%s1992_s14] sm:$0xf] %vm660_vm7, %v658_v5 }
 0x62c   : > { %v796_v6 = vpop.permute.xlu0 %795 }
 0x62d   : > { %799 = vst.msk [vmem:[%s1992_s14] sm:$0xf] %vm798_vm8, %v796_v6 }
 0x63c   : > { %v934_v7 = vpop.permute.xlu1 %933 }
 0x63d   : > { %937 = vst.msk [vmem:[%s1992_s14] sm:$0xf] %vm936_vm9, %v934_v7 }
 0x63e   : > { %1561 = shalt.err (!%p1558_p1)
}
 0x63f   : > { %s1562_s29 = scalar_lea.hbm %s2069_s12, 64  ;;  %s1566_s24 = scalar_lea.hbm %s2123_s4, 128 }
 0x640   : > { %p1563_p12 = scmp.ne.s32.totalorder %s2069_s12, %s1562_s29  ;;  %p1567_p7 = scmp.lt.u32.totalorder %s2069_s12, %s2123_s4 }
 0x641   : > { %p1568_p9 = scmp.lt.u32.totalorder %s1566_s24, %s1562_s29  ;;  %p1570_p13 = scmp.lt.u32.totalorder %s1562_s29, %s2069_s12 }
 0x642   : > { %p1564_p10 = pnand %p1563_p12, %p2156_p8 }
 0x643   : > { %p1569_p6 = por %p1568_p9, %p1567_p7 }
 0x644   : > { %p1565_p4 = pneg %p1564_p10 }
 0x645   : > { %p1571_p11 = por %p1570_p13, %p1569_p6 }
 0x647   : > { %p1572_p2 = pnand %p1571_p11, %p1565_p4 }
 0x649   : > { %1575 = shalt.err (!%p1572_p2)
}
 0x64a   : > { %1285 = dma.vmem_to_hbm [thread:$0]  (%p2156_p8), %s2071_s18, 64, %s2069_s12, %s939_s7  }
 0x64b PF: > { %s2157_s27 = sld [smem:[#allocation18_spill]]  ;;  %s2158_s26 = sld [smem:[#allocation23_spill]] }
 0x64c   : > { %s2159_s23 = sld [smem:[#allocation20_spill]] }
 0x651   : > { %s990_s1 = sand.u32 1, %s2157_s27   ;;  %p2160_p5 = scmp.ne.s32.totalorder %s2158_s26, 0 }
 0x652   : > { %p2161_p0 = scmp.ge.s32.totalorder %s2159_s23, 2  ;;  %s991_s9 = scalar_lea.sflag [#allocation4], %s990_s1 }
 0x654   : > { %p1303_p3 = pnand %p2161_p0, %p2160_p5 }
 0x656   : > { %1613 = dma.done.wait (!%p1303_p3), %s991_s9, 64  }
 0x657   : > { %1615 = vsyncadd (!%p1303_p3), %s991_s9, 4294967232  ;;  %s1000_s10 = scalar_lea.sflag [#allocation12], %s990_s1 }
 0x658   : > { %1617 = dma.done.wait (!%p1303_p3), %s1000_s10, 256  }
 0x659   : > { %1619 = vsyncadd (!%p1303_p3), %s1000_s10, 4294967040  ;;  %s31_s23 = sadd.s32 1, %s2159_s23   ;;  %s2162_s6 = sld [smem:[#allocation19_spill]] }
 0x65a   : > { %p28_p1 = scmp.ge.s32.totalorder %s31_s23, 4   ;;  %s2163_s20 = sld [smem:[#allocation22_spill]] }
 0x65b   : > { %s2164_s13 = sld [smem:[#allocation21_spill]]  ;;  %s2165_s18 = smov %s1626_s19 }
 0x65c   : > { %s2167_s21 = smov %s1638_s22  ;;  %30 = sbr.rel (!%p28_p1) target bundleno = 14 (0xe), region = 138 }
 0x65f   : > { %s2166_s19 = smov %s2162_s6 }
 0x661   : > { %s2168_s22 = smov %s2164_s13 }
 0x663   :  { %1005 = vsyncpa [#allocation3], 1 }
 0x664   :  { %1007 = vsyncpa [#allocation3 + $0x1], 1 }
 0x665   :  { %1008 = vsyncpa [#allocation6], 1 }
 0x666   :  { %1010 = vsyncpa [#allocation6 + $0x1], 1 }
 0x667   :  { %1011 = vsyncpa [#allocation9], 1 }
 0x668   :  { %1013 = vsyncpa [#allocation9 + $0x1], 1 }
 0x669   :  { %1014 = vsyncpa [#allocation4], 1 }
 0x66a   :  { %1016 = vsyncpa [#allocation4 + $0x1], 1 }
 0x66b   :  { %1017 = vsyncpa [#allocation12], 1 }
 0x66c   :  { %1019 = vsyncpa [#allocation12 + $0x1], 1 }

// kernel: decoder_forward.37
= control target key start
LH: loop header
LB: loop body
LE: loop exit
PB: predicated region body
PF: predicated region fallthrough
CT: control target
= control target key end

     0   :  { %9 = vsyncpa [#allocation4], 0  ;;  %s556_s0 = inlined_call_operand.hbm [shape: bf16[16,128], index: 0, kind: input, shape index: {}]   ;;  %s557_s1 = inlined_call_operand.hbm [shape: bf16[128,32], index: 1, kind: input, shape index: {}]   ;;  %s558_s2 = inlined_call_operand.hbm [shape: f32[1,32], index: 2, kind: input, shape index: {}]   ;;  %s559_s3 = inlined_call_operand.hbm [shape: bf16[16,32], index: 3, kind: input, shape index: {}]   ;;  %s560_s4 = inlined_call_operand.hbm [shape: bf16[16,32], index: 4, kind: output, shape index: {}]  }
   0x1   :  { %10 = vsyncpa [#allocation7], 0 }
   0x2   :  { %11 = vsyncpa [#allocation10], 0 }
   0x3   :  { %12 = vsyncpa [#allocation5], 0  ;;  %s432_s15 = smov [#allocation6]   ;;  %s433_s17 = smov [#allocation3]  }
   0x4   :  { %s30_s16 = sshll.u32 %s432_s15, 4  ;;  %s18_s18 = sshll.u32 %s433_s17, 4  ;;  %s31_s16 = int_to_ptr.vmem [resolvable:$true] %s30_s16  ;;  %s466_s18 = int_to_ptr.vmem [resolvable:$true] %s18_s18 }
   0x5   :  { %s314_s21 = scalar_lea.hbm %s557_s1, 1024 }
   0x6   :  { %p315_p0 = scmp.ne.s32.totalorder %s557_s1, %s314_s21  ;;  %p318_p1 = scmp.lt.u32.totalorder %s314_s21, %s557_s1 }
   0x8   :  { %p320_p2 = pnand %p318_p1, %p315_p0 }
   0xa   :  { %323 = shalt.err (!%p320_p2)
}
   0xb   :  { %s324_s26 = scalar_lea.vmem %s31_s16, 1024  ;;  %p329_p4 = scmp.lt.s32.totalorder %s31_s16, %s31_s16 }
   0xc   :  { %p325_p3 = scmp.ne.s32.totalorder %s31_s16, %s324_s26  ;;  %p330_p5 = scmp.lt.s32.totalorder %s324_s26, %s324_s26 }
   0xe   :  { %p331_p6 = por %p330_p5, %p329_p4 }
  0x10   :  { %p332_p7 = pnand %p331_p6, %p325_p3 }
  0x12   :  { %335 = shalt.err (!%p332_p7)
}
  0x13   :  { %s434_s27 = smov 64   ;;  %s435_s28 = smov 4  }
  0x14   :  { %36 = dma.hbm_to_vmem [thread:$0]  %s557_s1, 1024, %s31_s16, [#allocation7], %s434_s27, %s434_s27, %s435_s28  }
  0x15   :  { %s336_s7 = scalar_lea.hbm %s556_s0, 128 }
  0x16   :  { %p337_p8 = scmp.ne.s32.totalorder %s556_s0, %s336_s7  ;;  %p340_p9 = scmp.lt.u32.totalorder %s336_s7, %s556_s0 }
  0x18   :  { %p342_p10 = pnand %p340_p9, %p337_p8 }
  0x1a   :  { %345 = shalt.err (!%p342_p10)
}
  0x1b   :  { %s346_s12 = scalar_lea.vmem %s466_s18, 128  ;;  %p351_p12 = scmp.lt.s32.totalorder %s466_s18, %s466_s18 }
  0x1c   :  { %p347_p11 = scmp.ne.s32.totalorder %s466_s18, %s346_s12  ;;  %p352_p13 = scmp.lt.s32.totalorder %s346_s12, %s346_s12 }
  0x1e   :  { %p353_p0 = por %p352_p13, %p351_p12 }
  0x20   :  { %p354_p1 = pnand %p353_p0, %p347_p11 }
  0x22   :  { %357 = shalt.err (!%p354_p1)
}
  0x23   :  { %24 = dma.hbm_to_vmem [thread:$0]  %s556_s0, 128, %s466_s18, [#allocation4], %s434_s27, %s434_s27, %s435_s28  }
  0x24   :  { %s436_s14 = smov [#allocation8]   ;;  %s437_s16 = smov [#allocation9]  }
  0x25   :  { %s43_s15 = sshll.u32 %s436_s14, 4  ;;  %s52_s17 = sshll.u32 %s437_s16, 4  ;;  %s44_s15 = int_to_ptr.vmem [resolvable:$true] %s43_s15  ;;  %s503_s17 = int_to_ptr.vmem [resolvable:$true] %s52_s17 }
  0x26   :  { %s358_s21 = scalar_lea.hbm %s558_s2, 16 }
  0x27   :  { %p359_p2 = scmp.ne.s32.totalorder %s558_s2, %s358_s21  ;;  %p362_p3 = scmp.lt.u32.totalorder %s358_s21, %s558_s2 }
  0x29   :  { %p364_p4 = pnand %p362_p3, %p359_p2 }
  0x2b   :  { %367 = shalt.err (!%p364_p4)
}
  0x2c   :  { %s368_s0 = scalar_lea.vmem %s44_s15, 16  ;;  %s372_s18 = scalar_lea.vmem %s44_s15, 32 }
  0x2d   :  { %p369_p5 = scmp.ne.s32.totalorder %s44_s15, %s368_s0  ;;  %p373_p6 = scmp.lt.s32.totalorder %s44_s15, %s44_s15 }
  0x2e   :  { %p374_p7 = scmp.lt.s32.totalorder %s372_s18, %s368_s0 }
  0x30   :  { %p375_p8 = por %p374_p7, %p373_p6 }
  0x32   :  { %p376_p9 = pnand %p375_p8, %p369_p5 }
  0x34   :  { %379 = shalt.err (!%p376_p9)
}
  0x35   :  { %46 = dma.hbm_to_vmem [thread:$0]  %s558_s2, 16, %s44_s15, [#allocation7]  }
  0x36   :  { %s380_s6 = scalar_lea.hbm %s559_s3, 128 }
  0x37   :  { %p381_p10 = scmp.ne.s32.totalorder %s559_s3, %s380_s6  ;;  %p384_p11 = scmp.lt.u32.totalorder %s380_s6, %s559_s3 }
  0x39   :  { %p386_p12 = pnand %p384_p11, %p381_p10 }
  0x3b   :  { %389 = shalt.err (!%p386_p12)
}
  0x3c   :  { %s390_s11 = scalar_lea.vmem %s503_s17, 128  ;;  %p395_p0 = scmp.lt.s32.totalorder %s503_s17, %s503_s17 }
  0x3d   :  { %p391_p13 = scmp.ne.s32.totalorder %s503_s17, %s390_s11  ;;  %p396_p1 = scmp.lt.s32.totalorder %s390_s11, %s390_s11 }
  0x3f   :  { %p397_p2 = por %p396_p1, %p395_p0 }
  0x41   :  { %p398_p3 = pnand %p397_p2, %p391_p13 }
  0x43   :  { %401 = shalt.err (!%p398_p3)
}
  0x44   :  { %58 = dma.hbm_to_vmem [thread:$0]  %s559_s3, 128, %s503_s17, [#allocation10], %s434_s27, %s434_s27, %s435_s28  }
  0x45   :  { %424 = dma.done.wait [#allocation4], 128  }
  0x46   :  { %425 = vsyncadd [#allocation4], 4294967168 }
  0x47   :  { %426 = dma.done.wait [#allocation7], 1040  }
  0x48   :  { %427 = vsyncadd [#allocation7], 4294966256 }
  0x49   :  { %428 = dma.done.wait [#allocation10], 128  }
  0x4a   :  { %429 = vsyncadd [#allocation10], 4294967168  ;;  %vm76_vm0 = vcmask 261120   ;;  %v438_v0 = vmov 0.0   ;;  %vm439_vm1 = vmmov 0   ;;  %v305_v1 = vld [vmem:[#allocation6] sm:$0xff]  }
  0x4b   :  { %276 = vmatprep.subr.bf16.mxu0 %v438_v0  ;;  %292 = vmatprep.mubr.msk.bf16.mxu0 %vm439_vm1, %v438_v0  ;;  %77 = vst.msk [vmem:[#allocation2] sm:$0xff] %vm76_vm0, %v438_v0  ;;  %78 = vst.msk [vmem:[#allocation2 + $0x8] sm:$0xff] %vm76_vm0, %v438_v0  ;;  %v306_v2 = vld [vmem:[#allocation6 + $0x8] sm:$0xff]   ;;  %v307_v3 = vld [vmem:[#allocation6 + $0x10] sm:$0xff]   ;;  %vm227_vm2 = vcmask 257024   ;;  %s440_s3 = smov [#allocation11]  }
  0x4c   :  { %277 = vmatpush3.bf16.msra.mxu0 %v305_v1  ;;  %v308_v4 = vld [vmem:[#allocation6 + $0x18] sm:$0xff]   ;;  %v309_v5 = vld [vmem:[#allocation6 + $0x20] sm:$0xff]   ;;  %v310_v6 = vld [vmem:[#allocation6 + $0x28] sm:$0xff]   ;;  %s235_s1 = sshll.u32 %s440_s3, 4  ;;  %s236_s1 = int_to_ptr.vmem [resolvable:$true] %s235_s1 }
  0x4d   :  { %278 = vmatprep.subr.bf16.mxu0 %v438_v0  ;;  %v311_v7 = vld [vmem:[#allocation6 + $0x30] sm:$0xff]   ;;  %v312_v8 = vld [vmem:[#allocation6 + $0x38] sm:$0xff]   ;;  %v264_v18 = vld [vmem:[#allocation9] sm:$0xff]   ;;  %s402_s13 = scalar_lea.vmem %s236_s1, 128  ;;  %p407_p5 = scmp.lt.s32.totalorder %s236_s1, %s236_s1 }
  0x4e   :  { %v313_v9 = vld [vmem:[#allocation3] sm:$0xff]   ;;  %v258_v19 = vld [vmem:[#allocation8] ss:$0 sm:$0xff]  ;;  %v265_v20 = vunpack.c.l.bf16 %v264_v18  ;;  %v266_v23 = vunpack.c.h.bf16 %v264_v18  ;;  %p403_p4 = scmp.ne.s32.totalorder %s236_s1, %s402_s13  ;;  %p408_p6 = scmp.lt.s32.totalorder %s402_s13, %s402_s13 }
  0x50   :  { %279 = vmatpush3.bf16.msra.mxu0 %v306_v2  ;;  %p409_p7 = por %p408_p6, %p407_p5 }
  0x51   :  { %280 = vmatprep.subr.bf16.mxu0 %v438_v0 }
  0x52   :  { %v79_v10 = vld [vmem:[#allocation2] sm:$0xff]  ;;  %v80_v12 = vld [vmem:[#allocation2 + $0x8] sm:$0xff]  ;;  %p410_p8 = pnand %p409_p7, %p403_p4 }
  0x54   :  { %281 = vmatpush3.bf16.msra.mxu0 %v307_v3 }
  0x55   :  { %282 = vmatprep.subr.bf16.mxu0 %v438_v0 }
  0x58   :  { %283 = vmatpush3.bf16.msra.mxu0 %v308_v4 }
  0x59   :  { %284 = vmatprep.subr.bf16.mxu0 %v438_v0 }
  0x5c   :  { %285 = vmatpush3.bf16.msra.mxu0 %v309_v5 }
  0x5d   :  { %286 = vmatprep.subr.bf16.mxu0 %v438_v0 }
  0x60   :  { %287 = vmatpush3.bf16.msra.mxu0 %v310_v6 }
  0x61   :  { %288 = vmatprep.subr.bf16.mxu0 %v438_v0 }
  0x64   :  { %289 = vmatpush3.bf16.msra.mxu0 %v311_v7 }
  0x65   :  { %290 = vmatprep.subr.bf16.mxu0 %v438_v0 }
  0x68   :  { %291 = vmatpush3.bf16.msra.mxu0 %v312_v8 }
  0x6b   :  { %293 = vmatmul.mubr.bf16.vlgmr.msra.gmra.mrb[0].mxu0 %v313_v9 }
 0x13e   :  { %v187_v11 = vpop.f32.mrb[0].mxu0 }
 0x13f   :  { %v194_v13 = vadd.f32 %v187_v11, %v79_v10  ;;  %v294_v14 = vpop.f32.mrb[1].mxu0 }
 0x140   :  { %v190_v15 = vpop.f32.mrb[2].mxu0 }
 0x141   :  { %197 = vst.msk [vmem:[#allocation2] sm:$0xff] %vm76_vm0, %v194_v13  ;;  %v195_v16 = vadd.f32 %v190_v15, %v80_v12  ;;  %v295_v17 = vpop.f32.mrb[3].mxu0 }
 0x143   :  { %198 = vst.msk [vmem:[#allocation2 + $0x8] sm:$0xff] %vm76_vm0, %v195_v16 }
 0x148   :  { %v202_v21 = vld [vmem:[#allocation2] sm:$0xff] }
 0x149   :  { %v211_v22 = vadd.f32 %v258_v19, %v202_v21 }
 0x14a   :  { %v203_v24 = vld [vmem:[#allocation2 + $0x8] sm:$0xff] }
 0x14b   :  { %v212_v25 = vadd.f32 %v258_v19, %v203_v24  ;;  %v217_v26 = vadd.f32 %v265_v20, %v211_v22 }
 0x14d   :  { %v218_v27 = vadd.f32 %v266_v23, %v212_v25  ;;  %v261_v28 = vpack.c.bf16 %v217_v26, %v217_v26 }
 0x14f   :  { %v262_v29 = vpack.c.bf16 %v218_v27, %v218_v27  ;;  %228 = vst.msk [vmem:[#allocation11] sm:$0xf] %vm227_vm2, %v261_v28 }
 0x151   :  { %229 = vst.msk [vmem:[#allocation11 + $0x4] sm:$0xf] %vm227_vm2, %v262_v29 }
 0x152   :  { %413 = shalt.err (!%p410_p8)
}
 0x153   :  { %s414_s16 = scalar_lea.hbm %s560_s4, 128 }
 0x154   :  { %p415_p9 = scmp.ne.s32.totalorder %s560_s4, %s414_s16  ;;  %p418_p10 = scmp.lt.u32.totalorder %s414_s16, %s560_s4 }
 0x156   :  { %p420_p11 = pnand %p418_p10, %p415_p9 }
 0x158   :  { %423 = shalt.err (!%p420_p11)
}
 0x159   :  { %241 = dma.vmem_to_hbm [thread:$0]  %s236_s1, 128, %s560_s4, [#allocation5], %s434_s27, %s434_s27, %s435_s28  }
 0x15a   :  { %430 = dma.done.wait [#allocation5], 128  }
 0x15b   :  { %431 = vsyncadd [#allocation5], 4294967168 }
 0x15c   :  { %245 = vsyncpa [#allocation4], 1 }
 0x15d   :  { %246 = vsyncpa [#allocation7], 1 }
 0x15e   :  { %247 = vsyncpa [#allocation10], 1 }
 0x15f   :  { %248 = vsyncpa [#allocation5], 1 }

// kernel: decoder_forward.51
= control target key start
LH: loop header
LB: loop body
LE: loop exit
PB: predicated region body
PF: predicated region fallthrough
CT: control target
= control target key end

     0   :  { %7 = vsyncpa [#allocation4], 0  ;;  %s352_s0 = inlined_call_operand.hbm [shape: bf16[16,32], index: 0, kind: input, shape index: {}]   ;;  %s353_s1 = inlined_call_operand.hbm [shape: bf16[64,32], index: 1, kind: input, shape index: {}]   ;;  %s354_s2 = inlined_call_operand.hbm [shape: f32[16,64], index: 2, kind: output, shape index: {}]  }
   0x1   :  { %8 = vsyncpa [#allocation7], 0 }
   0x2   :  { %9 = vsyncpa [#allocation5], 0  ;;  %s281_s9 = smov [#allocation3]   ;;  %s209_s13 = scalar_lea.hbm %s352_s0, 128 }
   0x3   :  { %s15_s10 = sshll.u32 %s281_s9, 4  ;;  %p210_p0 = scmp.ne.s32.totalorder %s352_s0, %s209_s13  ;;  %s16_s10 = int_to_ptr.vmem [resolvable:$true] %s15_s10 }
   0x4   :  { %p213_p1 = scmp.lt.u32.totalorder %s209_s13, %s352_s0 }
   0x6   :  { %p215_p2 = pnand %p213_p1, %p210_p0 }
   0x8   :  { %218 = shalt.err (!%p215_p2)
}
   0x9   :  { %s219_s18 = scalar_lea.vmem %s16_s10, 128  ;;  %p224_p4 = scmp.lt.s32.totalorder %s16_s10, %s16_s10 }
   0xa   :  { %p220_p3 = scmp.ne.s32.totalorder %s16_s10, %s219_s18  ;;  %p225_p5 = scmp.lt.s32.totalorder %s219_s18, %s219_s18 }
   0xc   :  { %p226_p6 = por %p225_p5, %p224_p4 }
   0xe   :  { %p227_p7 = pnand %p226_p6, %p220_p3 }
  0x10   :  { %230 = shalt.err (!%p227_p7)
}
  0x11   :  { %s282_s19 = smov 64   ;;  %s283_s20 = smov 4  }
  0x12   :  { %21 = dma.hbm_to_vmem [thread:$0]  %s352_s0, 128, %s16_s10, [#allocation4], %s282_s19, %s282_s19, %s283_s20  }
  0x13   :  { %s284_s23 = smov [#allocation6]   ;;  %s231_s27 = scalar_lea.hbm %s353_s1, 512 }
  0x14   :  { %s27_s24 = sshll.u32 %s284_s23, 4  ;;  %p232_p8 = scmp.ne.s32.totalorder %s353_s1, %s231_s27  ;;  %s28_s24 = int_to_ptr.vmem [resolvable:$true] %s27_s24 }
  0x15   :  { %p235_p9 = scmp.lt.u32.totalorder %s231_s27, %s353_s1 }
  0x17   :  { %p237_p10 = pnand %p235_p9, %p232_p8 }
  0x19   :  { %240 = shalt.err (!%p237_p10)
}
  0x1a   :  { %s241_s4 = scalar_lea.vmem %s28_s24, 512  ;;  %p246_p12 = scmp.lt.s32.totalorder %s28_s24, %s28_s24 }
  0x1b   :  { %p242_p11 = scmp.ne.s32.totalorder %s28_s24, %s241_s4  ;;  %p247_p13 = scmp.lt.s32.totalorder %s241_s4, %s241_s4 }
  0x1d   :  { %p248_p0 = por %p247_p13, %p246_p12 }
  0x1f   :  { %p249_p1 = pnand %p248_p0, %p242_p11 }
  0x21   :  { %252 = shalt.err (!%p249_p1)
}
  0x22   :  { %33 = dma.hbm_to_vmem [thread:$0]  %s353_s1, 512, %s28_s24, [#allocation7], %s282_s19, %s282_s19, %s283_s20  }
  0x23   :  { %275 = dma.done.wait [#allocation4], 128  }
  0x24   :  { %276 = vsyncadd [#allocation4], 4294967168 }
  0x25   :  { %277 = dma.done.wait [#allocation7], 512  }
  0x26   :  { %278 = vsyncadd [#allocation7], 4294966784  ;;  %vm45_vm0 = vcmask 523264   ;;  %v285_v0 = vmov 0.0   ;;  %vm286_vm1 = vmmov 0   ;;  %vm85_vm2 = vcmask 261120  }
  0x27   :  { %183 = vmatprep.subr.bf16.mxu0 %v285_v0  ;;  %191 = vmatprep.mubr.msk.bf16.mxu0 %vm286_vm1, %v285_v0  ;;  %46 = vst.msk [vmem:[#allocation2] sm:$0xff] %vm45_vm0, %v285_v0  ;;  %47 = vst.msk [vmem:[#allocation2 + $0x8] sm:$0xff] %vm45_vm0, %v285_v0  ;;  %v204_v1 = vld [vmem:[#allocation6] sm:$0xff]   ;;  %v205_v3 = vld [vmem:[#allocation6 + $0x8] sm:$0xff]   ;;  %s287_s1 = smov [#allocation8]  }
  0x28   :  { %v90_v2 = vsel %vm85_vm2, %v204_v1, 0  ;;  %v93_v4 = vsel %vm85_vm2, %v205_v3, 0  ;;  %v206_v5 = vld [vmem:[#allocation6 + $0x10] sm:$0xff]   ;;  %v207_v7 = vld [vmem:[#allocation6 + $0x18] sm:$0xff]   ;;  %s159_s6 = sshll.u32 %s287_s1, 4  ;;  %s160_s6 = int_to_ptr.vmem [resolvable:$true] %s159_s6 }
  0x29   :  { %184 = vmatpush3.bf16.xpose.msra.mxu0 %v90_v2  ;;  %v96_v6 = vsel %vm85_vm2, %v206_v5, 0  ;;  %v99_v8 = vsel %vm85_vm2, %v207_v7, 0  ;;  %v208_v9 = vld [vmem:[#allocation3] sm:$0xff]   ;;  %s253_s7 = scalar_lea.vmem %s160_s6, 256  ;;  %p258_p3 = scmp.lt.s32.totalorder %s160_s6, %s160_s6 }
  0x2a   :  { %185 = vmatprep.subr.bf16.mxu0 %v285_v0  ;;  %p254_p2 = scmp.ne.s32.totalorder %s160_s6, %s253_s7  ;;  %p259_p4 = scmp.lt.s32.totalorder %s253_s7, %s253_s7 }
  0x2c   :  { %p260_p5 = por %p259_p4, %p258_p3 }
  0x2e   :  { %v48_v10 = vld [vmem:[#allocation2] sm:$0xff]  ;;  %v49_v12 = vld [vmem:[#allocation2 + $0x8] sm:$0xff]  ;;  %p261_p6 = pnand %p260_p5, %p254_p2 }
  0x31   :  { %186 = vmatpush3.bf16.xpose.msra.mxu0 %v93_v4 }
  0x32   :  { %187 = vmatprep.subr.bf16.mxu0 %v285_v0 }
  0x39   :  { %188 = vmatpush3.bf16.xpose.msra.mxu0 %v96_v6 }
  0x3a   :  { %189 = vmatprep.subr.bf16.mxu0 %v285_v0 }
  0x41   :  { %190 = vmatpush3.bf16.xpose.msra.mxu0 %v99_v8 }
  0x48   :  { %192 = vmatmul.mubr.msk.bf16.vlgmr.msra.gmra.mrb[0].mxu0 %vm85_vm2, %v208_v9 }
 0x11b   :  { %v135_v11 = vpop.f32.mrb[0].mxu0 }
 0x11c   :  { %v142_v13 = vadd.f32 %v135_v11, %v48_v10  ;;  %v193_v14 = vpop.f32.mrb[1].mxu0 }
 0x11d   :  { %v138_v15 = vpop.f32.mrb[2].mxu0 }
 0x11e   :  { %145 = vst.msk [vmem:[#allocation2] sm:$0xff] %vm45_vm0, %v142_v13  ;;  %v143_v16 = vadd.f32 %v138_v15, %v49_v12  ;;  %v194_v17 = vpop.f32.mrb[3].mxu0 }
 0x120   :  { %146 = vst.msk [vmem:[#allocation2 + $0x8] sm:$0xff] %vm45_vm0, %v143_v16 }
 0x125   :  { %v150_v18 = vld [vmem:[#allocation2] sm:$0xff] }
 0x126   :  { %152 = vst.msk [vmem:[#allocation8] sm:$0xff] %vm45_vm0, %v150_v18 }
 0x127   :  { %v151_v19 = vld [vmem:[#allocation2 + $0x8] sm:$0xff] }
 0x128   :  { %153 = vst.msk [vmem:[#allocation8 + $0x8] sm:$0xff] %vm45_vm0, %v151_v19 }
 0x129   :  { %264 = shalt.err (!%p261_p6)
}
 0x12a   :  { %s265_s10 = scalar_lea.hbm %s354_s2, 256 }
 0x12b   :  { %p266_p7 = scmp.ne.s32.totalorder %s354_s2, %s265_s10  ;;  %p269_p8 = scmp.lt.u32.totalorder %s265_s10, %s354_s2 }
 0x12d   :  { %p271_p9 = pnand %p269_p8, %p266_p7 }
 0x12f   :  { %274 = shalt.err (!%p271_p9)
}
 0x130   :  { %s288_s15 = smov 128   ;;  %s289_s16 = smov 8  }
 0x131   :  { %165 = dma.vmem_to_hbm [thread:$0]  %s160_s6, 256, %s354_s2, [#allocation5], %s288_s15, %s288_s15, %s289_s16  }
 0x132   :  { %279 = dma.done.wait [#allocation5], 256  }
 0x133   :  { %280 = vsyncadd [#allocation5], 4294967040 }
 0x134   :  { %169 = vsyncpa [#allocation4], 1 }
 0x135   :  { %170 = vsyncpa [#allocation7], 1 }
 0x136   :  { %171 = vsyncpa [#allocation5], 1 }

</bundles_post_ra>
